<compile_context>
chip_gen: v6e
topology: v6e:2x2x1
jax: 0.10.0
libtpu: 0.0.40
codegen_flags: <defaults>
</compile_context>

<pallas_src>
import jax
import jax.numpy as jnp
from jax.experimental import pallas as pl
from jax.experimental.pallas import tpu as pltpu

# ----- "ck" config (synthetic, deterministic) --------------------------------
N_STATE = 16      # ck.n_state
N_MDP = 8         # ck.n_mdp
N_ACTION = 4      # ck.n_action
D_H11 = D_H12 = D_H13 = 5
D_H1 = D_H11 + D_H12 + D_H13          # 15
D_H2 = 32
D_H3 = 32
D_IN = N_STATE + N_MDP + 2            # 26 fused input features

PAD_F = 128          # lane padding for the hidden feature axes
W1_ROWS = 32         # fused layer-1 weight rows (26 real, padded to 32)
OUT_PAD = 8          # narrow output lanes (4 real actions)
BATCH_ALIGN = 128    # batch-tile granularity
MAX_BATCH_TILE = 512 # sweepable; bias higher (1024-2048) on v7x if desired


# ----- Pallas kernel ----------------------------------------------------------
def actionnn_kernel(obs_ref, bel_ref, cm_ref, w1_ref, w_ref, b_ref, out_ref):
    """Whole ActionNN forward for one batch tile.

    obs_ref : (tile, 16)   observation
    bel_ref : (tile, 8)    belief
    cm_ref  : (tile, 2)    [cost | max_cost]
    w1_ref  : (32, 128)    block-structured fused layer-1 weight (rows 26: zero)
    w_ref   : (3, 128, 128) layers 2..4 weights (zero-padded)
    b_ref   : (4, 1, 128)  biases; b[3] lanes >= N_ACTION hold -1e30
    out_ref : (tile, 8)    softmax probabilities (lanes >= N_ACTION are 0)
    """
    f32 = jnp.float32
    hp = jax.lax.Precision.HIGHEST

    # Fused layer1: the three branch Linears of the block-structured weight.
    # obs / bel go through the MXU; the 2-feature [cost|max_cost] branch is two
    # rank-1 broadcast terms (cheaper than a K=2 matmul).  Branch outputs land
    # contiguously in lanes 0:15.
    cm = cm_ref[...]
    h1 = jnp.dot(obs_ref[...], w1_ref[0:N_STATE, :],
                 preferred_element_type=f32, precision=hp)
    h1 += jnp.dot(bel_ref[...], w1_ref[N_STATE:N_STATE + N_MDP, :],
                  preferred_element_type=f32, precision=hp)
    h1 += cm[:, 0:1] * w1_ref[D_IN - 2:D_IN - 1, :]
    h1 += cm[:, 1:2] * w1_ref[D_IN - 1:D_IN, :]
    h1 = jnp.maximum(h1 + b_ref[0], 0.0)

    # layer2
    h2 = jnp.maximum(
        jnp.dot(h1, w_ref[0], preferred_element_type=f32, precision=hp)
        + b_ref[1], 0.0)

    # layer3 + residual (padded lanes of h2/h3 stay exactly 0: zero-padded W,b)
    h3 = jnp.maximum(
        jnp.dot(h2, w_ref[1], preferred_element_type=f32, precision=hp)
        + b_ref[2], 0.0) + h2

    # layer4 + softmax.  Bias lanes >= N_ACTION were packed as -1e30, so no
    # iota/where masking is needed: exp(-1e30 - m) underflows to exactly 0.
    logits = jnp.dot(h3, w_ref[2], preferred_element_type=f32, precision=hp) + b_ref[3]
    logits = logits[:, 0:OUT_PAD]                       # (tile, 8)
    m = jnp.max(logits, axis=-1, keepdims=True)
    e = jnp.exp(logits - m)
    denom = jnp.sum(e, axis=-1, keepdims=True)
    # exact reciprocal to keep the 1e-5 tolerance vs the f32 reference
    out_ref[...] = e * pl.reciprocal(denom, approx=False)


# ----- One-time parameter packing (hoisted out of the forward path) -----------
def pack_params(params):
    """Pack all Linear layers into packed, lane-padded device buffers."""
    # fused layer1 (block-structured: three branches side by side, rows 26: 0)
    w1 = jnp.zeros((W1_ROWS, PAD_F), jnp.float32)
    w1 = w1.at[0:N_STATE, 0:D_H11].set(params["w11"].T)
    w1 = w1.at[N_STATE:N_STATE + N_MDP, D_H11:D_H11 + D_H12].set(params["w12"].T)
    w1 = w1.at[N_STATE + N_MDP:D_IN, D_H11 + D_H12:D_H1].set(params["w13"].T)

    # layers 2..4 (zero padding keeps the ReLU / residual invariant)
    w = jnp.zeros((3, PAD_F, PAD_F), jnp.float32)
    w = w.at[0, 0:D_H1, 0:D_H2].set(params["w2"].T)
    w = w.at[1, 0:D_H2, 0:D_H3].set(params["w3"].T)
    w = w.at[2, 0:D_H3, 0:N_ACTION].set(params["w4"].T)

    b = jnp.zeros((4, 1, PAD_F), jnp.float32)
    b = b.at[0, 0, 0:D_H11].set(params["b11"])
    b = b.at[0, 0, D_H11:D_H11 + D_H12].set(params["b12"])
    b = b.at[0, 0, D_H11 + D_H12:D_H1].set(params["b13"])
    b = b.at[1, 0, 0:D_H2].set(params["b2"])
    b = b.at[2, 0, 0:D_H3].set(params["b3"])
    b = b.at[3, 0, 0:N_ACTION].set(params["b4"])
    # layer-4 bias only: finite -1e30 pad removes the in-kernel softmax mask
    b = b.at[3, 0, N_ACTION:].set(-1e30)
    return w1, w, b


# ----- Wrapper ----------------------------------------------------------------
def action_nn_forward(w1_packed, w_packed, b_packed, obs, bel, cost, max_cost):
    """obs: (B, n_state), bel: (B, n_mdp), cost/max_cost: (B, 1) -> (B, n_action)."""
    b_in = obs.shape[0]

    # Batch tile: grow toward MAX_BATCH_TILE to amortize per-step grid overhead
    # but keep >= 2 grid steps when possible (feeds v7x's second TensorCore).
    half = pl.cdiv(max(1, (b_in + 1) // 2), BATCH_ALIGN) * BATCH_ALIGN
    tile = min(MAX_BATCH_TILE, max(BATCH_ALIGN, half))
    b_pad = pl.cdiv(b_in, tile) * tile
    n_tiles = b_pad // tile

    obs = obs.astype(jnp.float32)
    bel = bel.astype(jnp.float32)
    cm = jnp.concatenate([cost, max_cost], axis=-1).astype(jnp.float32)  # (B, 2)
    pad = b_pad - b_in
    if pad:  # only materializes when B is not a tile multiple (narrow arrays)
        obs = jnp.pad(obs, ((0, pad), (0, 0)))
        bel = jnp.pad(bel, ((0, pad), (0, 0)))
        cm = jnp.pad(cm, ((0, pad), (0, 0)))

    out_p = pl.pallas_call(
        actionnn_kernel,
        out_shape=jax.ShapeDtypeStruct((b_pad, OUT_PAD), jnp.float32),
        grid=(n_tiles,),
        in_specs=[
            pl.BlockSpec((tile, N_STATE), lambda i: (i, 0)),         # obs tile
            pl.BlockSpec((tile, N_MDP), lambda i: (i, 0)),           # bel tile
            pl.BlockSpec((tile, 2), lambda i: (i, 0)),               # [cost|max_cost]
            pl.BlockSpec((W1_ROWS, PAD_F), lambda i: (0, 0)),        # w1 (resident)
            pl.BlockSpec((3, PAD_F, PAD_F), lambda i: (0, 0, 0)),    # w2..w4 (resident)
            pl.BlockSpec((4, 1, PAD_F), lambda i: (0, 0, 0)),        # biases (resident)
        ],
        out_specs=pl.BlockSpec((tile, OUT_PAD), lambda i: (i, 0)),
        compiler_params=pltpu.CompilerParams(
            dimension_semantics=("parallel",)),   # megacore split on v7x
    )(obs, bel, cm, w1_packed, w_packed, b_packed)

    return out_p[:b_in, :N_ACTION]


# ----- Parameter init (deterministic, PyTorch-Linear-like uniform) ------------
def init_params(key):
    def linear(key, d_in, d_out):
        k1, k2 = jax.random.split(key)
        bound = 1.0 / jnp.sqrt(d_in)
        w = jax.random.uniform(k1, (d_out, d_in), jnp.float32, -bound, bound)
        b = jax.random.uniform(k2, (d_out,), jnp.float32, -bound, bound)
        return w, b

    keys = jax.random.split(key, 6)
    p = {}
    p["w11"], p["b11"] = linear(keys[0], N_STATE, D_H11)
    p["w12"], p["b12"] = linear(keys[1], N_MDP, D_H12)
    p["w13"], p["b13"] = linear(keys[2], 2, D_H13)
    p["w2"], p["b2"] = linear(keys[3], D_H1, D_H2)
    p["w3"], p["b3"] = linear(keys[4], D_H2, D_H3)
    p["w4"], p["b4"] = linear(keys[5], D_H3, N_ACTION)
    return p


# ----- Pure-JAX reference (for sanity check; full-f32 matmuls) -----------------
def reference_forward(p, obs, bel, cost, max_cost):
    hp = jax.lax.Precision.HIGHEST
    dot = lambda a, w: jnp.dot(a, w.T, precision=hp)
    relu = lambda x: jnp.maximum(x, 0.0)
    y1 = relu(dot(obs, p["w11"]) + p["b11"])
    y2 = relu(dot(bel, p["w12"]) + p["b12"])
    y3 = relu(dot(jnp.concatenate([cost, max_cost], -1), p["w13"]) + p["b13"])
    y = jnp.concatenate([y1, y2, y3], axis=-1)
    h2 = relu(dot(y, p["w2"]) + p["b2"])
    h3 = relu(dot(h2, p["w3"]) + p["b3"]) + h2
    logits = dot(h3, p["w4"]) + p["b4"]
    return jax.nn.softmax(logits, axis=-1)


if __name__ == "__main__":
    key = jax.random.PRNGKey(0)
    kp, k1, k2, k3, k4 = jax.random.split(key, 5)
    params = init_params(kp)

    # one-time pack (NOT in the per-call path)
    w1_packed, w_packed, b_packed = jax.block_until_ready(pack_params(params))

    B = 256  # -> tile=128, 2 grid steps (keeps both v7x TensorCores busy)
    obs = jax.random.normal(k1, (B, N_STATE), jnp.float32)
    bel = jax.random.normal(k2, (B, N_MDP), jnp.float32)
    cost = jax.random.uniform(k3, (B, 1), jnp.float32)
    max_cost = jax.random.uniform(k4, (B, 1), jnp.float32)

    # TODO(synk): nn.Dropout (p=0.3) is identity in eval mode and is omitted.
    fwd = jax.jit(action_nn_forward)
    out = jax.block_until_ready(
        fwd(w1_packed, w_packed, b_packed, obs, bel, cost, max_cost))

    ref = reference_forward(params, obs, bel, cost, max_cost)
    assert out.shape == (B, N_ACTION)
    assert jnp.allclose(out, ref, atol=1e-5, rtol=1e-5), "mismatch vs reference"
    print("KERNEL_OK")
</pallas_src>

<mosaic_0001>
module attributes {stable_mosaic.version = 11 : i64} {
  func.func @actionnn_kernel(%arg0: i32, %arg1: memref<128x16xf32, #tpu.memory_space<vmem>>, %arg2: memref<128x8xf32, #tpu.memory_space<vmem>>, %arg3: memref<128x2xf32, #tpu.memory_space<vmem>>, %arg4: memref<32x128xf32, #tpu.memory_space<vmem>>, %arg5: memref<3x128x128xf32, #tpu.memory_space<vmem>>, %arg6: memref<4x1x128xf32, #tpu.memory_space<vmem>>, %arg7: memref<128x8xf32, #tpu.memory_space<vmem>>) attributes {dimension_semantics = [#tpu.dimension_semantics<parallel>], iteration_bounds = array<i64: 2>, scalar_prefetch = 0 : i64, scratch_operands = 0 : i64, tpu.core_type = #tpu.core_type<tc>, window_params = [{transform_indices = @transform_0, window_bounds = array<i64: 128, 16>}, {transform_indices = @transform_1, window_bounds = array<i64: 128, 8>}, {transform_indices = @transform_2, window_bounds = array<i64: 128, 2>}, {pipeline_mode = #tpu.pipeline_mode<synchronous>, transform_indices = @transform_3, window_bounds = array<i64: 32, 128>}, {pipeline_mode = #tpu.pipeline_mode<synchronous>, transform_indices = @transform_4, window_bounds = array<i64: 3, 128, 128>}, {pipeline_mode = #tpu.pipeline_mode<synchronous>, transform_indices = @transform_5, window_bounds = array<i64: 4, 1, 128>}, {transform_indices = @transform_6, window_bounds = array<i64: 128, 8>}]} {
    %c0 = arith.constant 0 : index
    %c0_0 = arith.constant 0 : index
    %0 = vector.load %arg3[%c0, %c0_0] : memref<128x2xf32, #tpu.memory_space<vmem>>, vector<128x2xf32>
    %c0_1 = arith.constant 0 : index
    %c0_2 = arith.constant 0 : index
    %1 = vector.load %arg1[%c0_1, %c0_2] : memref<128x16xf32, #tpu.memory_space<vmem>>, vector<128x16xf32>
    %c0_3 = arith.constant 0 : index
    %c0_4 = arith.constant 0 : index
    %2 = vector.load %arg4[%c0_3, %c0_4] : memref<32x128xf32, #tpu.memory_space<vmem>>, vector<16x128xf32>
    %cst = arith.constant dense<0.000000e+00> : vector<128x128xf32>
    %3 = tpu.matmul %1, %2, %cst {dimension_numbers = #tpu.dot_dimension_numbers<[1], [0], [0], [1], [0, 0, 1, 1], [], []>, precision = #tpu.contract_precision<fp32>} : vector<128x16xf32>, vector<16x128xf32>, vector<128x128xf32> -> vector<128x128xf32>
    %c0_5 = arith.constant 0 : index
    %c0_6 = arith.constant 0 : index
    %4 = vector.load %arg2[%c0_5, %c0_6] : memref<128x8xf32, #tpu.memory_space<vmem>>, vector<128x8xf32>
    %c16 = arith.constant 16 : index
    %c0_7 = arith.constant 0 : index
    %5 = vector.load %arg4[%c16, %c0_7] : memref<32x128xf32, #tpu.memory_space<vmem>>, vector<8x128xf32>
    %cst_8 = arith.constant dense<0.000000e+00> : vector<128x128xf32>
    %6 = tpu.matmul %4, %5, %cst_8 {dimension_numbers = #tpu.dot_dimension_numbers<[1], [0], [0], [1], [0, 0, 1, 1], [], []>, precision = #tpu.contract_precision<fp32>} : vector<128x8xf32>, vector<8x128xf32>, vector<128x128xf32> -> vector<128x128xf32>
    %7 = arith.addf %3, %6 : vector<128x128xf32>
    %8 = vector.extract_strided_slice %0 {offsets = [0, 0], sizes = [128, 1], strides = [1, 1]} : vector<128x2xf32> to vector<128x1xf32>
    %c24 = arith.constant 24 : index
    %c0_9 = arith.constant 0 : index
    %9 = vector.load %arg4[%c24, %c0_9] : memref<32x128xf32, #tpu.memory_space<vmem>>, vector<1x128xf32>
    %10 = vector.broadcast %8 : vector<128x1xf32> to vector<128x128xf32>
    %11 = vector.broadcast %9 : vector<1x128xf32> to vector<128x128xf32>
    %12 = arith.mulf %10, %11 : vector<128x128xf32>
    %13 = arith.addf %7, %12 : vector<128x128xf32>
    %14 = vector.extract_strided_slice %0 {offsets = [0, 1], sizes = [128, 1], strides = [1, 1]} : vector<128x2xf32> to vector<128x1xf32>
    %c25 = arith.constant 25 : index
    %c0_10 = arith.constant 0 : index
    %15 = vector.load %arg4[%c25, %c0_10] : memref<32x128xf32, #tpu.memory_space<vmem>>, vector<1x128xf32>
    %16 = vector.broadcast %14 : vector<128x1xf32> to vector<128x128xf32>
    %17 = vector.broadcast %15 : vector<1x128xf32> to vector<128x128xf32>
    %18 = arith.mulf %16, %17 : vector<128x128xf32>
    %19 = arith.addf %13, %18 : vector<128x128xf32>
    %c0_11 = arith.constant 0 : index
    %c0_12 = arith.constant 0 : index
    %c0_13 = arith.constant 0 : index
    %20 = vector.load %arg6[%c0_11, %c0_12, %c0_13] : memref<4x1x128xf32, #tpu.memory_space<vmem>>, vector<1x1x128xf32>
    %21 = vector.shape_cast %20 : vector<1x1x128xf32> to vector<1x128xf32>
    %22 = vector.broadcast %21 : vector<1x128xf32> to vector<128x128xf32>
    %23 = arith.addf %19, %22 : vector<128x128xf32>
    %cst_14 = arith.constant 0.000000e+00 : f32
    %24 = vector.broadcast %cst_14 : f32 to vector<128x128xf32>
    %25 = arith.maximumf %23, %24 : vector<128x128xf32>
    %c0_15 = arith.constant 0 : index
    %c0_16 = arith.constant 0 : index
    %c0_17 = arith.constant 0 : index
    %26 = vector.load %arg5[%c0_15, %c0_16, %c0_17] : memref<3x128x128xf32, #tpu.memory_space<vmem>>, vector<1x128x128xf32>
    %27 = vector.shape_cast %26 : vector<1x128x128xf32> to vector<128x128xf32>
    %cst_18 = arith.constant dense<0.000000e+00> : vector<128x128xf32>
    %28 = tpu.matmul %25, %27, %cst_18 {dimension_numbers = #tpu.dot_dimension_numbers<[1], [0], [0], [1], [0, 0, 1, 1], [], []>, precision = #tpu.contract_precision<fp32>} : vector<128x128xf32>, vector<128x128xf32>, vector<128x128xf32> -> vector<128x128xf32>
    %c1 = arith.constant 1 : index
    %c0_19 = arith.constant 0 : index
    %c0_20 = arith.constant 0 : index
    %29 = vector.load %arg6[%c1, %c0_19, %c0_20] : memref<4x1x128xf32, #tpu.memory_space<vmem>>, vector<1x1x128xf32>
    %30 = vector.shape_cast %29 : vector<1x1x128xf32> to vector<1x128xf32>
    %31 = vector.broadcast %30 : vector<1x128xf32> to vector<128x128xf32>
    %32 = arith.addf %28, %31 : vector<128x128xf32>
    %cst_21 = arith.constant 0.000000e+00 : f32
    %33 = vector.broadcast %cst_21 : f32 to vector<128x128xf32>
    %34 = arith.maximumf %32, %33 : vector<128x128xf32>
    %c1_22 = arith.constant 1 : index
    %c0_23 = arith.constant 0 : index
    %c0_24 = arith.constant 0 : index
    %35 = vector.load %arg5[%c1_22, %c0_23, %c0_24] : memref<3x128x128xf32, #tpu.memory_space<vmem>>, vector<1x128x128xf32>
    %36 = vector.shape_cast %35 : vector<1x128x128xf32> to vector<128x128xf32>
    %cst_25 = arith.constant dense<0.000000e+00> : vector<128x128xf32>
    %37 = tpu.matmul %34, %36, %cst_25 {dimension_numbers = #tpu.dot_dimension_numbers<[1], [0], [0], [1], [0, 0, 1, 1], [], []>, precision = #tpu.contract_precision<fp32>} : vector<128x128xf32>, vector<128x128xf32>, vector<128x128xf32> -> vector<128x128xf32>
    %c2 = arith.constant 2 : index
    %c0_26 = arith.constant 0 : index
    %c0_27 = arith.constant 0 : index
    %38 = vector.load %arg6[%c2, %c0_26, %c0_27] : memref<4x1x128xf32, #tpu.memory_space<vmem>>, vector<1x1x128xf32>
    %39 = vector.shape_cast %38 : vector<1x1x128xf32> to vector<1x128xf32>
    %40 = vector.broadcast %39 : vector<1x128xf32> to vector<128x128xf32>
    %41 = arith.addf %37, %40 : vector<128x128xf32>
    %cst_28 = arith.constant 0.000000e+00 : f32
    %42 = vector.broadcast %cst_28 : f32 to vector<128x128xf32>
    %43 = arith.maximumf %41, %42 : vector<128x128xf32>
    %44 = arith.addf %43, %34 : vector<128x128xf32>
    %c2_29 = arith.constant 2 : index
    %c0_30 = arith.constant 0 : index
    %c0_31 = arith.constant 0 : index
    %45 = vector.load %arg5[%c2_29, %c0_30, %c0_31] : memref<3x128x128xf32, #tpu.memory_space<vmem>>, vector<1x128x128xf32>
    %46 = vector.shape_cast %45 : vector<1x128x128xf32> to vector<128x128xf32>
    %cst_32 = arith.constant dense<0.000000e+00> : vector<128x128xf32>
    %47 = tpu.matmul %44, %46, %cst_32 {dimension_numbers = #tpu.dot_dimension_numbers<[1], [0], [0], [1], [0, 0, 1, 1], [], []>, precision = #tpu.contract_precision<fp32>} : vector<128x128xf32>, vector<128x128xf32>, vector<128x128xf32> -> vector<128x128xf32>
    %c3 = arith.constant 3 : index
    %c0_33 = arith.constant 0 : index
    %c0_34 = arith.constant 0 : index
    %48 = vector.load %arg6[%c3, %c0_33, %c0_34] : memref<4x1x128xf32, #tpu.memory_space<vmem>>, vector<1x1x128xf32>
    %49 = vector.shape_cast %48 : vector<1x1x128xf32> to vector<1x128xf32>
    %50 = vector.broadcast %49 : vector<1x128xf32> to vector<128x128xf32>
    %51 = arith.addf %47, %50 : vector<128x128xf32>
    %52 = vector.extract_strided_slice %51 {offsets = [0, 0], sizes = [128, 8], strides = [1, 1]} : vector<128x128xf32> to vector<128x8xf32>
    %cst_35 = arith.constant dense<0xFF800000> : vector<128xf32>
    %53 = vector.multi_reduction <maximumf>, %52, %cst_35 [1] : vector<128x8xf32> to vector<128xf32>
    %54 = vector.shape_cast %53 : vector<128xf32> to vector<128x1xf32>
    %55 = vector.broadcast %54 : vector<128x1xf32> to vector<128x8xf32>
    %56 = arith.subf %52, %55 : vector<128x8xf32>
    %57 = math.exp %56 : vector<128x8xf32>
    %cst_36 = arith.constant dense<0.000000e+00> : vector<128xf32>
    %58 = vector.multi_reduction <add>, %57, %cst_36 [1] : vector<128x8xf32> to vector<128xf32>
    %59 = vector.shape_cast %58 : vector<128xf32> to vector<128x1xf32>
    %60 = tpu.reciprocal %59 : vector<128x1xf32> -> vector<128x1xf32>
    %61 = vector.broadcast %60 : vector<128x1xf32> to vector<128x8xf32>
    %62 = arith.mulf %57, %61 : vector<128x8xf32>
    %c0_37 = arith.constant 0 : index
    %c0_38 = arith.constant 0 : index
    %63 = vector.load %arg7[%c0_37, %c0_38] : memref<128x8xf32, #tpu.memory_space<vmem>>, vector<128x8xf32>
    tpu.vector_store %arg7[%c0_37, %c0_38], %62 {strides = array<i32>} : memref<128x8xf32, #tpu.memory_space<vmem>>, vector<128x8xf32>,
    return
  }
  func.func @transform_0(%arg0: i32) -> (i32, i32) {
    %c0_i32 = arith.constant 0 : i32
    %c0_i32_0 = arith.constant 0 : i32
    return %arg0, %c0_i32 : i32, i32
  }
  func.func @transform_1(%arg0: i32) -> (i32, i32) {
    %c0_i32 = arith.constant 0 : i32
    %c0_i32_0 = arith.constant 0 : i32
    return %arg0, %c0_i32 : i32, i32
  }
  func.func @transform_2(%arg0: i32) -> (i32, i32) {
    %c0_i32 = arith.constant 0 : i32
    %c0_i32_0 = arith.constant 0 : i32
    return %arg0, %c0_i32 : i32, i32
  }
  func.func @transform_3(%arg0: i32) -> (i32, i32) {
    %c0_i32 = arith.constant 0 : i32
    %c0_i32_0 = arith.constant 0 : i32
    %c0_i32_1 = arith.constant 0 : i32
    return %c0_i32, %c0_i32_0 : i32, i32
  }
  func.func @transform_4(%arg0: i32) -> (i32, i32, i32) {
    %c0_i32 = arith.constant 0 : i32
    %c0_i32_0 = arith.constant 0 : i32
    %c0_i32_1 = arith.constant 0 : i32
    %c0_i32_2 = arith.constant 0 : i32
    return %c0_i32, %c0_i32_0, %c0_i32_1 : i32, i32, i32
  }
  func.func @transform_5(%arg0: i32) -> (i32, i32, i32) {
    %c0_i32 = arith.constant 0 : i32
    %c0_i32_0 = arith.constant 0 : i32
    %c0_i32_1 = arith.constant 0 : i32
    %c0_i32_2 = arith.constant 0 : i32
    return %c0_i32, %c0_i32_0, %c0_i32_1 : i32, i32, i32
  }
  func.func @transform_6(%arg0: i32) -> (i32, i32) {
    %c0_i32 = arith.constant 0 : i32
    %c0_i32_0 = arith.constant 0 : i32
    return %arg0, %c0_i32 : i32, i32
  }
}

</mosaic_0001>

<bundles_post_ra>
// kernel: action_nn_forward.1
= control target key start
LH: loop header
LB: loop body
LE: loop exit
PB: predicated region body
PF: predicated region fallthrough
CT: control target
= control target key end

     0   :  { %s9463_s21 = smov 0   ;;  %s13470_s0 = inlined_call_operand.vmem [shape: f32[256,16], index: 0, kind: input, shape index: {}]   ;;  %s13471_s1 = inlined_call_operand.vmem [shape: f32[256,8], index: 1, kind: input, shape index: {}]   ;;  %s13472_s2 = inlined_call_operand.vmem [shape: f32[256,2], index: 2, kind: input, shape index: {}]   ;;  %s13473_s3 = inlined_call_operand.vmem [shape: f32[32,128], index: 3, kind: input, shape index: {}]   ;;  %s13474_s4 = inlined_call_operand.vmem [shape: f32[3,128,128], index: 4, kind: input, shape index: {}]   ;;  %s13475_s5 = inlined_call_operand.vmem [shape: f32[4,1,128], index: 5, kind: input, shape index: {}]   ;;  %s13476_s6 = inlined_call_operand.vmem [shape: f32[256,8], index: 6, kind: output, shape index: {}]  }
   0x1 LB: > { %s7152_s22 = sadd.s32 4294967295, %s9424_s21   ;;  %p7156_p0 = scmp.ge.s32.totalorder %s9424_s21, 1  ;;  %s9424_s21 = sphi %s9463_s21, %s16_s21  }
   0x2   : > { %p235_p1 = scmp.lt.s32.totalorder %s9424_s21, 3 }
   0x4   : > { %p236_p2 = pnand %p7156_p0, %p235_p1 }
   0x6   : > { %239 = sbr.rel (%p236_p2) target bundleno = 1655 (0x677), region = 44 }
   0xb   : > { %v349_v0 = vld [vmem:[%s13473_s3 + $0x10] sm:$0xff]  ;;  %s7157_s25 = sshll.u32 %s7152_s22, 4  ;;  %vm350_vm0 = vcmask 64512   ;;  %vm1490_vm1 = vcmask 130048  }
   0xc   : > { %v9474_v1 = vand.u32 4294901760, %v349_v0  ;;  %p276_p3 = scmp.lt.s32.totalorder %s7157_s25, 31 }
   0xe   : > { %7994 = vmatprep.subr.mxu0 %v9474_v1  ;;  %v9478_v2 = vsub.f32 %v349_v0, %v9474_v1  ;;  %s14383_s25 = smov (!%p276_p3, %s7157_s25), 31 }
   0xf   : > { %7995 = vmatpush3.msra.mxu0 %v9474_v1  ;;  %s9484_s26 = sshll.u32 %s14383_s25, 3 }
  0x10   : > { %v9482_v3 = vand.u32 4294901760, %v9478_v2  ;;  %8046 = vmatprep.subr.mxu0 %v9478_v2  ;;  %s9491_s29 = scalar_lea.vmem %s13471_s1, %s9484_s26  ;;  %s9750_s12 = scalar_lea.vmem %s13472_s2, %s9484_s26 }
  0x11   : > { %v333_v5 = vld [vmem:[%s9491_s29] sm:$0xff]  ;;  %v334_v6 = vld [vmem:[%s9491_s29 + $0x8] sm:$0xff]  ;;  %v335_v7 = vld [vmem:[%s9491_s29 + $0x10] sm:$0xff]  ;;  %s9808_s15 = scalar_lea.vmem %s13470_s0, %s9484_s26  ;;  %s13417_s16 = scalar_lea.vmem %s13476_s6, %s9484_s26 }
  0x12   : > { %v659_v4 = vsub.f32 %v9478_v2, %v9482_v3  ;;  %v352_v8 = vsel %vm350_vm0, %v333_v5, 0  ;;  %v355_v9 = vsel %vm350_vm0, %v334_v6, 0  ;;  %v358_v10 = vsel %vm350_vm0, %v335_v7, 0  ;;  %v336_v11 = vld [vmem:[%s9491_s29 + $0x18] sm:$0xff]  ;;  %v337_v12 = vld [vmem:[%s9491_s29 + $0x20] sm:$0xff]  ;;  %v338_v13 = vld [vmem:[%s9491_s29 + $0x28] sm:$0xff] }
  0x13   : > { %v9504_v15 = vand.u32 4294901760, %v352_v8  ;;  %v9506_v16 = vand.u32 4294901760, %v355_v9  ;;  %v9508_v17 = vand.u32 4294901760, %v358_v10  ;;  %v339_v18 = vld [vmem:[%s9491_s29 + $0x30] sm:$0xff]  ;;  %v340_v19 = vld [vmem:[%s9491_s29 + $0x38] sm:$0xff]  ;;  %v361_v20 = vsel %vm350_vm0, %v336_v11, 0 }
  0x14   : > { %v660_v14 = vand.u32 4294901760, %v659_v4  ;;  %v364_v21 = vsel %vm350_vm0, %v337_v12, 0  ;;  %v367_v22 = vsel %vm350_vm0, %v338_v13, 0  ;;  %v370_v23 = vsel %vm350_vm0, %v339_v18, 0  ;;  %v341_v48 = vld [vmem:[%s9491_s29 + $0x40] sm:$0xff]  ;;  %v342_v49 = vld [vmem:[%s9491_s29 + $0x48] sm:$0xff] }
  0x15   : > { %v9517_v24 = vsub.f32 %v352_v8, %v9504_v15  ;;  %8022 = vmatprep.mubr.f32.mxu1 %v9504_v15  ;;  %v9521_v25 = vsub.f32 %v355_v9, %v9506_v16  ;;  %v9524_v26 = vsub.f32 %v358_v10, %v9508_v17  ;;  %v9526_v27 = vand.u32 4294901760, %v361_v20  ;;  %v343_v50 = vld [vmem:[%s9491_s29 + $0x50] sm:$0xff]  ;;  %v344_v59 = vld [vmem:[%s9491_s29 + $0x58] sm:$0xff]  ;;  %v345_v63 = vld [vmem:[%s9491_s29 + $0x60] sm:$0xff] }
  0x16   : > { %8020 = vmatprep.subr.mxu1 %v660_v14  ;;  %v9528_v28 = vand.u32 4294901760, %v364_v21  ;;  %v9530_v29 = vand.u32 4294901760, %v367_v22  ;;  %v9532_v30 = vand.u32 4294901760, %v370_v23  ;;  %v373_v31 = vsel %vm350_vm0, %v340_v19, 0  ;;  %v346_v0 = vld [vmem:[%s9491_s29 + $0x68] sm:$0xff]  ;;  %v347_v12 = vld [vmem:[%s9491_s29 + $0x70] sm:$0xff] }
  0x17   : > { %8021 = vmatpush3.msra.mxu1 %v660_v14  ;;  %v467_v32 = vand.u32 4294901760, %v9517_v24  ;;  %v477_v33 = vand.u32 4294901760, %v9521_v25  ;;  %v487_v34 = vand.u32 4294901760, %v9524_v26  ;;  %v9541_v35 = vsub.f32 %v361_v20, %v9526_v27  ;;  %v348_v13 = vld [vmem:[%s9491_s29 + $0x78] sm:$0xff] }
  0x18   : > { %8023 = vmatmul.mubr.f32.vlgmr.msra.gmra.mxu1 %v9506_v16  ;;  %8072 = vmatprep.subr.mxu1 %v9474_v1  ;;  %v9546_v36 = vsub.f32 %v364_v21, %v9528_v28  ;;  %v9549_v37 = vsub.f32 %v367_v22, %v9530_v29  ;;  %v9552_v38 = vsub.f32 %v370_v23, %v9532_v30  ;;  %v9554_v39 = vand.u32 4294901760, %v373_v31 }
  0x19   : > { %8073 = vmatpush3.msra.mxu1 %v9474_v1  ;;  %8025 = vmatprep.mubr.f32.mxu1 %v9508_v17  ;;  %v468_v40 = vsub.f32 %v9517_v24, %v467_v32  ;;  %v478_v41 = vsub.f32 %v9521_v25, %v477_v33  ;;  %v488_v42 = vsub.f32 %v9524_v26, %v487_v34  ;;  %v497_v43 = vand.u32 4294901760, %v9541_v35 }
  0x1a   : > { %8124 = vmatprep.subr.mxu1 %v9474_v1  ;;  %v507_v44 = vand.u32 4294901760, %v9546_v36  ;;  %v517_v45 = vand.u32 4294901760, %v9549_v37  ;;  %v527_v46 = vand.u32 4294901760, %v9552_v38  ;;  %v9571_v47 = vsub.f32 %v373_v31, %v9554_v39 }
  0x1b   : > { %v469_v51 = vand.u32 4294901760, %v468_v40  ;;  %v479_v52 = vand.u32 4294901760, %v478_v41  ;;  %v489_v53 = vand.u32 4294901760, %v488_v42  ;;  %v498_v54 = vsub.f32 %v9541_v35, %v497_v43 }
  0x1c   : > { %8026 = vmatmul.mubr.f32.gmra.mxu1 %v9526_v27  ;;  %v508_v55 = vsub.f32 %v9546_v36, %v507_v44  ;;  %v518_v56 = vsub.f32 %v9549_v37, %v517_v45  ;;  %v528_v57 = vsub.f32 %v9552_v38, %v527_v46  ;;  %v537_v58 = vand.u32 4294901760, %v9571_v47 }
  0x1d   : > { %8028 = vmatprep.mubr.f32.mxu1 %v9528_v28  ;;  %7996 = vmatprep.mubr.f32.mxu0 %v469_v51  ;;  %v376_v60 = vsel %vm350_vm0, %v341_v48, 0  ;;  %v379_v61 = vsel %vm350_vm0, %v342_v49, 0  ;;  %v382_v62 = vsel %vm350_vm0, %v343_v50, 0  ;;  %v499_v4 = vand.u32 4294901760, %v498_v54  ;;  %v332_v48 = vld [vmem:[%s13473_s3 + $0x8] sm:$0xff] }
  0x1e   : > { %7997 = vmatmul.mubr.f32.vlgmr.msra.gmra.mxu0 %v479_v52  ;;  %v509_v5 = vand.u32 4294901760, %v508_v55  ;;  %v519_v6 = vand.u32 4294901760, %v518_v56  ;;  %v529_v7 = vand.u32 4294901760, %v528_v57  ;;  %v9598_v8 = vand.u32 4294901760, %v376_v60 }
  0x1f   : > { %8047 = vmatpush3.msra.mxu0 %v9478_v2  ;;  %7999 = vmatprep.mubr.f32.mxu0 %v489_v53  ;;  %v9600_v9 = vand.u32 4294901760, %v379_v61  ;;  %v9602_v10 = vand.u32 4294901760, %v382_v62  ;;  %v385_v11 = vsel %vm350_vm0, %v344_v59, 0  ;;  %v538_v14 = vsub.f32 %v9571_v47, %v537_v58 }
  0x20   : > { %8029 = vmatmul.mubr.f32.gmra.mxu1 %v9530_v29  ;;  %v9611_v18 = vand.u32 4294901760, %v385_v11  ;;  %v388_v2 = vsel %vm350_vm0, %v345_v63, 0  ;;  %v391_v19 = vsel %vm350_vm0, %v346_v0, 0  ;;  %8098 = vmatprep.subr.mxu0 %v9482_v3  ;;  %v9618_v20 = vsub.f32 %v376_v60, %v9598_v8 }
  0x21   : > { %8031 = vmatprep.mubr.f32.mxu1 %v9532_v30  ;;  %v9621_v21 = vsub.f32 %v379_v61, %v9600_v9  ;;  %v9624_v22 = vsub.f32 %v382_v62, %v9602_v10  ;;  %v9626_v23 = vand.u32 4294901760, %v388_v2  ;;  %v9631_v40 = vand.u32 4294901760, %v391_v19 }
  0x22   : > { %8000 = vmatmul.mubr.f32.gmra.mxu0 %v499_v4  ;;  %v9629_v31 = vsub.f32 %v385_v11, %v9611_v18  ;;  %v394_v41 = vsel %vm350_vm0, %v347_v12, 0  ;;  %v397_v42 = vsel %vm350_vm0, %v348_v13, 0  ;;  %v547_v49 = vand.u32 4294901760, %v9618_v20 }
  0x23   : > { %8002 = vmatprep.mubr.f32.mxu0 %v509_v5  ;;  %v557_v50 = vand.u32 4294901760, %v9621_v21  ;;  %v567_v51 = vand.u32 4294901760, %v9624_v22  ;;  %v9642_v52 = vsub.f32 %v388_v2, %v9626_v23  ;;  %v9645_v53 = vand.u32 4294901760, %v394_v41 }
  0x24   : > { %8032 = vmatmul.mubr.f32.gmra.mxu1 %v9554_v39  ;;  %v539_v54 = vand.u32 4294901760, %v538_v14  ;;  %v548_v55 = vsub.f32 %v9618_v20, %v547_v49  ;;  %v9651_v56 = vand.u32 4294901760, %v332_v48  ;;  %v577_v59 = vand.u32 4294901760, %v9629_v31 }
  0x25   : > { %8034 = vmatprep.mubr.f32.mxu1 %v9598_v8  ;;  %v558_v57 = vsub.f32 %v9621_v21, %v557_v50  ;;  %v9658_v60 = vsub.f32 %v391_v19, %v9631_v40  ;;  %v9660_v61 = vand.u32 4294901760, %v397_v42  ;;  %v568_v63 = vsub.f32 %v9624_v22, %v567_v51 }
  0x26   : > { %8003 = vmatmul.mubr.f32.gmra.mxu0 %v519_v6  ;;  %v549_v62 = vand.u32 4294901760, %v548_v55  ;;  %v587_v0 = vand.u32 4294901760, %v9642_v52  ;;  %v9667_v4 = vsub.f32 %v394_v41, %v9645_v53  ;;  %v9672_v5 = vsub.f32 %v332_v48, %v9651_v56 }
  0x27   : > { %8005 = vmatprep.mubr.f32.mxu0 %v529_v7  ;;  %v559_v6 = vand.u32 4294901760, %v558_v57  ;;  %v578_v7 = vsub.f32 %v9629_v31, %v577_v59  ;;  %v597_v11 = vand.u32 4294901760, %v9658_v60  ;;  %v9679_v12 = vsub.f32 %v397_v42, %v9660_v61 }
  0x28   : > { %8035 = vmatmul.mubr.f32.gmra.mxu1 %v9600_v9  ;;  %v569_v13 = vand.u32 4294901760, %v568_v63  ;;  %v588_v14 = vsub.f32 %v9642_v52, %v587_v0  ;;  %v607_v2 = vand.u32 4294901760, %v9667_v4  ;;  %v9692_v48 = vand.u32 4294901760, %v9672_v5 }
  0x29   : > { %8037 = vmatprep.mubr.f32.mxu1 %v9602_v10  ;;  %v579_v19 = vand.u32 4294901760, %v578_v7  ;;  %v598_v41 = vsub.f32 %v9658_v60, %v597_v11  ;;  %v617_v42 = vand.u32 4294901760, %v9679_v12 }
  0x2a   : > { %8006 = vmatmul.mubr.f32.gmra.mxu0 %v539_v54  ;;  %v589_v54 = vand.u32 4294901760, %v588_v14  ;;  %v608_v55 = vsub.f32 %v9667_v4, %v607_v2  ;;  %v1798_v63 = vsub.f32 %v9672_v5, %v9692_v48 }
  0x2b   : > { %8008 = vmatprep.mubr.f32.mxu0 %v549_v62  ;;  %v599_v57 = vand.u32 4294901760, %v598_v41  ;;  %v618_v62 = vsub.f32 %v9679_v12, %v617_v42 }
  0x2c   : > { %8038 = vmatmul.mubr.f32.gmra.mxu1 %v9611_v18 }
  0x2d   : > { %8040 = vmatprep.mubr.f32.mxu1 %v9626_v23  ;;  %v619_v7 = vand.u32 4294901760, %v618_v62 }
  0x2e   : > { %8009 = vmatmul.mubr.f32.gmra.mxu0 %v559_v6  ;;  %v609_v6 = vand.u32 4294901760, %v608_v55 }
  0x2f   : > { %8011 = vmatprep.mubr.f32.mxu0 %v569_v13  ;;  %v1799_v13 = vand.u32 4294901760, %v1798_v63 }
  0x30   : > { %8041 = vmatmul.mubr.f32.gmra.mxu1 %v9631_v40 }
  0x31   : > { %8043 = vmatprep.mubr.f32.mxu1 %v9645_v53 }
  0x32   : > { %8012 = vmatmul.mubr.f32.gmra.mxu0 %v579_v19 }
  0x33   : > { %8014 = vmatprep.mubr.f32.mxu0 %v589_v54 }
  0x34   : > { %8044 = vmatmul.mubr.f32.gmra.mxu1 %v9660_v61 }
  0x35   : > { %8074 = vmatprep.mubr.f32.mxu1 %v467_v32 }
  0x36   : > { %8015 = vmatmul.mubr.f32.gmra.mxu0 %v599_v57  ;;  %v324_v57 = vld [vmem:[%s9808_s15 + $0x48] sm:$0xff] }
  0x37   : > { %8017 = vmatprep.mubr.f32.mxu0 %v609_v6 }
  0x38   : > { %8075 = vmatmul.mubr.f32.vlgmr.msra.gmra.mxu1 %v477_v33  ;;  %v9768_v33 = vld [vmem:[%s9750_s12 + $0x8] sm:$0xff] }
  0x39   : > { %8125 = vmatpush3.msra.mxu1 %v9474_v1  ;;  %8077 = vmatprep.mubr.f32.mxu1 %v487_v34  ;;  %v331_v1 = vld [vmem:[%s13473_s3] sm:$0xff] }
  0x3a   : > { %8018 = vmatmul.mubr.f32.gmra.mxu0 %v619_v7  ;;  %8178 = vmatprep.subr.mxu1 %v1799_v13  ;;  %v325_v7 = vld [vmem:[%s9808_s15 + $0x50] sm:$0xff] }
  0x3b   : > { %8048 = vmatprep.mubr.f32.mxu0 %v9517_v24 }
  0x3c   : > { %8078 = vmatmul.mubr.f32.gmra.mxu1 %v497_v43  ;;  %v9791_v43 = vld [vmem:[%s9750_s12 + $0x30] sm:$0xff] }
  0x3d   : > { %8080 = vmatprep.mubr.f32.mxu1 %v507_v44  ;;  %v303_v44 = vld [vmem:[%s9750_s12 + $0x20] sm:$0xff] }
  0x3e   : > { %8049 = vmatmul.mubr.f32.vlgmr.msra.gmra.mxu0 %v9521_v25  ;;  %v9426_v25 = vmov 1  }
  0x3f   : > { %8099 = vmatpush3.msra.mxu0 %v9482_v3  ;;  %8051 = vmatprep.mubr.f32.mxu0 %v9524_v26  ;;  %v9735_v3 = vand.u32 4294901760, %v331_v1  ;;  %v9755_v26 = vld [vmem:[%s9750_s12] sm:$0xff] }
  0x40   : > { %8081 = vmatmul.mubr.f32.gmra.mxu1 %v517_v45  ;;  %8150 = vmatprep.subr.mxu0 %v9651_v56  ;;  %v316_v45 = vld [vmem:[%s9808_s15 + $0x8] sm:$0xff] }
  0x41   : > { %8083 = vmatprep.mubr.f32.mxu1 %v527_v46  ;;  %v9744_v24 = vsub.f32 %v331_v1, %v9735_v3  ;;  %9336 = vset.pattern.permute.xlu1 %v9426_v25  ;;  %v317_v46 = vld [vmem:[%s9808_s15 + $0x10] sm:$0xff] }
  0x42   : > { %8052 = vmatmul.mubr.f32.gmra.mxu0 %v9541_v35  ;;  %2762 = vperm.xlu1 %9336, %v9755_v26   ;;  %v9780_v35 = vld [vmem:[%s9750_s12 + $0x10] sm:$0xff] }
  0x43   : > { %8054 = vmatprep.mubr.f32.mxu0 %v9546_v36  ;;  %9338 = vset.pattern.permute.xlu0 %v9426_v25  ;;  %v9765_v32 = vand.u32 4294901760, %v9744_v24  ;;  %v302_v36 = vld [vmem:[%s9750_s12 + $0x18] sm:$0xff] }
  0x44   : > { %8084 = vmatmul.mubr.f32.gmra.mxu1 %v537_v58  ;;  %2770 = vperm.xlu0 %9338, %v9780_v35   ;;  %v1498_v58 = vsel %vm1490_vm1, %v317_v46, 0 }
  0x45   : > { %8086 = vmatprep.mubr.f32.mxu1 %v547_v49  ;;  %v1805_v34 = vsub.f32 %v9744_v24, %v9765_v32  ;;  %v320_v49 = vld [vmem:[%s9808_s15 + $0x28] sm:$0xff] }
  0x46   : > { %8055 = vmatmul.mubr.f32.gmra.mxu0 %v9549_v37  ;;  %2766 = vperm.xlu1 %9336, %v9768_v33   ;;  %v9427_v37 = vmov 0  }
  0x47   : > { %8057 = vmatprep.mubr.f32.mxu0 %v9552_v38  ;;  %v1806_v38 = vand.u32 4294901760, %v1805_v34 }
  0x48   : > { %8087 = vmatmul.mubr.f32.gmra.mxu1 %v557_v50  ;;  %2786 = vperm.xlu0 %9338, %v9791_v43   ;;  %v321_v50 = vld [vmem:[%s9808_s15 + $0x30] sm:$0xff] }
  0x49   : > { %8089 = vmatprep.mubr.f32.mxu1 %v567_v51  ;;  %v304_v51 = vld [vmem:[%s9750_s12 + $0x28] sm:$0xff] }
  0x4a   : > { %8058 = vmatmul.mubr.f32.gmra.mxu0 %v9571_v47  ;;  %9337 = vset.pattern.permute.xlu1 %v9427_v37  ;;  %v318_v47 = vld [vmem:[%s9808_s15 + $0x18] sm:$0xff] }
  0x4b   : > { %8060 = vmatprep.mubr.f32.mxu0 %v9618_v20  ;;  %2661 = vperm.xlu1 %9337, %v302_v36   ;;  %v319_v20 = vld [vmem:[%s9808_s15 + $0x20] sm:$0xff] }
  0x4c   : > { %8090 = vmatmul.mubr.f32.gmra.mxu1 %v577_v59  ;;  %v1507_v59 = vsel %vm1490_vm1, %v320_v49, 0  ;;  %v329_v49 = vld [vmem:[%s9808_s15 + $0x70] sm:$0xff] }
  0x4d   : > { %8092 = vmatprep.mubr.f32.mxu1 %v587_v0  ;;  %v9886_v14 = vand.u32 4294901760, %v1507_v59 }
  0x4e   : > { %8061 = vmatmul.mubr.f32.gmra.mxu0 %v9621_v21 }
  0x4f   : > { %8063 = vmatprep.mubr.f32.mxu0 %v9624_v22  ;;  %9339 = vset.pattern.permute.xlu1 %v9426_v25  ;;  %v9852_v22 = vand.u32 4294901760, %v1498_v58 }
  0x50   : > { %8093 = vmatmul.mubr.f32.gmra.mxu1 %v597_v11  ;;  %2774 = vperm.xlu1 %9339, %v302_v36   ;;  %v322_v11 = vld [vmem:[%s9808_s15 + $0x38] sm:$0xff] }
  0x51   : > { %8095 = vmatprep.mubr.f32.mxu1 %v607_v2  ;;  %v323_v2 = vld [vmem:[%s9808_s15 + $0x40] sm:$0xff]  ;;  %v326_v36 = vld [vmem:[%s9808_s15 + $0x58] sm:$0xff] }
  0x52   : > { %8064 = vmatmul.mubr.f32.gmra.mxu0 %v9629_v31  ;;  %v1504_v31 = vsel %vm1490_vm1, %v319_v20, 0  ;;  %v328_v20 = vld [vmem:[%s9808_s15 + $0x68] sm:$0xff] }
  0x53   : > { %8066 = vmatprep.mubr.f32.mxu0 %v9642_v52  ;;  %v9867_v52 = vand.u32 4294901760, %v1504_v31 }
  0x54   : > { %8096 = vmatmul.mubr.f32.gmra.mxu1 %v617_v42  ;;  %9340 = vset.pattern.permute.xlu1 %v9427_v37  ;;  %v1513_v42 = vsel %vm1490_vm1, %v322_v11, 0 }
  0x55   : > { %8126 = vmatprep.mubr.f32.mxu1 %v9504_v15  ;;  %2666 = vperm.xlu1 %9340, %v303_v44   ;;  %v9894_v41 = vsub.f32 %v1504_v31, %v9867_v52  ;;  %v9915_v6 = vand.u32 4294901760, %v1513_v42 }
  0x56   : > { %8067 = vmatmul.mubr.f32.gmra.mxu0 %v9658_v60  ;;  %v1510_v60 = vsel %vm1490_vm1, %v321_v50, 0 }
  0x57   : > { %8069 = vmatprep.mubr.f32.mxu0 %v9667_v4  ;;  %v9874_v4 = vsub.f32 %v1498_v58, %v9852_v22  ;;  %v1648_v1 = vand.u32 4294901760, %v9894_v41 }
  0x58   : > { %8127 = vmatmul.mubr.f32.vlgmr.msra.gmra.mxu1 %v9506_v16 }
  0x59   : > { %8179 = vmatpush3.msra.mxu1 %v1799_v13  ;;  %8129 = vmatprep.mubr.f32.mxu1 %v9508_v17  ;;  %v1628_v55 = vand.u32 4294901760, %v9874_v4 }
  0x5a   : > { %8070 = vmatmul.mubr.f32.gmra.mxu0 %v9679_v12  ;;  %8180 = vmatprep.subr.mxu1 %v1806_v38 }
  0x5b   : > { %8100 = vmatprep.mubr.f32.mxu0 %v9504_v15  ;;  %8181 = vmatpush3.msra.mxu1 %v1806_v38  ;;  %v9815_v15 = vld [vmem:[%s9750_s12 + $0x50] sm:$0xff] }
  0x5c   : > { %8130 = vmatmul.mubr.f32.gmra.mxu1 %v9526_v27  ;;  %8234 = vmatprep.subr.mxu1 %v9651_v56 }
  0x5d   : > { %8132 = vmatprep.mubr.f32.mxu1 %v9528_v28  ;;  %2802 = vperm.xlu0 %9338, %v9815_v15  }
  0x5e   : > { %8101 = vmatmul.mubr.f32.vlgmr.msra.gmra.mxu0 %v9506_v16  ;;  %v315_v16 = vld [vmem:[%s9808_s15] sm:$0xff]  ;;  %9341 = vset.pattern.permute.xlu1 %v9426_v25 }
  0x5f   : > { %8151 = vmatpush3.msra.mxu0 %v9651_v56  ;;  %8103 = vmatprep.mubr.f32.mxu0 %v9508_v17  ;;  %v1492_v17 = vsel %vm1490_vm1, %v315_v16, 0 }
  0x60   : > { %8133 = vmatmul.mubr.f32.gmra.mxu1 %v9530_v29  ;;  %8152 = vmatprep.subr.mxu0 %v9735_v3 }
  0x61   : > { %8135 = vmatprep.mubr.f32.mxu1 %v9532_v30  ;;  %8153 = vmatpush3.msra.mxu0 %v9735_v3 }
  0x62   : > { %8104 = vmatmul.mubr.f32.gmra.mxu0 %v9526_v27  ;;  %8206 = vmatprep.subr.mxu0 %v9672_v5  ;;  %v9833_v27 = vand.u32 4294901760, %v1492_v17 }
  0x63   : > { %8106 = vmatprep.mubr.f32.mxu0 %v9528_v28  ;;  %v1495_v28 = vsel %vm1490_vm1, %v316_v45, 0  ;;  %9347 = vset.pattern.permute.xlu0 %v9427_v37  ;;  %v1649_v45 = vsub.f32 %v9894_v41, %v1648_v1 }
  0x64   : > { %8136 = vmatmul.mubr.f32.gmra.mxu1 %v9554_v39  ;;  %2646 = vperm.xlu0 %9347, %v9755_v26   ;;  %v9850_v21 = vsub.f32 %v1492_v17, %v9833_v27  ;;  %v327_v17 = vld [vmem:[%s9808_s15 + $0x60] sm:$0xff] }
  0x65   : > { %8138 = vmatprep.mubr.f32.mxu1 %v9598_v8  ;;  %2778 = vperm.xlu1 %9341, %v303_v44   ;;  %v9943_v44 = vsub.f32 %v1513_v42, %v9915_v6  ;;  %v1528_v31 = vsel %vm1490_vm1, %v327_v17, 0  ;;  %v1650_v11 = vand.u32 4294901760, %v1649_v45 }
  0x66   : > { %8107 = vmatmul.mubr.f32.gmra.mxu0 %v9530_v29  ;;  %v9845_v29 = vand.u32 4294901760, %v1495_v28  ;;  %v1608_v0 = vand.u32 4294901760, %v9850_v21 }
  0x67   : > { %8109 = vmatprep.mubr.f32.mxu0 %v9532_v30  ;;  %v1501_v30 = vsel %vm1490_vm1, %v318_v47, 0 }
  0x68   : > { %8139 = vmatmul.mubr.f32.gmra.mxu1 %v9600_v9  ;;  %2651 = vperm.xlu0 %9347, %v9768_v33   ;;  %v1609_v54 = vsub.f32 %v9850_v21, %v1608_v0  ;;  %v1629_v33 = vsub.f32 %v9874_v4, %v1628_v55 }
  0x69   : > { %8141 = vmatprep.mubr.f32.mxu1 %v9602_v10  ;;  %2782 = vperm.xlu1 %9341, %v304_v51  }
  0x6a   : > { %8110 = vmatmul.mubr.f32.gmra.mxu0 %v9554_v39  ;;  %v9861_v39 = vand.u32 4294901760, %v1501_v30  ;;  %v1610_v26 = vand.u32 4294901760, %v1609_v54  ;;  %v1531_v54 = vsel %vm1490_vm1, %v328_v20, 0 }
  0x6b   : > { %8112 = vmatprep.mubr.f32.mxu0 %v9598_v8  ;;  %v9865_v8 = vsub.f32 %v1495_v28, %v9845_v29  ;;  %v1630_v28 = vand.u32 4294901760, %v1629_v33 }
  0x6c   : > { %8142 = vmatmul.mubr.f32.gmra.mxu1 %v9611_v18  ;;  %2656 = vperm.xlu0 %9347, %v9780_v35   ;;  %v9884_v12 = vsub.f32 %v1501_v30, %v9861_v39  ;;  %v1519_v35 = vsel %vm1490_vm1, %v324_v57, 0  ;;  %v9962_v30 = vld [vmem:[%s9750_s12 + $0x48] sm:$0xff] }
  0x6d   : > { %8144 = vmatprep.mubr.f32.mxu1 %v9626_v23  ;;  %v1618_v19 = vand.u32 4294901760, %v9865_v8  ;;  %9342 = vset.pattern.permute.xlu1 %v9427_v37  ;;  %v9950_v46 = vand.u32 4294901760, %v1519_v35 }
  0x6e   : > { %8113 = vmatmul.mubr.f32.gmra.mxu0 %v9600_v9  ;;  %v9880_v9 = vld [vmem:[%s9750_s12 + $0x38] sm:$0xff]  ;;  %v1638_v62 = vand.u32 4294901760, %v9884_v12 }
  0x6f   : > { %8115 = vmatprep.mubr.f32.mxu0 %v9602_v10  ;;  %v9888_v10 = vand.u32 4294901760, %v1510_v60  ;;  %2681 = vperm.xlu1 %9342, %v9880_v9   ;;  %v1619_v13 = vsub.f32 %v9865_v8, %v1618_v19 }
  0x70   : > { %8145 = vmatmul.mubr.f32.gmra.mxu1 %v9631_v40  ;;  %2671 = vperm.xlu0 %9347, %v304_v51  }
  0x71   : > { %8147 = vmatprep.mubr.f32.mxu1 %v9645_v53  ;;  %v9913_v63 = vsub.f32 %v1510_v60, %v9888_v10  ;;  %v1678_v60 = vand.u32 4294901760, %v9943_v44 }
  0x72   : > { %8116 = vmatmul.mubr.f32.gmra.mxu0 %v9611_v18  ;;  %v1516_v18 = vsel %vm1490_vm1, %v323_v2, 0  ;;  %v9978_v2 = vsub.f32 %v1519_v35, %v9950_v46  ;;  %v307_v35 = vld [vmem:[%s9750_s12 + $0x40] sm:$0xff] }
  0x73   : > { %8118 = vmatprep.mubr.f32.mxu0 %v9626_v23  ;;  %v9910_v23 = vsub.f32 %v1507_v59, %v9886_v14  ;;  %v9927_v34 = vand.u32 4294901760, %v1516_v18  ;;  %9343 = vset.pattern.permute.xlu1 %v9426_v25  ;;  %v1668_v16 = vand.u32 4294901760, %v9913_v63 }
  0x74   : > { %8148 = vmatmul.mubr.f32.gmra.mxu1 %v9660_v61  ;;  %2676 = vperm.xlu0 %9347, %v9791_v43   ;;  %v1620_v43 = vand.u32 4294901760, %v1619_v13  ;;  %v330_v13 = vld [vmem:[%s9808_s15 + $0x78] sm:$0xff] }
  0x75   : > { %8182 = vmatprep.mubr.f32.mxu1 %v9833_v27  ;;  %v1658_v38 = vand.u32 4294901760, %v9910_v23  ;;  %v9954_v47 = vsub.f32 %v1516_v18, %v9927_v34  ;;  %v1669_v59 = vsub.f32 %v9913_v63, %v1668_v16  ;;  %2790 = vperm.xlu1 %9343, %v9880_v9   ;;  %v9989_v9 = vand.u32 4294901760, %v1528_v31 }
  0x76   : > { %8119 = vmatmul.mubr.f32.gmra.mxu0 %v9631_v40  ;;  %v1522_v40 = vsel %vm1490_vm1, %v325_v7, 0  ;;  %v1534_v7 = vsel %vm1490_vm1, %v329_v49, 0 }
  0x77   : > { %8121 = vmatprep.mubr.f32.mxu0 %v9645_v53  ;;  %v1639_v53 = vsub.f32 %v9884_v12, %v1638_v62  ;;  %v9957_v58 = vand.u32 4294901760, %v1522_v40  ;;  %v1659_v51 = vsub.f32 %v9910_v23, %v1658_v38  ;;  %v1688_v18 = vand.u32 4294901760, %v9954_v47 }
  0x78   : > { %8183 = vmatmul.mubr.f32.vlgmr.msra.gmra.mxu1 %v9845_v29  ;;  %2691 = vperm.xlu0 %9347, %v9962_v30   ;;  %v1670_v33 = vand.u32 4294901760, %v1669_v59  ;;  %v10007_v17 = vand.u32 4294901760, %v1534_v7  ;;  %v10015_v45 = vsub.f32 %v1528_v31, %v9989_v9 }
  0x79   : > { %8235 = vmatpush3.msra.mxu1 %v9651_v56  ;;  %8185 = vmatprep.mubr.f32.mxu1 %v9852_v22  ;;  %v1640_v50 = vand.u32 4294901760, %v1639_v53  ;;  %v9987_v57 = vsub.f32 %v1522_v40, %v9957_v58  ;;  %v1698_v40 = vand.u32 4294901760, %v9978_v2  ;;  %v10005_v53 = vand.u32 4294901760, %v1531_v54 }
  0x7a   : > { %8122 = vmatmul.mubr.f32.gmra.mxu0 %v9660_v61  ;;  %8236 = vmatprep.subr.mxu1 %v9735_v3  ;;  %v1525_v61 = vsel %vm1490_vm1, %v326_v36, 0 }
  0x7b   : > { %8154 = vmatprep.mubr.f32.mxu0 %v1610_v26  ;;  %8237 = vmatpush3.msra.mxu1 %v9735_v3  ;;  %v9980_v42 = vand.u32 4294901760, %v1525_v61  ;;  %v1660_v26 = vand.u32 4294901760, %v1659_v51  ;;  %v1699_v20 = vsub.f32 %v9978_v2, %v1698_v40  ;;  %v10027_v49 = vsub.f32 %v1531_v54, %v10005_v53  ;;  %v10032_v51 = vld [vmem:[%s9750_s12 + $0x68] sm:$0xff] }
  0x7c   : > { %8186 = vmatmul.mubr.f32.gmra.mxu1 %v9861_v39  ;;  %8290 = vmatprep.subr.mxu1 %v9651_v56 }
  0x7d   : > { %8188 = vmatprep.mubr.f32.mxu1 %v9867_v52  ;;  %v10003_v36 = vsub.f32 %v1525_v61, %v9980_v42  ;;  %9344 = vset.pattern.permute.xlu1 %v9427_v37  ;;  %v1700_v54 = vand.u32 4294901760, %v1699_v20 }
  0x7e   : > { %8155 = vmatmul.mubr.f32.vlgmr.msra.gmra.mxu0 %v1620_v43  ;;  %v1689_v43 = vsub.f32 %v9954_v47, %v1688_v18  ;;  %2686 = vperm.xlu1 %9344, %v307_v35  }
  0x7f   : > { %8207 = vmatpush3.msra.mxu0 %v9672_v5  ;;  %8157 = vmatprep.mubr.f32.mxu0 %v1630_v28  ;;  %v1679_v5 = vsub.f32 %v9943_v44, %v1678_v60  ;;  %v1537_v28 = vsel %vm1490_vm1, %v330_v13, 0  ;;  %v1718_v31 = vand.u32 4294901760, %v10003_v36  ;;  %v10039_v13 = vsub.f32 %v1534_v7, %v10007_v17  ;;  %v313_v7 = vld [vmem:[%s9750_s12 + $0x70] sm:$0xff] }
  0x80   : > { %8189 = vmatmul.mubr.f32.gmra.mxu1 %v9886_v14  ;;  %8208 = vmatprep.subr.mxu0 %v9744_v24  ;;  %v1690_v59 = vand.u32 4294901760, %v1689_v43 }
  0x81   : > { %8191 = vmatprep.mubr.f32.mxu1 %v9888_v10  ;;  %8209 = vmatpush3.msra.mxu0 %v9744_v24  ;;  %v13477_v24 = vand.u32 4294901760, %v9987_v57  ;;  %v1680_v61 = vand.u32 4294901760, %v1679_v5 }
  0x82   : > { %8158 = vmatmul.mubr.f32.gmra.mxu0 %v1640_v50  ;;  %8262 = vmatprep.subr.mxu0 %v9692_v48  ;;  %v10029_v50 = vand.u32 4294901760, %v1537_v28 }
  0x83   : > { %8160 = vmatprep.mubr.f32.mxu0 %v1650_v11  ;;  %2696 = vperm.xlu0 %9347, %v9815_v15   ;;  %v1709_v15 = vsub.f32 %v9987_v57, %v13477_v24  ;;  %v13478_v11 = vand.u32 4294901760, %v10015_v45 }
  0x84   : > { %8192 = vmatmul.mubr.f32.gmra.mxu1 %v9915_v6  ;;  %9345 = vset.pattern.permute.xlu1 %v9426_v25  ;;  %v10050_v5 = vsub.f32 %v1537_v28, %v10029_v50 }
  0x85   : > { %8194 = vmatprep.mubr.f32.mxu1 %v9927_v34  ;;  %2794 = vperm.xlu1 %9345, %v307_v35   ;;  %v1710_v43 = vand.u32 4294901760, %v1709_v15  ;;  %v1729_v24 = vsub.f32 %v10015_v45, %v13478_v11  ;;  %v310_v11 = vld [vmem:[%s9750_s12 + $0x58] sm:$0xff] }
  0x86   : > { %8161 = vmatmul.mubr.f32.gmra.mxu0 %v1660_v26  ;;  %v1719_v26 = vsub.f32 %v10003_v36, %v1718_v31  ;;  %v1758_v28 = vand.u32 4294901760, %v10050_v5 }
  0x87   : > { %8163 = vmatprep.mubr.f32.mxu0 %v1670_v33  ;;  %2711 = vperm.xlu0 %9347, %v10032_v51   ;;  %v1738_v33 = vand.u32 4294901760, %v10027_v49 }
  0x88   : > { %8195 = vmatmul.mubr.f32.gmra.mxu1 %v9950_v46  ;;  %v1720_v20 = vand.u32 4294901760, %v1719_v26  ;;  %v1759_v26 = vsub.f32 %v10050_v5, %v1758_v28 }
  0x89   : > { %8197 = vmatprep.mubr.f32.mxu1 %v9957_v58  ;;  %v1739_v35 = vsub.f32 %v10027_v49, %v1738_v33  ;;  %2798 = vperm.xlu1 %9345, %v9962_v30  }
  0x8a   : > { %8164 = vmatmul.mubr.f32.gmra.mxu0 %v1680_v61  ;;  %v1748_v61 = vand.u32 4294901760, %v10039_v13 }
  0x8b   : > { %8166 = vmatprep.mubr.f32.mxu0 %v1690_v59  ;;  %2716 = vperm.xlu0 %9347, %v313_v7   ;;  %v1730_v59 = vand.u32 4294901760, %v1729_v24  ;;  %v1760_v24 = vand.u32 4294901760, %v1759_v26 }
  0x8c   : > { %8198 = vmatmul.mubr.f32.gmra.mxu1 %v9980_v42  ;;  %v1749_v15 = vsub.f32 %v10039_v13, %v1748_v61 }
  0x8d   : > { %8200 = vmatprep.mubr.f32.mxu1 %v9989_v9  ;;  %9346 = vset.pattern.permute.xlu1 %v9427_v37 }
  0x8e   : > { %8167 = vmatmul.mubr.f32.gmra.mxu0 %v1700_v54  ;;  %v1740_v54 = vand.u32 4294901760, %v1739_v35  ;;  %v1750_v30 = vand.u32 4294901760, %v1749_v15  ;;  %2701 = vperm.xlu1 %9346, %v310_v11  }
  0x8f   : > { %8169 = vmatprep.mubr.f32.mxu0 %v1710_v43  ;;  %9352 = vset.pattern.permute.xlu0 %v9426_v25 }
  0x90   : > { %8201 = vmatmul.mubr.f32.gmra.mxu1 %v10005_v53  ;;  %2818 = vperm.xlu0 %9352, %v313_v7   ;;  %v311_v7 = vld [vmem:[%s9750_s12 + $0x60] sm:$0xff] }
  0x91   : > { %8203 = vmatprep.mubr.f32.mxu1 %v10007_v17 }
  0x92   : > { %8170 = vmatmul.mubr.f32.gmra.mxu0 %v1720_v20  ;;  %9348 = vset.pattern.permute.xlu1 %v9426_v25 }
  0x93   : > { %8172 = vmatprep.mubr.f32.mxu0 %v1730_v59  ;;  %2806 = vperm.xlu1 %9348, %v310_v11   ;;  %v2909_v59 = vld [vmem:[%s13474_s4 + $0x48] sm:$0xff] }
  0x94   : > { %8204 = vmatmul.mubr.f32.gmra.mxu1 %v10029_v50 }
  0x95   : > { %8238 = vmatprep.mubr.f32.mxu1 %v1608_v0 }
  0x96   : > { %8173 = vmatmul.mubr.f32.gmra.mxu0 %v1740_v54 }
  0x97   : > { %8175 = vmatprep.mubr.f32.mxu0 %v1750_v30  ;;  %9349 = vset.pattern.permute.xlu1 %v9427_v37  ;;  %v10279_v30 = vand.u32 4294901760, %v2909_v59 }
  0x98   : > { %8239 = vmatmul.mubr.f32.vlgmr.msra.gmra.mxu1 %v1618_v19  ;;  %2706 = vperm.xlu1 %9349, %v311_v7  }
  0x99   : > { %8291 = vmatpush3.msra.mxu1 %v9651_v56  ;;  %8241 = vmatprep.mubr.f32.mxu1 %v1628_v55  ;;  %v13807_v56 = vand.u32 4294901760, %v9987_v57  ;;  %13824 = vst [vmem:[#allocation17_spill] sm:$0xff] %v10279_v30 }
  0x9a   : > { %8176 = vmatmul.mubr.f32.gmra.mxu0 %v1760_v24  ;;  %8292 = vmatprep.subr.mxu1 %v9735_v3 }
  0x9b   : > { %8210 = vmatprep.mubr.f32.mxu0 %v9850_v21  ;;  %8293 = vmatpush3.msra.mxu1 %v9735_v3  ;;  %v13808_v3 = vand.u32 4294901760, %v10015_v45 }
  0x9c   : > { %8242 = vmatmul.mubr.f32.gmra.mxu1 %v1638_v62  ;;  %9350 = vset.pattern.permute.xlu1 %v9426_v25  ;;  %v2914_v62 = vld [vmem:[%s13474_s4 + $0x70] sm:$0xff] }
  0x9d   : > { %8244 = vmatprep.mubr.f32.mxu1 %v1648_v1  ;;  %2810 = vperm.xlu1 %9350, %v311_v7   ;;  %v10201_v1 = vand.u32 4294901760, %v2914_v62 }
  0x9e   : > { %8211 = vmatmul.mubr.f32.vlgmr.msra.gmra.mxu0 %v9865_v8 }
  0x9f   : > { %8263 = vmatpush3.msra.mxu0 %v9692_v48  ;;  %8213 = vmatprep.mubr.f32.mxu0 %v9874_v4  ;;  %v314_v48 = vld [vmem:[%s9750_s12 + $0x78] sm:$0xff]  ;;  %13811 = vst [vmem:[#allocation4_spill] sm:$0xff] %v10201_v1 }
  0xa0   : > { %8245 = vmatmul.mubr.f32.gmra.mxu1 %v1658_v38  ;;  %8264 = vmatprep.subr.mxu0 %v9765_v32 }
  0xa1   : > { %8247 = vmatprep.mubr.f32.mxu1 %v1668_v16  ;;  %8265 = vmatpush3.msra.mxu0 %v9765_v32 }
  0xa2   : > { %8214 = vmatmul.mubr.f32.gmra.mxu0 %v9884_v12  ;;  %2814 = vperm.xlu1 %9350, %v10032_v51  }
  0xa3   : > { %8216 = vmatprep.mubr.f32.mxu0 %v9894_v41 }
  0xa4   : > { %8248 = vmatmul.mubr.f32.gmra.mxu1 %v1678_v60  ;;  %v2912_v60 = vld [vmem:[%s13474_s4 + $0x60] sm:$0xff] }
  0xa5   : > { %8250 = vmatprep.mubr.f32.mxu1 %v1688_v18 }
  0xa6   : > { %8217 = vmatmul.mubr.f32.gmra.mxu0 %v9910_v23  ;;  %9351 = vset.pattern.permute.xlu1 %v9427_v37 }
  0xa7   : > { %8219 = vmatprep.mubr.f32.mxu0 %v9913_v63  ;;  %2721 = vperm.xlu1 %9351, %v314_v48  }
  0xa8   : > { %8251 = vmatmul.mubr.f32.gmra.mxu1 %v1698_v40  ;;  %v10236_v40 = vand.u32 4294901760, %v2912_v60 }
  0xa9   : > { %8253 = vmatprep.mubr.f32.mxu1 %v13807_v56 }
  0xaa   : > { %8220 = vmatmul.mubr.f32.gmra.mxu0 %v9943_v44  ;;  %13817 = vst [vmem:[#allocation10_spill] sm:$0xff] %v10236_v40  ;;  %v10254_v11 = vsub.f32 %v2912_v60, %v10236_v40 }
  0xab   : > { %8222 = vmatprep.mubr.f32.mxu0 %v9954_v47  ;;  %9353 = vset.pattern.permute.xlu1 %v9426_v25 }
  0xac   : > { %8254 = vmatmul.mubr.f32.gmra.mxu1 %v1718_v31  ;;  %2822 = vperm.xlu1 %9353, %v314_v48   ;;  %13820 = vst [vmem:[#allocation13_spill] sm:$0xff] %v10254_v11  ;;  %v10266_v20 = vand.u32 4294901760, %v10254_v11 }
  0xad   : > { %8256 = vmatprep.mubr.f32.mxu1 %v13808_v3  ;;  %v2908_v3 = vld [vmem:[%s13474_s4 + $0x40] sm:$0xff] }
  0xae   : > { %8223 = vmatmul.mubr.f32.gmra.mxu0 %v9978_v2  ;;  %13821 = vst [vmem:[#allocation14_spill] sm:$0xff] %v10266_v20  ;;  %v3190_v7 = vsub.f32 %v10254_v11, %v10266_v20 }
  0xaf   : > { %8225 = vmatprep.mubr.f32.mxu0 %v9987_v57 }
  0xb0   : > { %8257 = vmatmul.mubr.f32.gmra.mxu1 %v1738_v33 }
  0xb1   : > { %8259 = vmatprep.mubr.f32.mxu1 %v1748_v61 }
  0xb2   : > { %8226 = vmatmul.mubr.f32.gmra.mxu0 %v10003_v36  ;;  %v2911_v36 = vld [vmem:[%s13474_s4 + $0x58] sm:$0xff] }
  0xb3   : > { %8228 = vmatprep.mubr.f32.mxu0 %v10015_v45 }
  0xb4   : > { %8260 = vmatmul.mubr.f32.gmra.mxu1 %v1758_v28 }
  0xb5   : > { %8294 = vmatprep.mubr.f32.mxu1 %v9833_v27 }
  0xb6   : > { %8229 = vmatmul.mubr.f32.gmra.mxu0 %v10027_v49 }
  0xb7   : > { %8231 = vmatprep.mubr.f32.mxu0 %v10039_v13  ;;  %v2910_v13 = vld [vmem:[%s13474_s4 + $0x50] sm:$0xff] }
  0xb8   : > { %8295 = vmatmul.mubr.f32.vlgmr.msra.gmra.mxu1 %v9845_v29  ;;  %v10271_v28 = vand.u32 4294901760, %v2910_v13 }
  0xb9   : > { %8297 = vmatprep.mubr.f32.mxu1 %v9852_v22 }
  0xba   : > { %8232 = vmatmul.mubr.f32.gmra.mxu0 %v10050_v5  ;;  %13823 = vst [vmem:[#allocation16_spill] sm:$0xff] %v10271_v28  ;;  %v10290_v48 = vsub.f32 %v2910_v13, %v10271_v28 }
  0xbb   : > { %8266 = vmatprep.mubr.f32.mxu0 %v9833_v27 }
  0xbc   : > { %8298 = vmatmul.mubr.f32.gmra.mxu1 %v9861_v39  ;;  %13826 = vst [vmem:[#allocation19_spill] sm:$0xff] %v10290_v48 }
  0xbd   : > { %8300 = vmatprep.mubr.f32.mxu1 %v9867_v52 }
  0xbe   : > { %8267 = vmatmul.mubr.f32.vlgmr.msra.gmra.mxu0 %v9845_v29 }
  0xbf   : > { %8269 = vmatprep.mubr.f32.mxu0 %v9852_v22 }
  0xc0   : > { %8301 = vmatmul.mubr.f32.gmra.mxu1 %v9886_v14 }
  0xc1   : > { %8303 = vmatprep.mubr.f32.mxu1 %v9888_v10 }
  0xc2   : > { %8270 = vmatmul.mubr.f32.gmra.mxu0 %v9861_v39 }
  0xc3   : > { %8272 = vmatprep.mubr.f32.mxu0 %v9867_v52 }
  0xc4   : > { %8304 = vmatmul.mubr.f32.gmra.mxu1 %v9915_v6 }
  0xc5   : > { %8306 = vmatprep.mubr.f32.mxu1 %v9927_v34 }
  0xc6   : > { %8273 = vmatmul.mubr.f32.gmra.mxu0 %v9886_v14  ;;  %v2915_v14 = vld [vmem:[%s13474_s4 + $0x78] sm:$0xff] }
  0xc7   : > { %8275 = vmatprep.mubr.f32.mxu0 %v9888_v10  ;;  %v10189_v41 = vand.u32 4294901760, %v2915_v14 }
  0xc8   : > { %8307 = vmatmul.mubr.f32.gmra.mxu1 %v9950_v46 }
  0xc9   : > { %8309 = vmatprep.mubr.f32.mxu1 %v9957_v58  ;;  %13809 = vst [vmem:[#allocation2_spill] sm:$0xff] %v10189_v41  ;;  %8318 = vmatprep.subr.mxu0 %v10189_v41 }
  0xca   : > { %8276 = vmatmul.mubr.f32.gmra.mxu0 %v9915_v6  ;;  %v10199_v6 = vsub.f32 %v2915_v14, %v10189_v41  ;;  %v10307_v14 = vand.u32 4294901760, %v10290_v48 }
  0xcb   : > { %8278 = vmatprep.mubr.f32.mxu0 %v9927_v34  ;;  %v2913_v34 = vld [vmem:[%s13474_s4 + $0x68] sm:$0xff]  ;;  %8319 = vmatpush3.msra.mxu0 %v10189_v41 }
  0xcc   : > { %8310 = vmatmul.mubr.f32.gmra.mxu1 %v9980_v42  ;;  %13810 = vst [vmem:[#allocation3_spill] sm:$0xff] %v10199_v6  ;;  %v10211_v44 = vand.u32 4294901760, %v10199_v6  ;;  %v10216_v47 = vand.u32 4294901760, %v2913_v34  ;;  %8320 = vmatprep.subr.mxu0 %v10201_v1  ;;  %13829 = vst [vmem:[#allocation22_spill] sm:$0xff] %v10307_v14 }
  0xcd   : > { %8312 = vmatprep.mubr.f32.mxu1 %v9989_v9  ;;  %8321 = vmatpush3.msra.mxu0 %v10201_v1 }
  0xce   : > { %8279 = vmatmul.mubr.f32.gmra.mxu0 %v9950_v46  ;;  %13812 = vst [vmem:[#allocation5_spill] sm:$0xff] %v10211_v44  ;;  %v10214_v46 = vsub.f32 %v2914_v62, %v10201_v1  ;;  %13814 = vst [vmem:[#allocation7_spill] sm:$0xff] %v10216_v47  ;;  %v3169_v18 = vsub.f32 %v10199_v6, %v10211_v44  ;;  %8322 = vmatprep.subr.mxu0 %v10216_v47 }
  0xcf   : > { %8281 = vmatprep.mubr.f32.mxu0 %v9957_v58  ;;  %8323 = vmatpush3.msra.mxu0 %v10216_v47 }
  0xd0   : > { %8313 = vmatmul.mubr.f32.gmra.mxu1 %v10005_v53  ;;  %13813 = vst [vmem:[#allocation6_spill] sm:$0xff] %v10214_v46  ;;  %v10230_v57 = vand.u32 4294901760, %v10214_v46  ;;  %v3170_v45 = vand.u32 4294901760, %v3169_v18  ;;  %8324 = vmatprep.subr.mxu0 %v10236_v40 }
  0xd1   : > { %8315 = vmatprep.mubr.f32.mxu1 %v10007_v17  ;;  %8325 = vmatpush3.msra.mxu0 %v10236_v40 }
  0xd2   : > { %8282 = vmatmul.mubr.f32.gmra.mxu0 %v9980_v42  ;;  %13815 = vst [vmem:[#allocation8_spill] sm:$0xff] %v10230_v57  ;;  %v3176_v31 = vsub.f32 %v10214_v46, %v10230_v57  ;;  %8374 = vmatprep.subr.mxu1 %v3170_v45 }
  0xd3   : > { %8284 = vmatprep.mubr.f32.mxu0 %v9989_v9  ;;  %v10233_v9 = vsub.f32 %v2913_v34, %v10216_v47  ;;  %8375 = vmatpush3.msra.mxu1 %v3170_v45 }
  0xd4   : > { %8316 = vmatmul.mubr.f32.gmra.mxu1 %v10029_v50  ;;  %v3177_v43 = vand.u32 4294901760, %v3176_v31 }
  0xd5   : > { %13816 = vst [vmem:[#allocation9_spill] sm:$0xff] %v10233_v9  ;;  %v10247_v49 = vand.u32 4294901760, %v10233_v9 }
  0xd6   : > { %8285 = vmatmul.mubr.f32.gmra.mxu0 %v10005_v53  ;;  %8376 = vmatprep.subr.mxu1 %v3177_v43 }
  0xd7   : > { %8287 = vmatprep.mubr.f32.mxu0 %v10007_v17  ;;  %13818 = vst [vmem:[#allocation11_spill] sm:$0xff] %v10247_v49  ;;  %v3183_v61 = vsub.f32 %v10233_v9, %v10247_v49  ;;  %8377 = vmatpush3.msra.mxu1 %v3177_v43 }
  0xd8   : > { %v8024_v25 = vpop.f32.mrf.mxu1 }
  0xd9   : > { %v3184_v26 = vand.u32 4294901760, %v3183_v61 }
  0xda   : > { %v10169_v32 = vpop.f32.mrf.mxu1  ;;  %8288 = vmatmul.mubr.f32.gmra.mxu0 %v10029_v50  ;;  %v10249_v50 = vand.u32 4294901760, %v2911_v36 }
  0xdb   : > { %8378 = vmatprep.subr.mxu1 %v3184_v26 }
  0xdc   : > { %v8027_v37 = vpop.f32.mrf.mxu1  ;;  %13819 = vst [vmem:[#allocation12_spill] sm:$0xff] %v10249_v50  ;;  %v10269_v35 = vsub.f32 %v2911_v36, %v10249_v50  ;;  %8326 = vmatprep.subr.mxu0 %v10249_v50  ;;  %8379 = vmatpush3.msra.mxu1 %v3184_v26  ;;  %v3204_v36 = vsub.f32 %v10290_v48, %v10307_v14 }
  0xdd   : > { %8327 = vmatpush3.msra.mxu0 %v10249_v50 }
  0xde   : > { %v10172_v27 = vpop.f32.mrf.mxu1  ;;  %v7998_v29 = vpop.f32.mrf.mxu0  ;;  %13822 = vst [vmem:[#allocation15_spill] sm:$0xff] %v10269_v35  ;;  %v10287_v56 = vand.u32 4294901760, %v10269_v35  ;;  %8328 = vmatprep.subr.mxu0 %v10271_v28 }
  0xdf   : > { %v10174_v21 = vadd.f32 %v8024_v25, %v7998_v29  ;;  %v10299_v29 = vsub.f32 %v2909_v59, %v10279_v30  ;;  %8329 = vmatpush3.msra.mxu0 %v10271_v28  ;;  %v3205_v59 = vand.u32 4294901760, %v3204_v36 }
  0xe0   : > { %v10176_v22 = vpop.f32.mrf.mxu0  ;;  %v8030_v39 = vpop.f32.mrf.mxu1  ;;  %13825 = vst [vmem:[#allocation18_spill] sm:$0xff] %v10287_v56  ;;  %8330 = vmatprep.subr.mxu0 %v10279_v30 }
  0xe1   : > { %13827 = vst [vmem:[#allocation20_spill] sm:$0xff] %v10299_v29  ;;  %v10316_v34 = vand.u32 4294901760, %v10299_v29  ;;  %8331 = vmatpush3.msra.mxu0 %v10279_v30 }
  0xe2   : > { %v8001_v8 = vpop.f32.mrf.mxu0  ;;  %v10178_v52 = vpop.f32.mrf.mxu1 }
  0xe3   : > { %v10180_v0 = vadd.f32 %v8027_v37, %v8001_v8  ;;  %v3191_v8 = vand.u32 4294901760, %v3190_v7  ;;  %13830 = vst [vmem:[#allocation23_spill] sm:$0xff] %v10316_v34  ;;  %v3211_v13 = vsub.f32 %v10299_v29, %v10316_v34 }
  0xe4   : > { %v10182_v4 = vpop.f32.mrf.mxu0  ;;  %v8033_v12 = vpop.f32.mrf.mxu1 }
  0xe5   : > { %8380 = vmatprep.subr.mxu1 %v3191_v8 }
  0xe6   : > { %v8004_v10 = vpop.f32.mrf.mxu0  ;;  %v10187_v19 = vpop.f32.mrf.mxu1  ;;  %8381 = vmatpush3.msra.mxu1 %v3191_v8 }
  0xe7   : > { %v10191_v55 = vadd.f32 %v8030_v39, %v8004_v10  ;;  %v10301_v39 = vand.u32 4294901760, %v2908_v3  ;;  %v2907_v10 = vld [vmem:[%s13474_s4 + $0x38] sm:$0xff] }
  0xe8   : > { %v10196_v23 = vpop.f32.mrf.mxu0  ;;  %v8036_v63 = vpop.f32.mrf.mxu1  ;;  %v10321_v60 = vand.u32 4294901760, %v2907_v10 }
  0xe9   : > { %13828 = vst [vmem:[#allocation21_spill] sm:$0xff] %v10301_v39  ;;  %8332 = vmatprep.subr.mxu0 %v10301_v39 }
  0xea   : > { %v8007_v38 = vpop.f32.mrf.mxu0  ;;  %v10208_v16 = vpop.f32.mrf.mxu1  ;;  %13832 = vst [vmem:[#allocation25_spill] sm:$0xff] %v10321_v60  ;;  %v10340_v43 = vsub.f32 %v2907_v10, %v10321_v60  ;;  %8333 = vmatpush3.msra.mxu0 %v10301_v39 }
  0xeb   : > { %v10219_v58 = vadd.f32 %v8033_v12, %v8007_v38  ;;  %v3197_v12 = vsub.f32 %v10269_v35, %v10287_v56  ;;  %v10319_v38 = vsub.f32 %v2908_v3, %v10301_v39  ;;  %8334 = vmatprep.subr.mxu0 %v10321_v60  ;;  %v3212_v3 = vand.u32 4294901760, %v3211_v13  ;;  %v2903_v56 = vld [vmem:[%s13474_s4 + $0x18] sm:$0xff] }
  0xec   : > { %v10225_v2 = vpop.f32.mrf.mxu0  ;;  %v8039_v42 = vpop.f32.mrf.mxu1  ;;  %13834 = vst [vmem:[#allocation27_spill] sm:$0xff] %v10340_v43  ;;  %8335 = vmatpush3.msra.mxu0 %v10321_v60  ;;  %v10357_v10 = vand.u32 4294901760, %v10340_v43 }
  0xed   : > { %13831 = vst [vmem:[#allocation24_spill] sm:$0xff] %v10319_v38  ;;  %v3198_v18 = vand.u32 4294901760, %v3197_v12 }
  0xee   : > { %v8010_v53 = vpop.f32.mrf.mxu0  ;;  %v10242_v17 = vpop.f32.mrf.mxu1  ;;  %13836 = vst [vmem:[#allocation29_spill] sm:$0xff] %v10357_v10 }
  0xef   : > { %v10251_v51 = vadd.f32 %v8036_v63, %v8010_v53  ;;  %v2906_v53 = vld [vmem:[%s13474_s4 + $0x30] sm:$0xff]  ;;  %8382 = vmatprep.subr.mxu1 %v3198_v18 }
  0xf0   : > { %v10260_v33 = vpop.f32.mrf.mxu0  ;;  %v8042_v5 = vpop.f32.mrf.mxu1  ;;  %v10342_v61 = vand.u32 4294901760, %v2906_v53  ;;  %8383 = vmatpush3.msra.mxu1 %v3198_v18 }
  0xf1   : > { %8384 = vmatprep.subr.mxu1 %v3205_v59 }
  0xf2   : > { %v8013_v15 = vpop.f32.mrf.mxu0  ;;  %v10277_v54 = vpop.f32.mrf.mxu1  ;;  %13835 = vst [vmem:[#allocation28_spill] sm:$0xff] %v10342_v61  ;;  %8336 = vmatprep.subr.mxu0 %v10342_v61  ;;  %8385 = vmatpush3.msra.mxu1 %v3205_v59 }
  0xf3   : > { %v10282_v24 = vadd.f32 %v8039_v42, %v8013_v15  ;;  %v2905_v15 = vld [vmem:[%s13474_s4 + $0x28] sm:$0xff]  ;;  %8337 = vmatpush3.msra.mxu0 %v10342_v61  ;;  %8386 = vmatprep.subr.mxu1 %v3212_v3 }
  0xf4   : > { %v10296_v25 = vpop.f32.mrf.mxu0  ;;  %v8045_v37 = vpop.f32.mrf.mxu1  ;;  %v10362_v36 = vand.u32 4294901760, %v2905_v15  ;;  %8387 = vmatpush3.msra.mxu1 %v3212_v3 }
  0xf6   : > { %v8016_v62 = vpop.f32.mrf.mxu0  ;;  %v10313_v63 = vpop.f32.mrf.mxu1  ;;  %13838 = vst [vmem:[#allocation31_spill] sm:$0xff] %v10362_v36  ;;  %v10377_v34 = vsub.f32 %v2905_v15, %v10362_v36  ;;  %8338 = vmatprep.subr.mxu0 %v10362_v36 }
  0xf7   : > { %v10324_v42 = vadd.f32 %v8042_v5, %v8016_v62  ;;  %v10337_v5 = vand.u32 4294901760, %v10319_v38  ;;  %v10360_v62 = vsub.f32 %v2906_v53, %v10342_v61  ;;  %v3225_v53 = vsub.f32 %v10340_v43, %v10357_v10  ;;  %8339 = vmatpush3.msra.mxu0 %v10362_v36 }
  0xf8   : > { %v10332_v45 = vpop.f32.mrf.mxu0  ;;  %v8076_v31 = vpop.f32.mrf.mxu1  ;;  %13840 = vst [vmem:[#allocation33_spill] sm:$0xff] %v10377_v34  ;;  %v10392_v49 = vand.u32 4294901760, %v10377_v34  ;;  %v10399_v43 = vand.u32 4294901760, %v2903_v56 }
  0xf9   : > { %13833 = vst [vmem:[#allocation26_spill] sm:$0xff] %v10337_v5  ;;  %v3218_v8 = vsub.f32 %v10319_v38, %v10337_v5  ;;  %13837 = vst [vmem:[#allocation30_spill] sm:$0xff] %v10360_v62  ;;  %v3226_v20 = vand.u32 4294901760, %v3225_v53 }
  0xfa   : > { %v8019_v26 = vpop.f32.mrf.mxu0  ;;  %v10349_v7 = vpop.f32.mrf.mxu1  ;;  %13842 = vst [vmem:[#allocation35_spill] sm:$0xff] %v10392_v49  ;;  %13844 = vst [vmem:[#allocation37_spill] sm:$0xff] %v10399_v43  ;;  %v10416_v38 = vsub.f32 %v2903_v56, %v10399_v43 }
  0xfb   : > { %v10354_v12 = vadd.f32 %v8045_v37, %v8019_v26  ;;  %v3219_v5 = vand.u32 4294901760, %v3218_v8  ;;  %v2904_v37 = vld [vmem:[%s13474_s4 + $0x20] sm:$0xff]  ;;  %v10374_v26 = vand.u32 4294901760, %v10360_v62 }
  0xfc   : > { %v10365_v18 = vpop.f32.mrf.mxu0  ;;  %v8079_v13 = vpop.f32.mrf.mxu1  ;;  %v10382_v14 = vand.u32 4294901760, %v2904_v37  ;;  %13846 = vst [vmem:[#allocation39_spill] sm:$0xff] %v10416_v38 }
  0xfd   : > { %13839 = vst [vmem:[#allocation32_spill] sm:$0xff] %v10374_v26  ;;  %8388 = vmatprep.subr.mxu1 %v3219_v5  ;;  %v3232_v15 = vsub.f32 %v10360_v62, %v10374_v26  ;;  %v3239_v26 = vsub.f32 %v10377_v34, %v10392_v49 }
  0xfe   : > { %v8050_v59 = vpop.f32.mrf.mxu0  ;;  %v10380_v8 = vpop.f32.mrf.mxu1  ;;  %13841 = vst [vmem:[#allocation34_spill] sm:$0xff] %v10382_v14  ;;  %8389 = vmatpush3.msra.mxu1 %v3219_v5  ;;  %v10397_v44 = vsub.f32 %v2904_v37, %v10382_v14  ;;  %8340 = vmatprep.subr.mxu0 %v10382_v14 }
  0xff   : > { %v869_v10 = vadd.f32 %v8050_v59, %v10174_v21  ;;  %v2902_v21 = vld [vmem:[%s13474_s4 + $0x10] sm:$0xff]  ;;  %8390 = vmatprep.subr.mxu1 %v3226_v20  ;;  %v3233_v59 = vand.u32 4294901760, %v3232_v15  ;;  %8341 = vmatpush3.msra.mxu0 %v10382_v14  ;;  %v3240_v15 = vand.u32 4294901760, %v3239_v26  ;;  %v10433_v14 = vand.u32 4294901760, %v10416_v38 }
 0x100   : > { %v10394_v57 = vpop.f32.mrf.mxu0  ;;  %v8082_v3 = vpop.f32.mrf.mxu1  ;;  %13843 = vst [vmem:[#allocation36_spill] sm:$0xff] %v10397_v44  ;;  %8391 = vmatpush3.msra.mxu1 %v3226_v20  ;;  %v10413_v62 = vand.u32 4294901760, %v10397_v44  ;;  %v10418_v36 = vand.u32 4294901760, %v2902_v21  ;;  %8342 = vmatprep.subr.mxu0 %v10399_v43 }
 0x101   : > { %v10405_v53 = vadd.f32 %v8076_v31, %v869_v10  ;;  %v2901_v31 = vld [vmem:[%s13474_s4 + $0x8] sm:$0xff]  ;;  %8392 = vmatprep.subr.mxu1 %v3233_v59  ;;  %8343 = vmatpush3.msra.mxu0 %v10399_v43  ;;  %13849 = vst [vmem:[#allocation42_spill] sm:$0xff] %v10433_v14  ;;  %v3253_v43 = vsub.f32 %v10416_v38, %v10433_v14 }
 0x102   : > { %v8053_v5 = vpop.f32.mrf.mxu0  ;;  %v10410_v37 = vpop.f32.mrf.mxu1  ;;  %13845 = vst [vmem:[#allocation38_spill] sm:$0xff] %v10413_v62  ;;  %13847 = vst [vmem:[#allocation40_spill] sm:$0xff] %v10418_v36  ;;  %v10425_v49 = vand.u32 4294901760, %v2901_v31  ;;  %8393 = vmatpush3.msra.mxu1 %v3233_v59  ;;  %v3246_v34 = vsub.f32 %v10397_v44, %v10413_v62  ;;  %v10436_v29 = vsub.f32 %v2902_v21, %v10418_v36  ;;  %8344 = vmatprep.subr.mxu0 %v10418_v36 }
 0x103   : > { %v883_v10 = vadd.f32 %v8053_v5, %v10180_v0  ;;  %v2900_v0 = vld [vmem:[%s13474_s4] sm:$0xff]  ;;  %8394 = vmatprep.subr.mxu1 %v3240_v15  ;;  %8345 = vmatpush3.msra.mxu0 %v10418_v36 }
 0x104   : > { %13848 = vst [vmem:[#allocation41_spill] sm:$0xff] %v10425_v49  ;;  %v10428_v20 = vpop.f32.mrf.mxu0  ;;  %v8085_v56 = vpop.f32.mrf.mxu1  ;;  %13850 = vst [vmem:[#allocation43_spill] sm:$0xff] %v10436_v29  ;;  %v10445_v59 = vsub.f32 %v2901_v31, %v10425_v49  ;;  %v10447_v5 = vand.u32 4294901760, %v2900_v0  ;;  %8395 = vmatpush3.msra.mxu1 %v3240_v15  ;;  %v3247_v21 = vand.u32 4294901760, %v3246_v34  ;;  %8346 = vmatprep.subr.mxu0 %v10425_v49  ;;  %v3254_v34 = vand.u32 4294901760, %v3253_v43 }
 0x105   : > { %v10442_v26 = vadd.f32 %v8079_v13, %v883_v10  ;;  %v10457_v10 = vand.u32 4294901760, %v10436_v29  ;;  %8347 = vmatpush3.msra.mxu0 %v10425_v49 }
 0x106   : > { %13851 = vst [vmem:[#allocation44_spill] sm:$0xff] %v10445_v59  ;;  %13852 = vst [vmem:[#allocation45_spill] sm:$0xff] %v10447_v5  ;;  %v8056_v62 = vpop.f32.mrf.mxu0  ;;  %v10450_v44 = vpop.f32.mrf.mxu1  ;;  %v10460_v31 = vand.u32 4294901760, %v10445_v59  ;;  %8396 = vmatprep.subr.mxu1 %v3247_v21  ;;  %v10466_v15 = vsub.f32 %v2900_v0, %v10447_v5  ;;  %8348 = vmatprep.subr.mxu0 %v10447_v5 }
 0x107   : > { %13853 = vst [vmem:[#allocation46_spill] sm:$0xff] %v10450_v44  ;;  %v897_v13 = vadd.f32 %v8056_v62, %v10191_v55  ;;  %13854 = vst [vmem:[#allocation47_spill] sm:$0xff] %v10457_v10  ;;  %8397 = vmatpush3.msra.mxu1 %v3247_v21  ;;  %v3260_v55 = vsub.f32 %v10436_v29, %v10457_v10  ;;  %8349 = vmatpush3.msra.mxu0 %v10447_v5 }
 0x108   : > { %13855 = vst [vmem:[#allocation48_spill] sm:$0xff] %v10460_v31  ;;  %v10463_v36 = vpop.f32.mrf.mxu0  ;;  %v8088_v61 = vpop.f32.mrf.mxu1  ;;  %13856 = vst [vmem:[#allocation49_spill] sm:$0xff] %v10466_v15  ;;  %v3267_v62 = vsub.f32 %v10445_v59, %v10460_v31  ;;  %8398 = vmatprep.subr.mxu1 %v3254_v34  ;;  %v10478_v43 = vand.u32 4294901760, %v10466_v15  ;;  %8430 = vmatprep.subr.mxu0 %v10199_v6 }
 0x109   : > { %v10469_v14 = vadd.f32 %v8082_v3, %v897_v13  ;;  %8399 = vmatpush3.msra.mxu1 %v3254_v34  ;;  %v3261_v3 = vand.u32 4294901760, %v3260_v55 }
 0x10a   : > { %v8059_v38 = vpop.f32.mrf.mxu0  ;;  %v10475_v49 = vpop.f32.mrf.mxu1  ;;  %13858 = vst [vmem:[#allocation51_spill] sm:$0xff] %v10478_v43  ;;  %v3268_v21 = vand.u32 4294901760, %v3267_v62  ;;  %v3274_v31 = vsub.f32 %v10466_v15, %v10478_v43 }
 0x10b   : > { %13857 = vst [vmem:[#allocation50_spill] sm:$0xff] %v10475_v49  ;;  %v911_v0 = vadd.f32 %v8059_v38, %v10219_v58  ;;  %8400 = vmatprep.subr.mxu1 %v3261_v3 }
 0x10c   : > { %v10483_v13 = vpop.f32.mrf.mxu0  ;;  %v8091_v10 = vpop.f32.mrf.mxu1  ;;  %8401 = vmatpush3.msra.mxu1 %v3261_v3  ;;  %v3275_v5 = vand.u32 4294901760, %v3274_v31 }
 0x10d   : > { %v1097_v59 = vadd.f32 %v8085_v56, %v911_v0  ;;  %8402 = vmatprep.subr.mxu1 %v3268_v21 }
 0x10e   : > { %v8062_v29 = vpop.f32.mrf.mxu0  ;;  %v10487_v48 = vpop.f32.mrf.mxu1  ;;  %8403 = vmatpush3.msra.mxu1 %v3268_v21 }
 0x10f   : > { %13859 = vst [vmem:[#allocation52_spill] sm:$0xff] %v10487_v48  ;;  %v925_v58 = vadd.f32 %v8062_v29, %v10251_v51  ;;  %8404 = vmatprep.subr.mxu1 %v3275_v5  ;;  %v10498_v51 = vpop.permute.xlu1 %2762 }
 0x110   : > { %v10490_v38 = vpop.f32.mrf.mxu0  ;;  %v8094_v34 = vpop.f32.mrf.mxu1  ;;  %8405 = vmatpush3.msra.mxu1 %v3275_v5 }
 0x111   : > { %v1113_v55 = vadd.f32 %v8088_v61, %v925_v58  ;;  %8486 = vmatprep.subr.mxu1 %v10189_v41 }
 0x112   : > { %v8065_v62 = vpop.f32.mrf.mxu0  ;;  %v10492_v60 = vpop.f32.mrf.mxu1 }
 0x113   : > { %13860 = vst [vmem:[#allocation53_spill] sm:$0xff] %v10492_v60  ;;  %v939_v56 = vadd.f32 %v8065_v62, %v10282_v24  ;;  %v10508_v62 = vpop.permute.xlu1 %2766 }
 0x114   : > { %v10496_v0 = vpop.f32.mrf.mxu0  ;;  %v8097_v31 = vpop.f32.mrf.mxu1 }
 0x115   : > { %v1129_v3 = vadd.f32 %v8091_v10, %v939_v56 }
 0x116   : > { %v8068_v29 = vpop.f32.mrf.mxu0  ;;  %v10500_v43 = vpop.f32.mrf.mxu1 }
 0x117   : > { %13861 = vst [vmem:[#allocation54_spill] sm:$0xff] %v10500_v43  ;;  %v953_v61 = vadd.f32 %v8068_v29, %v10324_v42  ;;  %v10515_v29 = vpop.permute.xlu1 %2661 }
 0x118   : > { %v10503_v21 = vpop.f32.mrf.mxu0  ;;  %v8128_v58 = vpop.f32.mrf.mxu1 }
 0x119   : > { %v1145_v15 = vadd.f32 %v8094_v34, %v953_v61 }
 0x11a   : > { %v8071_v5 = vpop.f32.mrf.mxu0  ;;  %v10505_v35 = vpop.f32.mrf.mxu1 }
 0x11b   : > { %13862 = vst [vmem:[#allocation55_spill] sm:$0xff] %v10505_v35  ;;  %v967_v24 = vadd.f32 %v8071_v5, %v10354_v12  ;;  %v10528_v6 = vpop.permute.xlu1 %2774 }
 0x11c   : > { %v10510_v39 = vpop.f32.mrf.mxu0  ;;  %v8131_v10 = vpop.f32.mrf.mxu1 }
 0x11d   : > { %13863 = vst [vmem:[#allocation56_spill] sm:$0xff] %v10510_v39  ;;  %v1161_v56 = vadd.f32 %v8097_v31, %v967_v24 }
 0x11e   : > { %v8102_v11 = vpop.f32.mrf.mxu0  ;;  %v10512_v30 = vpop.f32.mrf.mxu1 }
 0x11f   : > { %13864 = vst [vmem:[#allocation57_spill] sm:$0xff] %v10512_v30  ;;  %v1241_v42 = vadd.f32 %v8102_v11, %v10405_v53 }
 0x120   : > { %v10517_v9 = vpop.f32.mrf.mxu0  ;;  %v8134_v34 = vpop.f32.mrf.mxu1 }
 0x121   : > { %v10519_v61 = vadd.f32 %v8128_v58, %v1241_v42 }
 0x122   : > { %v8105_v28 = vpop.f32.mrf.mxu0  ;;  %v10521_v12 = vpop.f32.mrf.mxu1 }
 0x123   : > { %13865 = vst [vmem:[#allocation58_spill] sm:$0xff] %v10519_v61  ;;  %13866 = vst [vmem:[#allocation59_spill] sm:$0xff] %v10521_v12  ;;  %v1253_v5 = vadd.f32 %v8105_v28, %v10442_v26  ;;  %v10539_v26 = vpop.permute.xlu0 %2770 }
 0x124   : > { %v10524_v46 = vpop.f32.mrf.mxu0  ;;  %v8137_v31 = vpop.f32.mrf.mxu1 }
 0x125   : > { %13867 = vst [vmem:[#allocation60_spill] sm:$0xff] %v10524_v46  ;;  %v10526_v24 = vadd.f32 %v8131_v10, %v1253_v5  ;;  %v10541_v10 = vpop.permute.xlu1 %2666 }
 0x126   : > { %v8108_v11 = vpop.f32.mrf.mxu0  ;;  %v10530_v53 = vpop.f32.mrf.mxu1 }
 0x127   : > { %13868 = vst [vmem:[#allocation61_spill] sm:$0xff] %v10526_v24  ;;  %13869 = vst [vmem:[#allocation62_spill] sm:$0xff] %v10530_v53  ;;  %v1265_v50 = vadd.f32 %v8108_v11, %v10469_v14 }
 0x128   : > { %v10533_v40 = vpop.f32.mrf.mxu0  ;;  %v8140_v58 = vpop.f32.mrf.mxu1 }
 0x129   : > { %13870 = vst [vmem:[#allocation63_spill] sm:$0xff] %v10533_v40  ;;  %v10535_v42 = vadd.f32 %v8134_v34, %v1265_v50 }
 0x12a   : > { %v8111_v47 = vpop.f32.mrf.mxu0  ;;  %v10537_v1 = vpop.f32.mrf.mxu1 }
 0x12b   : > { %13871 = vst [vmem:[#allocation64_spill] sm:$0xff] %v10535_v42  ;;  %13872 = vst [vmem:[#allocation65_spill] sm:$0xff] %v10537_v1  ;;  %v1277_v28 = vadd.f32 %v8111_v47, %v1097_v59  ;;  %v10551_v42 = vpop.permute.xlu0 %2786  ;;  %v10553_v47 = vpop.permute.xlu1 %2778 }
 0x12c   : > { %v10543_v5 = vpop.f32.mrf.mxu0  ;;  %v8143_v41 = vpop.f32.mrf.mxu1 }
 0x12d   : > { %13873 = vst [vmem:[#allocation66_spill] sm:$0xff] %v10543_v5  ;;  %v10545_v24 = vadd.f32 %v8137_v31, %v1277_v28 }
 0x12e   : > { %v8114_v53 = vpop.f32.mrf.mxu0  ;;  %v10547_v14 = vpop.f32.mrf.mxu1 }
 0x12f   : > { %13874 = vst [vmem:[#allocation67_spill] sm:$0xff] %v10545_v24  ;;  %13875 = vst [vmem:[#allocation68_spill] sm:$0xff] %v10547_v14  ;;  %v1289_v11 = vadd.f32 %v8114_v53, %v1113_v55  ;;  %v10561_v53 = vpop.permute.xlu0 %2802  ;;  %v10563_v14 = vpop.permute.xlu1 %2782 }
 0x130   : > { %v10549_v12 = vpop.f32.mrf.mxu0  ;;  %v8146_v50 = vpop.f32.mrf.mxu1 }
 0x131   : > { %13876 = vst [vmem:[#allocation69_spill] sm:$0xff] %v10549_v12  ;;  %v1451_v34 = vadd.f32 %v8140_v58, %v1289_v11 }
 0x132   : > { %v8117_v59 = vpop.f32.mrf.mxu0  ;;  %v10555_v1 = vpop.f32.mrf.mxu1 }
 0x133   : > { %13877 = vst [vmem:[#allocation70_spill] sm:$0xff] %v10555_v1  ;;  %v1301_v30 = vadd.f32 %v8117_v59, %v1129_v3  ;;  %v10571_v59 = vpop.permute.xlu1 %2681 }
 0x134   : > { %v10557_v5 = vpop.f32.mrf.mxu0  ;;  %v8149_v31 = vpop.f32.mrf.mxu1 }
 0x135   : > { %13878 = vst [vmem:[#allocation71_spill] sm:$0xff] %v10557_v5  ;;  %v1463_v28 = vadd.f32 %v8143_v41, %v1301_v30 }
 0x136   : > { %v8120_v24 = vpop.f32.mrf.mxu0  ;;  %v10559_v43 = vpop.f32.mrf.mxu1 }
 0x137   : > { %13879 = vst [vmem:[#allocation72_spill] sm:$0xff] %v10559_v43  ;;  %v1313_v55 = vadd.f32 %v8120_v24, %v1145_v15  ;;  %v10577_v24 = vpop.permute.xlu0 %2646 }
 0x138   : > { %v10565_v58 = vpop.f32.mrf.mxu0  ;;  %v10567_v11 = vpop.f32.mrf.mxu1 }
 0x139   : > { %13880 = vst [vmem:[#allocation73_spill] sm:$0xff] %v10565_v58  ;;  %13881 = vst [vmem:[#allocation74_spill] sm:$0xff] %v10567_v11  ;;  %v1475_v12 = vadd.f32 %v8146_v50, %v1313_v55  ;;  %v10587_v55 = vpop.permute.xlu1 %2790 }
 0x13a   : > { %v8123_v61 = vpop.f32.mrf.mxu0  ;;  %v10569_v1 = vpop.f32.mrf.mxu1 }
 0x13b   : > { %13882 = vst [vmem:[#allocation75_spill] sm:$0xff] %v10569_v1  ;;  %v1325_v3 = vadd.f32 %v8123_v61, %v1161_v56  ;;  %v10593_v1 = vpop.permute.xlu0 %2651 }
 0x13c   : > { %v10573_v41 = vpop.f32.mrf.mxu0  ;;  %v10575_v30 = vpop.f32.mrf.mxu1 }
 0x13d   : > { %13883 = vst [vmem:[#allocation76_spill] sm:$0xff] %v10573_v41  ;;  %13884 = vst [vmem:[#allocation77_spill] sm:$0xff] %v10575_v30  ;;  %v1487_v15 = vadd.f32 %v8149_v31, %v1325_v3 }
 0x13e   : > { %v10579_v43 = vpop.f32.mrf.mxu0  ;;  %v10581_v5 = vpop.f32.mrf.mxu1 }
 0x13f   : > { %13885 = vst [vmem:[#allocation78_spill] sm:$0xff] %v10579_v43  ;;  %13886 = vst [vmem:[#allocation79_spill] sm:$0xff] %v10581_v5  ;;  %v10603_v5 = vpop.permute.xlu1 %2686 }
 0x140   : > { %v10583_v58 = vpop.f32.mrf.mxu0  ;;  %v10585_v50 = vpop.f32.mrf.mxu1 }
 0x141   : > { %13887 = vst [vmem:[#allocation80_spill] sm:$0xff] %v10583_v58  ;;  %13888 = vst [vmem:[#allocation81_spill] sm:$0xff] %v10585_v50  ;;  %v10607_v58 = vpop.permute.xlu0 %2656 }
 0x142   : > { %v10589_v56 = vpop.f32.mrf.mxu0  ;;  %v10591_v61 = vpop.f32.mrf.mxu1 }
 0x143   : > { %13889 = vst [vmem:[#allocation82_spill] sm:$0xff] %v10589_v56  ;;  %13890 = vst [vmem:[#allocation83_spill] sm:$0xff] %v10591_v61  ;;  %v10615_v35 = vpop.permute.xlu1 %2794 }
 0x144   : > { %v10595_v30 = vpop.f32.mrf.mxu0  ;;  %v10597_v31 = vpop.f32.mrf.mxu1  ;;  %13899 = vst [vmem:[#allocation92_spill] sm:$0xff] %v10615_v35 }
 0x145   : > { %13891 = vst [vmem:[#allocation84_spill] sm:$0xff] %v10595_v30  ;;  %13892 = vst [vmem:[#allocation85_spill] sm:$0xff] %v10597_v31  ;;  %v10619_v60 = vpop.permute.xlu0 %2671 }
 0x146   : > { %v10599_v3 = vpop.f32.mrf.mxu0  ;;  %v10601_v11 = vpop.f32.mrf.mxu1 }
 0x147   : > { %13893 = vst [vmem:[#allocation86_spill] sm:$0xff] %v10599_v3  ;;  %13894 = vst [vmem:[#allocation87_spill] sm:$0xff] %v10601_v11  ;;  %v10627_v46 = vpop.permute.xlu1 %2798 }
 0x148   : > { %v10605_v41 = vpop.f32.mrf.mxu0  ;;  %v8196_v50 = vpop.f32.mrf.mxu1 }
 0x149   : > { %13895 = vst [vmem:[#allocation88_spill] sm:$0xff] %v10605_v41 }
 0x14a   : > { %v10609_v56 = vpop.f32.mrf.mxu0  ;;  %v10611_v61 = vpop.f32.mrf.mxu1 }
 0x14b   : > { %13896 = vst [vmem:[#allocation89_spill] sm:$0xff] %v10609_v56  ;;  %13897 = vst [vmem:[#allocation90_spill] sm:$0xff] %v10611_v61 }
 0x14c   : > { %v10613_v43 = vpop.f32.mrf.mxu0  ;;  %v8199_v30 = vpop.f32.mrf.mxu1 }
 0x14d   : > { %13898 = vst [vmem:[#allocation91_spill] sm:$0xff] %v10613_v43 }
 0x14e   : > { %v8168_v31 = vpop.f32.mrf.mxu0  ;;  %v10617_v3 = vpop.f32.mrf.mxu1 }
 0x14f   : > { %13900 = vst [vmem:[#allocation93_spill] sm:$0xff] %v10617_v3  ;;  %v1703_v11 = vadd.f32 %v8168_v31, %v1451_v34  ;;  %v2677_v3 = vpop.permute.xlu0 %2676 }
 0x150   : > { %v10621_v40 = vpop.f32.mrf.mxu0  ;;  %v8202_v41 = vpop.f32.mrf.mxu1 }
 0x151   : > { %13901 = vst [vmem:[#allocation94_spill] sm:$0xff] %v10621_v40  ;;  %v10623_v48 = vadd.f32 %v8196_v50, %v1703_v11  ;;  %v10635_v40 = vpop.permute.xlu1 %2701 }
 0x152   : > { %v8171_v49 = vpop.f32.mrf.mxu0  ;;  %v10625_v56 = vpop.f32.mrf.mxu1 }
 0x153   : > { %13902 = vst [vmem:[#allocation95_spill] sm:$0xff] %v10623_v48  ;;  %13903 = vst [vmem:[#allocation96_spill] sm:$0xff] %v10625_v56  ;;  %v1723_v61 = vadd.f32 %v8171_v49, %v1463_v28 }
 0x154   : > { %v10629_v43 = vpop.f32.mrf.mxu0  ;;  %v8205_v44 = vpop.f32.mrf.mxu1 }
 0x155   : > { %13904 = vst [vmem:[#allocation97_spill] sm:$0xff] %v10629_v43  ;;  %v10631_v35 = vadd.f32 %v8199_v30, %v1723_v61  ;;  %v2692_v43 = vpop.permute.xlu0 %2691 }
 0x156   : > { %v8174_v34 = vpop.f32.mrf.mxu0  ;;  %v10633_v31 = vpop.f32.mrf.mxu1 }
 0x157   : > { %13905 = vst [vmem:[#allocation98_spill] sm:$0xff] %v10631_v35  ;;  %13906 = vst [vmem:[#allocation99_spill] sm:$0xff] %v10633_v31  ;;  %v1743_v39 = vadd.f32 %v8174_v34, %v1475_v12  ;;  %v10651_v12 = vpop.permute.xlu1 %2806 }
 0x158   : > { %v10637_v11 = vpop.f32.mrf.mxu0  ;;  %v10639_v50 = vpop.f32.mrf.mxu1 }
 0x159   : > { %13907 = vst [vmem:[#allocation100_spill] sm:$0xff] %v10639_v50  ;;  %v10641_v48 = vadd.f32 %v8202_v41, %v1743_v39  ;;  %v2697_v41 = vpop.permute.xlu0 %2696 }
 0x15a   : > { %v8177_v49 = vpop.f32.mrf.mxu0  ;;  %v10643_v28 = vpop.f32.mrf.mxu1 }
 0x15b   : > { %13908 = vst [vmem:[#allocation101_spill] sm:$0xff] %v10641_v48  ;;  %13909 = vst [vmem:[#allocation102_spill] sm:$0xff] %v10643_v28  ;;  %v1763_v56 = vadd.f32 %v8177_v49, %v1487_v15  ;;  %v10675_v49 = vld [vmem:[%s13473_s3 + $0x18] ss:$0 sm:$0xff] }
 0x15c   : > { %v10645_v30 = vpop.f32.mrf.mxu0  ;;  %v10647_v61 = vpop.f32.mrf.mxu1 }
 0x15d   : > { %13910 = vst [vmem:[#allocation103_spill] sm:$0xff] %v10647_v61  ;;  %v10649_v35 = vadd.f32 %v8205_v44, %v1763_v56  ;;  %v10668_v44 = vld [vmem:[%s13473_s3 + $0x19] ss:$0 sm:$0xff]  ;;  %v10670_v56 = vpop.permute.xlu1 %2706 }
 0x15e   : > { %v10653_v34 = vpop.f32.mrf.mxu0  ;;  %v10655_v31 = vpop.f32.mrf.mxu1  ;;  %v10691_v61 = vmul.f32 %v10668_v44, %v10539_v26 }
 0x15f   : > { %13911 = vst [vmem:[#allocation104_spill] sm:$0xff] %v10649_v35  ;;  %13912 = vst [vmem:[#allocation105_spill] sm:$0xff] %v10655_v31  ;;  %v10683_v31 = vmul.f32 %v10668_v44, %v10498_v51  ;;  %v10705_v51 = vmul.f32 %v10675_v49, %v10515_v29  ;;  %v2712_v26 = vpop.permute.xlu0 %2711 }
 0x160   : > { %v10657_v50 = vpop.f32.mrf.mxu0  ;;  %v10659_v39 = vpop.f32.mrf.mxu1  ;;  %13919 = vst [vmem:[#allocation112_spill] sm:$0xff] %v10691_v61  ;;  %v710_v61 = vadd.f32 %v10172_v27, %v10182_v4  ;;  %v10734_v4 = vmul.f32 %v10675_v49, %v10593_v1 }
 0x161   : > { %13913 = vst [vmem:[#allocation106_spill] sm:$0xff] %v10659_v39  ;;  %13918 = vst [vmem:[#allocation111_spill] sm:$0xff] %v10683_v31  ;;  %v10715_v31 = vmul.f32 %v10668_v44, %v10561_v53  ;;  %v10738_v53 = vmul.f32 %v10668_v44, %v10553_v47  ;;  %v770_v47 = vadd.f32 %v10277_v54, %v10332_v45 }
 0x162   : > { %v10661_v48 = vpop.f32.mrf.mxu0  ;;  %v10663_v15 = vpop.f32.mrf.mxu1 }
 0x163   : > { %13914 = vst [vmem:[#allocation107_spill] sm:$0xff] %v10661_v48  ;;  %13915 = vst [vmem:[#allocation108_spill] sm:$0xff] %v10663_v15  ;;  %v10687_v15 = vmul.f32 %v10668_v44, %v10508_v62  ;;  %v10709_v62 = vmul.f32 %v10668_v44, %v10528_v6  ;;  %v2717_v54 = vpop.permute.xlu0 %2716 }
 0x164   : > { %v10677_v35 = vpop.f32.mrf.mxu0  ;;  %v10679_v39 = vpop.f32.mrf.mxu1  ;;  %13921 = vst [vmem:[#allocation114_spill] sm:$0xff] %v10715_v31  ;;  %13922 = vst [vmem:[#allocation115_spill] sm:$0xff] %v10738_v53  ;;  %v10746_v31 = vmul.f32 %v10675_v49, %v10607_v58 }
 0x165   : > { %13916 = vst [vmem:[#allocation109_spill] sm:$0xff] %v10677_v35  ;;  %13917 = vst [vmem:[#allocation110_spill] sm:$0xff] %v10679_v39  ;;  %v698_v35 = vadd.f32 %v10169_v32, %v10176_v22  ;;  %v10701_v39 = vmul.f32 %v10668_v44, %v10551_v42  ;;  %v10719_v32 = vmul.f32 %v10675_v49, %v10577_v24  ;;  %v10740_v24 = vpop.permute.xlu1 %2810 }
 0x166   : > { %v10693_v28 = vpop.f32.mrf.mxu0  ;;  %v10695_v48 = vpop.f32.mrf.mxu1  ;;  %v10723_v22 = vmul.f32 %v10675_v49, %v10541_v10  ;;  %v722_v42 = vadd.f32 %v10178_v52, %v10196_v23  ;;  %v734_v10 = vadd.f32 %v10187_v19, %v10225_v2  ;;  %v10750_v52 = vmul.f32 %v10668_v44, %v10563_v14 }
 0x167   : > { %13920 = vst [vmem:[#allocation113_spill] sm:$0xff] %v10701_v39  ;;  %v862_v27 = vadd.f32 %v10394_v57, %v698_v35  ;;  %v10754_v23 = vmul.f32 %v10675_v49, %v10619_v60  ;;  %v746_v35 = vadd.f32 %v10208_v16, %v10260_v33  ;;  %v876_v19 = vadd.f32 %v10428_v20, %v710_v61 }
 0x168   : > { %v10725_v29 = vpop.f32.mrf.mxu0  ;;  %v10727_v6 = vpop.f32.mrf.mxu1  ;;  %v10764_v2 = vmul.f32 %v10675_v49, %v2677_v3  ;;  %v10768_v14 = vmul.f32 %v10675_v49, %v10571_v59  ;;  %v758_v60 = vadd.f32 %v10242_v17, %v10296_v25  ;;  %v890_v58 = vadd.f32 %v10463_v36, %v722_v42 }
 0x169   : > { %v10778_v16 = vmul.f32 %v10675_v49, %v2692_v43  ;;  %v782_v20 = vadd.f32 %v10313_v63, %v10365_v18  ;;  %v1041_v59 = vadd.f32 %v10349_v7, %v862_v27  ;;  %v904_v3 = vadd.f32 %v10483_v13, %v734_v10  ;;  %v13931_v10 = vld [vmem:[#allocation92_spill] sm:$0xff] }
 0x16a   : > { %v10756_v1 = vpop.f32.mrf.mxu0  ;;  %v10758_v57 = vpop.f32.mrf.mxu1  ;;  %13923 = vst [vmem:[#allocation116_spill] sm:$0xff] %v10764_v2  ;;  %13924 = vst [vmem:[#allocation117_spill] sm:$0xff] %v10768_v14  ;;  %v10788_v17 = vmul.f32 %v10668_v44, %v10587_v55  ;;  %v918_v25 = vadd.f32 %v10490_v38, %v746_v35  ;;  %v932_v45 = vadd.f32 %v10496_v0, %v758_v60 }
 0x16b   : > { %13925 = vst [vmem:[#allocation118_spill] sm:$0xff] %v10778_v16  ;;  %v10795_v43 = vmul.f32 %v10675_v49, %v2697_v41  ;;  %v10799_v63 = vmul.f32 %v10675_v49, %v10603_v5  ;;  %v1057_v18 = vadd.f32 %v10380_v8, %v876_v19  ;;  %v946_v13 = vadd.f32 %v10503_v21, %v770_v47  ;;  %v2815_v0 = vpop.permute.xlu1 %2814  ;;  %v13930_v41 = vld [vmem:[#allocation56_spill] sm:$0xff]  ;;  %v13938_v47 = vld [vmem:[#allocation50_spill] sm:$0xff] }
 0x16c   : > { %v10775_v39 = vpop.f32.mrf.mxu0  ;;  %v10780_v33 = vpop.f32.mrf.mxu1  ;;  %13926 = vst [vmem:[#allocation119_spill] sm:$0xff] %v10788_v17  ;;  %v1235_v55 = vadd.f32 %v10517_v9, %v1041_v59  ;;  %v10807_v38 = vmul.f32 %v10675_v49, %v2712_v26  ;;  %v1073_v61 = vadd.f32 %v10410_v37, %v890_v58  ;;  %v960_v42 = vadd.f32 %v13930_v41, %v782_v20  ;;  %v13934_v9 = vld [vmem:[#allocation46_spill] sm:$0xff]  ;;  %v13935_v26 = vld [vmem:[#allocation60_spill] sm:$0xff]  ;;  %v13940_v41 = vld [vmem:[#allocation63_spill] sm:$0xff] }
 0x16d   : > { %13927 = vst [vmem:[#allocation120_spill] sm:$0xff] %v10795_v43  ;;  %13928 = vst [vmem:[#allocation121_spill] sm:$0xff] %v10799_v63  ;;  %v10817_v35 = vmul.f32 %v10668_v44, %v13931_v10  ;;  %v10820_v8 = vmul.f32 %v10675_v49, %v2717_v54  ;;  %v1089_v21 = vadd.f32 %v13934_v9, %v904_v3  ;;  %v13939_v20 = vld [vmem:[#allocation52_spill] sm:$0xff]  ;;  %v13943_v9 = vld [vmem:[#allocation55_spill] sm:$0xff] }
 0x16e   : > { %v10792_v36 = vpop.f32.mrf.mxu0  ;;  %v10801_v7 = vpop.f32.mrf.mxu1  ;;  %13929 = vst [vmem:[#allocation122_spill] sm:$0xff] %v10807_v38  ;;  %v1247_v19 = vadd.f32 %v13935_v26, %v1057_v18  ;;  %v10826_v37 = vmul.f32 %v10668_v44, %v10627_v46  ;;  %v10830_v60 = vmul.f32 %v10675_v49, %v10635_v40  ;;  %v1105_v58 = vadd.f32 %v13938_v47, %v918_v25  ;;  %v13942_v46 = vld [vmem:[#allocation53_spill] sm:$0xff]  ;;  %v13944_v40 = vld [vmem:[#allocation58_spill] sm:$0xff]  ;;  %v13967_v16 = vld [vmem:[#allocation68_spill] sm:$0xff] }
 0x16f   : > { %13932 = vst [vmem:[#allocation56_spill] sm:$0xff] %v10817_v35  ;;  %13933 = vst [vmem:[#allocation92_spill] sm:$0xff] %v10820_v8  ;;  %v1121_v59 = vadd.f32 %v13939_v20, %v932_v45  ;;  %v1259_v10 = vadd.f32 %v13940_v41, %v1073_v61  ;;  %v10841_v3 = vmul.f32 %v10668_v44, %v10651_v12  ;;  %v13945_v38 = vld [vmem:[#allocation78_spill] sm:$0xff]  ;;  %v2722_v45 = vpop.permute.xlu1 %2721  ;;  %v2819_v61 = vpop.permute.xlu0 %2818  ;;  %v13949_v35 = vld [vmem:[#allocation69_spill] sm:$0xff] }
 0x170   : > { %v10811_v27 = vpop.f32.mrf.mxu0  ;;  %v10813_v5 = vpop.f32.mrf.mxu1  ;;  %13936 = vst [vmem:[#allocation46_spill] sm:$0xff] %v10826_v37  ;;  %13937 = vst [vmem:[#allocation60_spill] sm:$0xff] %v10830_v60  ;;  %v1137_v18 = vadd.f32 %v13942_v46, %v946_v13  ;;  %v1397_v26 = vadd.f32 %v13943_v9, %v1235_v55  ;;  %v1623_v43 = vadd.f32 %v13945_v38, %v13944_v40  ;;  %v13947_v47 = vld [vmem:[#allocation54_spill] sm:$0xff]  ;;  %v13951_v46 = vld [vmem:[#allocation57_spill] sm:$0xff] }
 0x171   : > { %13941 = vst [vmem:[#allocation50_spill] sm:$0xff] %v10841_v3  ;;  %v10849_v25 = vmul.f32 %v10675_v49, %v10670_v56  ;;  %v1153_v20 = vadd.f32 %v13947_v47, %v960_v42  ;;  %v13948_v41 = vld [vmem:[#allocation66_spill] sm:$0xff]  ;;  %v1283_v12 = vadd.f32 %v13949_v35, %v1105_v58  ;;  %v13950_v3 = vld [vmem:[#allocation71_spill] sm:$0xff]  ;;  %v1409_v38 = vadd.f32 %v13951_v46, %v1247_v19  ;;  %v13952_v9 = vld [vmem:[#allocation73_spill] sm:$0xff] }
 0x172   : > { %v10835_v54 = vpop.f32.mrf.mxu0  ;;  %v10837_v8 = vpop.f32.mrf.mxu1  ;;  %v1271_v60 = vadd.f32 %v13948_v41, %v1089_v21  ;;  %v1295_v63 = vadd.f32 %v13950_v3, %v1121_v59  ;;  %v1307_v40 = vadd.f32 %v13952_v9, %v1137_v18  ;;  %v13953_v56 = vld [vmem:[#allocation80_spill] sm:$0xff]  ;;  %v10864_v37 = vmul.f32 %v10668_v44, %v10740_v24  ;;  %v13955_v42 = vld [vmem:[#allocation59_spill] sm:$0xff]  ;;  %v13960_v18 = vld [vmem:[#allocation74_spill] sm:$0xff] }
 0x173   : > { %13946 = vst [vmem:[#allocation52_spill] sm:$0xff] %v10849_v25  ;;  %v1613_v25 = vadd.f32 %v13953_v56, %v1397_v26  ;;  %v1421_v21 = vadd.f32 %v13955_v42, %v1259_v10  ;;  %v13956_v47 = vld [vmem:[#allocation76_spill] sm:$0xff]  ;;  %v10873_v3 = vmul.f32 %v10668_v44, %v2815_v0  ;;  %v10876_v19 = vmul.f32 %v10675_v49, %v2722_v45  ;;  %v13961_v41 = vld [vmem:[#allocation61_spill] sm:$0xff]  ;;  %v13962_v46 = vld [vmem:[#allocation82_spill] sm:$0xff] }
 0x174   : > { %v10855_v13 = vpop.f32.mrf.mxu0  ;;  %v10857_v55 = vpop.f32.mrf.mxu1  ;;  %13954 = vst [vmem:[#allocation63_spill] sm:$0xff] %v10864_v37  ;;  %v1319_v35 = vadd.f32 %v13956_v47, %v1153_v20  ;;  %v1850_v26 = vadd.f32 %v13960_v18, %v1623_v43  ;;  %v1643_v24 = vadd.f32 %v13962_v46, %v13961_v41  ;;  %v13963_v9 = vld [vmem:[#allocation84_spill] sm:$0xff]  ;;  %v10883_v10 = vmul.f32 %v10668_v44, %v2819_v61  ;;  %v13965_v20 = vld [vmem:[#allocation62_spill] sm:$0xff]  ;;  %v13966_v47 = vld [vmem:[#allocation65_spill] sm:$0xff] }
 0x175   : > { %13958 = vst [vmem:[#allocation55_spill] sm:$0xff] %v10873_v3  ;;  %13959 = vst [vmem:[#allocation58_spill] sm:$0xff] %v10876_v19  ;;  %v1633_v56 = vadd.f32 %v13963_v9, %v1409_v38  ;;  %v1433_v42 = vadd.f32 %v13965_v20, %v1271_v60  ;;  %v1445_v37 = vadd.f32 %v13966_v47, %v1283_v12  ;;  %v13968_v3 = vld [vmem:[#allocation64_spill] sm:$0xff]  ;;  %v13969_v17 = vld [vmem:[#allocation86_spill] sm:$0xff] }
 0x176   : > { %v10868_v58 = vpop.f32.mrf.mxu0  ;;  %v10870_v59 = vpop.f32.mrf.mxu1  ;;  %13964 = vst [vmem:[#allocation78_spill] sm:$0xff] %v10883_v10  ;;  %v1457_v0 = vadd.f32 %v13967_v16, %v1295_v63  ;;  %v1663_v49 = vadd.f32 %v13969_v17, %v13968_v3  ;;  %v13970_v18 = vld [vmem:[#allocation70_spill] sm:$0xff]  ;;  %v13971_v41 = vld [vmem:[#allocation75_spill] sm:$0xff]  ;;  %v13972_v38 = vld [vmem:[#allocation88_spill] sm:$0xff]  ;;  %v2017_v61 = vadd.f32 %v10653_v34, %v1850_v26 }
 0x177   : > { %13957 = vst [vmem:[#allocation53_spill] sm:$0xff] %v10870_v59  ;;  %v1469_v19 = vadd.f32 %v13970_v18, %v1307_v40  ;;  %v1844_v46 = vadd.f32 %v13971_v41, %v1613_v25  ;;  %v1653_v9 = vadd.f32 %v13972_v38, %v1421_v21  ;;  %v2823_v10 = vpop.permute.xlu1 %2822  ;;  %v13973_v60 = vld [vmem:[#allocation72_spill] sm:$0xff]  ;;  %v13974_v12 = vld [vmem:[#allocation67_spill] sm:$0xff]  ;;  %v13975_v47 = vld [vmem:[#allocation89_spill] sm:$0xff] }
 0x178   : > { %v10890_v45 = vpop.f32.mrf.mxu0  ;;  %v8296_v43 = vpop.f32.mrf.mxu1  ;;  %v1481_v20 = vadd.f32 %v13973_v60, %v1319_v35  ;;  %v1683_v16 = vadd.f32 %v13975_v47, %v13974_v12  ;;  %v13976_v63 = vld [vmem:[#allocation91_spill] sm:$0xff]  ;;  %v13977_v17 = vld [vmem:[#allocation94_spill] sm:$0xff]  ;;  %v13978_v40 = vld [vmem:[#allocation77_spill] sm:$0xff]  ;;  %v10913_v47 = vmul.f32 %v10668_v44, %v2823_v10 }
 0x179   : > { %v1673_v2 = vadd.f32 %v13976_v63, %v1433_v42  ;;  %v1693_v3 = vadd.f32 %v13977_v17, %v1445_v37  ;;  %v1862_v18 = vadd.f32 %v13978_v40, %v1643_v24  ;;  %v13979_v25 = vld [vmem:[#allocation79_spill] sm:$0xff]  ;;  %v13980_v21 = vld [vmem:[#allocation97_spill] sm:$0xff]  ;;  %v2010_v34 = vadd.f32 %v10657_v50, %v1844_v46  ;;  %v13984_v17 = vld [vmem:[#allocation100_spill] sm:$0xff] }
 0x17a   : > { %v10901_v14 = vpop.f32.mrf.mxu0  ;;  %v2549_v53 = vpop.f32.mrf.mxu1  ;;  %v1856_v41 = vadd.f32 %v13979_v25, %v1633_v56  ;;  %v1713_v38 = vadd.f32 %v13980_v21, %v1457_v0  ;;  %v13981_v26 = vld [vmem:[#allocation81_spill] sm:$0xff]  ;;  %v1733_v60 = vadd.f32 %v10637_v11, %v1469_v19  ;;  %v1753_v12 = vadd.f32 %v10645_v30, %v1481_v20  ;;  %13982 = vst [vmem:[#allocation54_spill] sm:$0xff] %v10913_v47  ;;  %v13983_v63 = vld [vmem:[#allocation83_spill] sm:$0xff]  ;;  %v13989_v19 = vld [vmem:[#allocation90_spill] sm:$0xff] }
 0x17b   : > { %v1874_v35 = vadd.f32 %v13981_v26, %v1663_v49  ;;  %v1868_v24 = vadd.f32 %v13983_v63, %v1653_v9  ;;  %v2198_v56 = vadd.f32 %v13984_v17, %v2017_v61  ;;  %v13985_v40 = vld [vmem:[#allocation107_spill] sm:$0xff]  ;;  %v13986_v25 = vld [vmem:[#allocation109_spill] sm:$0xff]  ;;  %v1892_v30 = vadd.f32 %v13989_v19, %v1693_v3  ;;  %v13991_v47 = vld [vmem:[#allocation102_spill] sm:$0xff] }
 0x17c   : > { %v10910_v42 = vpop.f32.mrf.mxu0  ;;  %v8299_v37 = vpop.f32.mrf.mxu1  ;;  %v2031_v0 = vadd.f32 %v13985_v40, %v1862_v18  ;;  %v2024_v50 = vadd.f32 %v13986_v25, %v1856_v41  ;;  %v13987_v46 = vld [vmem:[#allocation85_spill] sm:$0xff]  ;;  %v13988_v21 = vld [vmem:[#allocation87_spill] sm:$0xff]  ;;  %v2190_v9 = vadd.f32 %v13991_v47, %v2010_v34  ;;  %v13992_v18 = vld [vmem:[#allocation96_spill] sm:$0xff] }
 0x17d   : > { %v1886_v49 = vadd.f32 %v13987_v46, %v1683_v16  ;;  %v1880_v11 = vadd.f32 %v13988_v21, %v1673_v2  ;;  %v2045_v20 = vadd.f32 %v10693_v28, %v1874_v35  ;;  %v13990_v44 = vld [vmem:[#allocation93_spill] sm:$0xff]  ;;  %v2038_v61 = vadd.f32 %v10725_v29, %v1868_v24  ;;  %v13993_v41 = vld [vmem:[#allocation99_spill] sm:$0xff]  ;;  %v13996_v34 = vld [vmem:[#allocation106_spill] sm:$0xff] }
 0x17e   : > { %v8268_v26 = vpop.f32.mrf.mxu0  ;;  %v2561_v59 = vpop.f32.mrf.mxu1  ;;  %v1904_v10 = vadd.f32 %v13990_v44, %v1713_v38  ;;  %v1916_v17 = vadd.f32 %v13992_v18, %v1733_v60  ;;  %v1928_v40 = vadd.f32 %v13993_v41, %v1753_v12  ;;  %v13994_v28 = vld [vmem:[#allocation103_spill] sm:$0xff]  ;;  %v13995_v46 = vld [vmem:[#allocation105_spill] sm:$0xff]  ;;  %v2066_v60 = vadd.f32 %v10811_v27, %v1892_v30  ;;  %v13998_v12 = vld [vmem:[#allocation98_spill] sm:$0xff] }
 0x17f   : > { %v2393_v63 = vadd.f32 %v8268_v26, %v2198_v56  ;;  %v2059_v16 = vadd.f32 %v10756_v1, %v1886_v49  ;;  %v2052_v2 = vadd.f32 %v10775_v39, %v1880_v11  ;;  %v2214_v35 = vadd.f32 %v13994_v28, %v2031_v0  ;;  %v13997_v29 = vld [vmem:[#allocation95_spill] sm:$0xff]  ;;  %v13999_v49 = vld [vmem:[#allocation108_spill] sm:$0xff] }
 0x180   : > { %v2386_v3 = vpop.f32.mrf.mxu0  ;;  %v8302_v25 = vpop.f32.mrf.mxu1  ;;  %v2206_v21 = vadd.f32 %v13995_v46, %v2024_v50  ;;  %v2230_v47 = vadd.f32 %v13996_v34, %v2045_v20  ;;  %v2073_v24 = vadd.f32 %v10792_v36, %v13997_v29  ;;  %v2087_v1 = vadd.f32 %v10835_v54, %v13998_v12  ;;  %v14001_v36 = vld [vmem:[#allocation101_spill] sm:$0xff]  ;;  %v10948_v54 = vld [vmem:[%s13475_s5] ss:$0 sm:$0xff] }
 0x181   : > { %v2556_v38 = vadd.f32 %v8296_v43, %v2393_v63  ;;  %v2387_v19 = vadd.f32 %v2386_v3, %v2190_v9  ;;  %v2222_v11 = vadd.f32 %v13999_v49, %v2038_v61  ;;  %v14000_v43 = vld [vmem:[#allocation110_spill] sm:$0xff]  ;;  %v2238_v20 = vadd.f32 %v10695_v48, %v2052_v2  ;;  %v14002_v3 = vld [vmem:[#allocation111_spill] sm:$0xff] }
 0x182   : > { %v8271_v56 = vpop.f32.mrf.mxu0  ;;  %v2573_v39 = vpop.f32.mrf.mxu1  ;;  %v2246_v44 = vadd.f32 %v14000_v43, %v2059_v16  ;;  %v2080_v9 = vadd.f32 %v10855_v13, %v1904_v10  ;;  %v2101_v27 = vadd.f32 %v10868_v58, %v14001_v36  ;;  %v2262_v48 = vadd.f32 %v10727_v6, %v2073_v24  ;;  %v14005_v43 = vld [vmem:[#allocation53_spill] sm:$0xff] }
 0x183   : > { %v2745_v0 = vadd.f32 %v10734_v4, %v2556_v38  ;;  %v2550_v26 = vadd.f32 %v2549_v53, %v2387_v19  ;;  %v2405_v50 = vadd.f32 %v8271_v56, %v2214_v35  ;;  %v2254_v13 = vadd.f32 %v10758_v57, %v2066_v60  ;;  %v14003_v57 = vld [vmem:[#allocation104_spill] sm:$0xff] }
 0x184   : > { %v2398_v30 = vpop.f32.mrf.mxu0  ;;  %v8305_v61 = vpop.f32.mrf.mxu1  ;;  %v10955_v10 = vadd.f32 %v10780_v33, %v2087_v1  ;;  %v2094_v58 = vadd.f32 %v10890_v45, %v1916_v17  ;;  %v10965_v6 = vadd.f32 %v10813_v5, %v2101_v27  ;;  %v2115_v33 = vadd.f32 %v10901_v14, %v14003_v57  ;;  %v14004_v60 = vld [vmem:[#allocation112_spill] sm:$0xff] }
 0x185   : > { %v2846_v4 = vadd.f32 %v10687_v15, %v2745_v0  ;;  %v2744_v53 = vadd.f32 %v10719_v32, %v2550_v26  ;;  %v2568_v63 = vadd.f32 %v8299_v37, %v2405_v50  ;;  %v2399_v18 = vadd.f32 %v2398_v30, %v2206_v21 }
 0x186   : > { %v8274_v41 = vpop.f32.mrf.mxu0  ;;  %v2585_v16 = vpop.f32.mrf.mxu1  ;;  %v10962_v37 = vadd.f32 %v10801_v7, %v2080_v9  ;;  %v2108_v7 = vadd.f32 %v10910_v42, %v1928_v40 }
 0x187   : > { %v2869_v2 = vadd.f32 %v10948_v54, %v2846_v4  ;;  %v2845_v28 = vadd.f32 %v14002_v3, %v2744_v53  ;;  %v2747_v15 = vadd.f32 %v10705_v51, %v2568_v63  ;;  %v2562_v32 = vadd.f32 %v2561_v59, %v2399_v18  ;;  %v14008_v63 = vld [vmem:[#allocation116_spill] sm:$0xff] }
 0x188   : > { %v2417_v35 = vadd.f32 %v8274_v41, %v2230_v47  ;;  %v2410_v45 = vpop.f32.mrf.mxu0  ;;  %v8308_v17 = vpop.f32.mrf.mxu1  ;;  %v10973_v59 = vadd.f32 %v10837_v8, %v2094_v58 }
 0x189   : > { %v2885_v46 = vmax.f32 %v2869_v2, 0.0  ;;  %v2868_v21 = vadd.f32 %v10948_v54, %v2845_v28  ;;  %v2848_v38 = vadd.f32 %v10709_v62, %v2747_v15  ;;  %v2746_v51 = vadd.f32 %v10746_v31, %v2562_v32  ;;  %v14009_v2 = vld [vmem:[#allocation119_spill] sm:$0xff]  ;;  %v14010_v28 = vld [vmem:[#allocation2_spill] sm:$0xff] }
 0x18a   : > { %v2580_v5 = vadd.f32 %v8302_v25, %v2417_v35  ;;  %v2411_v19 = vadd.f32 %v2410_v45, %v2222_v11  ;;  %v8277_v34 = vpop.f32.mrf.mxu0  ;;  %v2597_v29 = vpop.f32.mrf.mxu1  ;;  %v10983_v62 = vadd.f32 %v10857_v55, %v2115_v33  ;;  %v14011_v33 = vld [vmem:[#allocation113_spill] sm:$0xff]  ;;  %v14012_v45 = vld [vmem:[#allocation118_spill] sm:$0xff] }
 0x18b   : > { %v10976_v14 = vand.u32 4294901760, %v2885_v46  ;;  %v2884_v47 = vmax.f32 %v2868_v21, 0.0  ;;  %v10979_v24 = vadd.f32 %v10948_v54, %v2848_v38  ;;  %v2847_v12 = vadd.f32 %v14004_v60, %v2746_v51  ;;  %v14013_v38 = vld [vmem:[#allocation4_spill] sm:$0xff]  ;;  %v14015_v60 = vld [vmem:[#allocation121_spill] sm:$0xff] }
 0x18c   : > { %v2749_v31 = vadd.f32 %v10754_v23, %v2580_v5  ;;  %v2574_v8 = vadd.f32 %v2573_v39, %v2411_v19  ;;  %v2429_v1 = vadd.f32 %v8277_v34, %v2246_v44  ;;  %v2422_v42 = vpop.f32.mrf.mxu0  ;;  %v8311_v40 = vpop.f32.mrf.mxu1  ;;  %v10998_v44 = vadd.f32 %v14005_v43, %v2108_v7  ;;  %v14017_v43 = vld [vmem:[#allocation56_spill] sm:$0xff] }
 0x18d   : > { %v10987_v25 = vsub.f32 %v2885_v46, %v10976_v14  ;;  %v2887_v56 = vmax.f32 %v10979_v24, 0.0  ;;  %v10991_v49 = vadd.f32 %v10948_v54, %v2847_v12  ;;  %v2423_v11 = vadd.f32 %v2422_v42, %v2238_v20  ;;  %v14016_v42 = vld [vmem:[#allocation7_spill] sm:$0xff]  ;;  %v14035_v24 = vld [vmem:[#allocation13_spill] sm:$0xff] }
 0x18e   : > { %v2850_v0 = vadd.f32 %v10750_v52, %v2749_v31  ;;  %v2748_v55 = vadd.f32 %v10723_v22, %v2574_v8  ;;  %v2592_v26 = vadd.f32 %v8305_v61, %v2429_v1  ;;  %v8280_v50 = vpop.f32.mrf.mxu0  ;;  %v10995_v23 = vand.u32 4294901760, %v2884_v47  ;;  %v2609_v39 = vpop.f32.mrf.mxu1  ;;  %v14006_v52 = vld [vmem:[#allocation115_spill] sm:$0xff]  ;;  %v14007_v22 = vld [vmem:[#allocation117_spill] sm:$0xff] }
 0x18f   : > { %v2886_v9 = vmax.f32 %v10991_v49, 0.0  ;;  %v2586_v36 = vadd.f32 %v2585_v16, %v2423_v11  ;;  %v2441_v27 = vadd.f32 %v8280_v50, %v2262_v48  ;;  %v3017_v30 = vand.u32 4294901760, %v10987_v25  ;;  %v14025_v49 = vld [vmem:[#allocation3_spill] sm:$0xff] }
 0x190   : > { %v11003_v20 = vadd.f32 %v10948_v54, %v2850_v0  ;;  %v2849_v4 = vadd.f32 %v14006_v52, %v2748_v55  ;;  %v2751_v61 = vadd.f32 %v14007_v22, %v2592_v26  ;;  %8406 = vmatprep.mubr.f32.mxu1 %v10995_v23  ;;  %v2434_v53 = vpop.f32.mrf.mxu0  ;;  %v11021_v32 = vand.u32 4294901760, %v2887_v56  ;;  %v8314_v57 = vpop.f32.mrf.mxu1 }
 0x191   : > { %v2750_v18 = vadd.f32 %v14008_v63, %v2586_v36  ;;  %v2604_v58 = vadd.f32 %v8308_v17, %v2441_v27  ;;  %v2435_v41 = vadd.f32 %v2434_v53, %v2254_v13  ;;  %8407 = vmatmul.mubr.f32.vlgmr.msra.gmra.mxu1 %v10976_v14  ;;  %v11012_v48 = vand.u32 4294901760, %v2886_v9  ;;  %v14018_v27 = vld [vmem:[#allocation60_spill] sm:$0xff] }
 0x192   : > { %v11015_v16 = vadd.f32 %v10948_v54, %v2849_v4  ;;  %v2852_v3 = vadd.f32 %v14009_v2, %v2751_v61  ;;  %8487 = vmatpush3.msra.mxu1 %v14010_v28  ;;  %v8283_v15 = vpop.f32.mrf.mxu0  ;;  %v11024_v13 = vsub.f32 %v2884_v47, %v10995_v23  ;;  %v3018_v34 = vsub.f32 %v10987_v25, %v3017_v30  ;;  %v2621_v26 = vpop.f32.mrf.mxu1  ;;  %v14019_v61 = vld [vmem:[#allocation10_spill] sm:$0xff] }
 0x193   : > { %v2851_v35 = vadd.f32 %v14011_v33, %v2750_v18  ;;  %v2753_v17 = vadd.f32 %v14012_v45, %v2604_v58  ;;  %v2598_v46 = vadd.f32 %v2597_v29, %v2435_v41  ;;  %v2453_v21 = vadd.f32 %v8283_v15, %v10955_v10  ;;  %8488 = vmatprep.subr.mxu1 %v14013_v38  ;;  %v14014_v29 = vld [vmem:[#allocation46_spill] sm:$0xff]  ;;  %v14021_v15 = vld [vmem:[#allocation120_spill] sm:$0xff] }
 0x194   : > { %v2888_v51 = vmax.f32 %v11015_v16, 0.0  ;;  %v11032_v7 = vadd.f32 %v10948_v54, %v2852_v3  ;;  %8409 = vmatprep.mubr.f32.mxu1 %v11012_v48  ;;  %8489 = vmatpush3.msra.mxu1 %v14013_v38  ;;  %v2446_v5 = vpop.f32.mrf.mxu0  ;;  %v3007_v19 = vand.u32 4294901760, %v11024_v13  ;;  %v2889_v8 = vmax.f32 %v11003_v20, 0.0  ;;  %v14020_v58 = vld [vmem:[#allocation50_spill] sm:$0xff] }
 0x195   : > { %v11041_v10 = vadd.f32 %v10948_v54, %v2851_v35  ;;  %v2854_v47 = vadd.f32 %v14014_v29, %v2753_v17  ;;  %v2752_v12 = vadd.f32 %v14015_v60, %v2598_v46  ;;  %v2616_v31 = vadd.f32 %v8311_v40, %v2453_v21  ;;  %8410 = vmatmul.mubr.f32.gmra.mxu1 %v11021_v32  ;;  %v14022_v35 = vld [vmem:[#allocation12_spill] sm:$0xff]  ;;  %v8317_v17 = vpop.f32.mrf.mxu1 }
 0x196   : > { %v2447_v1 = vadd.f32 %v2446_v5, %v10962_v37  ;;  %8490 = vmatprep.subr.mxu1 %v14016_v42  ;;  %v8286_v11 = vpop.f32.mrf.mxu0  ;;  %v3008_v0 = vsub.f32 %v11024_v13, %v3007_v19  ;;  %v11054_v55 = vand.u32 4294901760, %v2888_v51  ;;  %v2891_v40 = vmax.f32 %v11032_v7, 0.0 }
 0x197   : > { %v2890_v50 = vmax.f32 %v11041_v10, 0.0  ;;  %v2853_v36 = vadd.f32 %v14017_v43, %v2752_v12  ;;  %v2755_v37 = vadd.f32 %v14018_v27, %v2616_v31  ;;  %8491 = vmatpush3.msra.mxu1 %v14016_v42  ;;  %v11062_v52 = vadd.f32 %v10948_v54, %v2854_v47  ;;  %v14024_v47 = vld [vmem:[#allocation122_spill] sm:$0xff]  ;;  %v14029_v27 = vld [vmem:[#allocation55_spill] sm:$0xff] }
 0x198   : > { %v2610_v4 = vadd.f32 %v2609_v39, %v2447_v1  ;;  %v2465_v22 = vadd.f32 %v8286_v11, %v10965_v6  ;;  %8492 = vmatprep.subr.mxu1 %v14019_v61  ;;  %v3009_v53 = vand.u32 4294901760, %v3008_v0  ;;  %8412 = vmatprep.mubr.f32.mxu1 %v11054_v55  ;;  %v2458_v63 = vpop.f32.mrf.mxu0  ;;  %v3019_v3 = vand.u32 4294901760, %v3018_v34  ;;  %v14023_v34 = vld [vmem:[#allocation114_spill] sm:$0xff]  ;;  %v14026_v1 = vld [vmem:[#allocation52_spill] sm:$0xff] }
 0x199   : > { %v11068_v18 = vadd.f32 %v10948_v54, %v2853_v36  ;;  %v2856_v41 = vadd.f32 %v14020_v58, %v2755_v37  ;;  %8493 = vmatpush3.msra.mxu1 %v14019_v61  ;;  %v2459_v2 = vadd.f32 %v2458_v63, %v10973_v59  ;;  %v11076_v6 = vand.u32 4294901760, %v2889_v8  ;;  %v14027_v0 = vld [vmem:[#allocation6_spill] sm:$0xff]  ;;  %v14030_v63 = vld [vmem:[#allocation63_spill] sm:$0xff] }
 0x19a   : > { %v2754_v39 = vadd.f32 %v14021_v15, %v2610_v4  ;;  %v2628_v33 = vadd.f32 %v8314_v57, %v2465_v22  ;;  %8350 = vmatprep.mubr.f32.mxu0 %v3009_v53  ;;  %8494 = vmatprep.subr.mxu1 %v14022_v35  ;;  %v8289_v45 = vpop.f32.mrf.mxu0  ;;  %v11082_v46 = vsub.f32 %v2886_v9, %v11012_v48  ;;  %v11097_v12 = vand.u32 4294901760, %v2890_v50  ;;  %v2633_v22 = vpop.f32.mrf.mxu1  ;;  %v14031_v58 = vld [vmem:[#allocation58_spill] sm:$0xff] }
 0x19b   : > { %v2892_v59 = vmax.f32 %v11068_v18, 0.0  ;;  %v11086_v21 = vadd.f32 %v10948_v54, %v2856_v41  ;;  %v2622_v57 = vadd.f32 %v2621_v26, %v2459_v2  ;;  %8351 = vmatmul.mubr.f32.vlgmr.msra.gmra.mxu0 %v3019_v3  ;;  %8495 = vmatpush3.msra.mxu1 %v14022_v35  ;;  %v2477_v5 = vadd.f32 %v8289_v45, %v10983_v62  ;;  %v14028_v26 = vld [vmem:[#allocation16_spill] sm:$0xff]  ;;  %v14032_v2 = vld [vmem:[#allocation9_spill] sm:$0xff] }
 0x19c   : > { %v2855_v29 = vadd.f32 %v14023_v34, %v2754_v39  ;;  %v2757_v60 = vadd.f32 %v14024_v47, %v2628_v33  ;;  %8413 = vmatmul.mubr.f32.gmra.mxu1 %v11076_v6  ;;  %8431 = vmatpush3.msra.mxu0 %v14025_v49  ;;  %v3027_v9 = vand.u32 4294901760, %v11082_v46  ;;  %v2470_v31 = vpop.f32.mrf.mxu0  ;;  %v11114_v53 = vand.u32 4294901760, %v2891_v40  ;;  %v14034_v34 = vld [vmem:[#allocation17_spill] sm:$0xff] }
 0x19d   : > { %v2756_v11 = vadd.f32 %v14026_v1, %v2622_v57  ;;  %8432 = vmatprep.subr.mxu0 %v14027_v0  ;;  %v2640_v62 = vadd.f32 %v8317_v17, %v2477_v5  ;;  %8496 = vmatprep.subr.mxu1 %v14028_v26  ;;  %v2471_v43 = vadd.f32 %v2470_v31, %v10998_v44  ;;  %v2893_v15 = vmax.f32 %v11062_v52, 0.0  ;;  %v14033_v52 = vld [vmem:[#allocation92_spill] sm:$0xff]  ;;  %v14036_v31 = vld [vmem:[#allocation54_spill] sm:$0xff] }
 0x19e   : > { %v11104_v36 = vadd.f32 %v10948_v54, %v2855_v29  ;;  %v2858_v37 = vadd.f32 %v14029_v27, %v2757_v60  ;;  %8433 = vmatpush3.msra.mxu0 %v14027_v0  ;;  %v3028_v4 = vsub.f32 %v11082_v46, %v3027_v9  ;;  %8415 = vmatprep.mubr.f32.mxu1 %v11097_v12  ;;  %v11130_v45 = vand.u32 4294901760, %v2892_v59  ;;  %v14038_v0 = vld [vmem:[#allocation78_spill] sm:$0xff] }
 0x19f   : > { %v2857_v44 = vadd.f32 %v14030_v63, %v2756_v11  ;;  %v2759_v41 = vadd.f32 %v14031_v58, %v2640_v62  ;;  %8434 = vmatprep.subr.mxu0 %v14032_v2  ;;  %8497 = vmatpush3.msra.mxu1 %v14028_v26  ;;  %v2634_v3 = vadd.f32 %v2633_v22, %v2471_v43  ;;  %v2895_v49 = vmax.f32 %v11086_v21, 0.0  ;;  %v14037_v11 = vld [vmem:[#allocation21_spill] sm:$0xff]  ;;  %v14041_v58 = vld [vmem:[#allocation19_spill] sm:$0xff] }
 0x1a0   : > { %v3029_v39 = vand.u32 4294901760, %v3028_v4  ;;  %v11124_v33 = vsub.f32 %v2887_v56, %v11021_v32  ;;  %8416 = vmatmul.mubr.f32.gmra.mxu1 %v11114_v53  ;;  %8435 = vmatpush3.msra.mxu0 %v14032_v2  ;;  %v2894_v17 = vmax.f32 %v11104_v36, 0.0  ;;  %v11140_v56 = vadd.f32 %v10948_v54, %v2858_v37  ;;  %v14040_v63 = vld [vmem:[#allocation25_spill] sm:$0xff] }
 0x1a1   : > { %v11134_v57 = vadd.f32 %v10948_v54, %v2857_v44  ;;  %v2758_v5 = vadd.f32 %v14033_v52, %v2634_v3  ;;  %8498 = vmatprep.subr.mxu1 %v14034_v34  ;;  %8436 = vmatprep.subr.mxu0 %v14035_v24  ;;  %v11147_v47 = vsub.f32 %v2888_v51, %v11054_v55  ;;  %v11171_v43 = vand.u32 4294901760, %v2893_v15 }
 0x1a2   : > { %8353 = vmatprep.mubr.f32.mxu0 %v3029_v39  ;;  %v3037_v29 = vand.u32 4294901760, %v11124_v33  ;;  %8499 = vmatpush3.msra.mxu1 %v14034_v34  ;;  %v11152_v60 = vsub.f32 %v2889_v8, %v11076_v6  ;;  %v2860_v1 = vadd.f32 %v14036_v31, %v2759_v41  ;;  %v11162_v16 = vsub.f32 %v2890_v50, %v11097_v12  ;;  %v14039_v8 = vld [vmem:[#allocation15_spill] sm:$0xff]  ;;  %v14042_v39 = vld [vmem:[#allocation28_spill] sm:$0xff] }
 0x1a3   : > { %8437 = vmatpush3.msra.mxu0 %v14035_v24  ;;  %8500 = vmatprep.subr.mxu1 %v14037_v11  ;;  %v2859_v62 = vadd.f32 %v14038_v0, %v2758_v5  ;;  %v3047_v51 = vand.u32 4294901760, %v11147_v47  ;;  %v2896_v36 = vmax.f32 %v11134_v57, 0.0  ;;  %v11177_v50 = vand.u32 4294901760, %v2894_v17  ;;  %v14043_v0 = vld [vmem:[#allocation20_spill] sm:$0xff] }
 0x1a4   : > { %v3038_v20 = vsub.f32 %v11124_v33, %v3037_v29  ;;  %8418 = vmatprep.mubr.f32.mxu1 %v11130_v45  ;;  %8438 = vmatprep.subr.mxu0 %v14039_v8  ;;  %v3057_v21 = vand.u32 4294901760, %v11152_v60  ;;  %v3067_v10 = vand.u32 4294901760, %v11162_v16  ;;  %v11182_v27 = vsub.f32 %v2891_v40, %v11114_v53 }
 0x1a5   : > { %8501 = vmatpush3.msra.mxu1 %v14037_v11  ;;  %8439 = vmatpush3.msra.mxu0 %v14039_v8  ;;  %v3048_v4 = vsub.f32 %v11147_v47, %v3047_v51  ;;  %v2882_v44 = vadd.f32 %v10948_v54, %v2859_v62  ;;  %v11199_v41 = vand.u32 4294901760, %v2895_v49  ;;  %v2897_v2 = vmax.f32 %v11140_v56, 0.0 }
 0x1a6   : > { %v3039_v37 = vand.u32 4294901760, %v3038_v20  ;;  %v3058_v22 = vsub.f32 %v11152_v60, %v3057_v21  ;;  %8419 = vmatmul.mubr.f32.gmra.mxu1 %v11171_v43  ;;  %8502 = vmatprep.subr.mxu1 %v14040_v63  ;;  %v3068_v7 = vsub.f32 %v11162_v16, %v3067_v10  ;;  %v13580_v40 = vand.u32 4294901760, %v11182_v27 }
 0x1a7   : > { %8440 = vmatprep.subr.mxu0 %v14041_v58  ;;  %8503 = vmatpush3.msra.mxu1 %v14040_v63  ;;  %v3049_v3 = vand.u32 4294901760, %v3048_v4  ;;  %v11206_v57 = vsub.f32 %v2892_v59, %v11130_v45  ;;  %v2883_v52 = vadd.f32 %v10948_v54, %v2860_v1  ;;  %v11214_v56 = vand.u32 4294901760, %v2896_v36 }
 0x1a8   : > { %8354 = vmatmul.mubr.f32.gmra.mxu0 %v3039_v37  ;;  %8504 = vmatprep.subr.mxu1 %v14042_v39  ;;  %v3069_v5 = vand.u32 4294901760, %v3068_v7  ;;  %v3078_v24 = vsub.f32 %v11182_v27, %v13580_v40  ;;  %v3059_v31 = vand.u32 4294901760, %v3058_v22  ;;  %v11219_v59 = vsub.f32 %v2893_v15, %v11171_v43  ;;  %v14044_v22 = vld [vmem:[#allocation31_spill] sm:$0xff] }
 0x1a9   : > { %8441 = vmatpush3.msra.mxu0 %v14041_v58  ;;  %8421 = vmatprep.mubr.f32.mxu1 %v11177_v50  ;;  %v13576_v18 = vand.u32 4294901760, %v11206_v57  ;;  %v11222_v54 = vsub.f32 %v2894_v17, %v11177_v50  ;;  %v2898_v1 = vmax.f32 %v2882_v44, 0.0  ;;  %v11227_v62 = vsub.f32 %v2895_v49, %v11199_v41  ;;  %v14045_v44 = vld [vmem:[#allocation24_spill] sm:$0xff] }
 0x1aa   : > { %8356 = vmatprep.mubr.f32.mxu0 %v3049_v3  ;;  %8442 = vmatprep.subr.mxu0 %v14043_v0  ;;  %v13575_v15 = vand.u32 4294901760, %v11219_v59  ;;  %v11234_v8 = vand.u32 4294901760, %v2897_v2  ;;  %v2899_v37 = vmax.f32 %v2883_v52, 0.0  ;;  %v3079_v4 = vand.u32 4294901760, %v3078_v24 }
 0x1ab   : > { %8505 = vmatpush3.msra.mxu1 %v14042_v39  ;;  %8443 = vmatpush3.msra.mxu0 %v14043_v0  ;;  %v3088_v20 = vsub.f32 %v11206_v57, %v13576_v18  ;;  %v13574_v17 = vand.u32 4294901760, %v11222_v54  ;;  %v11239_v49 = vsub.f32 %v2896_v36, %v11214_v56  ;;  %v13577_v52 = vand.u32 4294901760, %v11227_v62  ;;  %v14046_v36 = vld [vmem:[#allocation34_spill] sm:$0xff] }
 0x1ac   : > { %8357 = vmatmul.mubr.f32.gmra.mxu0 %v3059_v31  ;;  %8422 = vmatmul.mubr.f32.gmra.mxu1 %v11199_v41  ;;  %v3098_v7 = vsub.f32 %v11219_v59, %v13575_v15  ;;  %v11256_v24 = vsub.f32 %v2897_v2, %v11234_v8  ;;  %v14047_v31 = vld [vmem:[#allocation27_spill] sm:$0xff]  ;;  %v14049_v15 = vld [vmem:[#allocation30_spill] sm:$0xff] }
 0x1ad   : > { %8359 = vmatprep.mubr.f32.mxu0 %v3069_v5  ;;  %8506 = vmatprep.subr.mxu1 %v14044_v22  ;;  %v3089_v58 = vand.u32 4294901760, %v3088_v20  ;;  %v3108_v3 = vsub.f32 %v11222_v54, %v13574_v17  ;;  %v11250_v5 = vand.u32 4294901760, %v2898_v1  ;;  %v13578_v0 = vand.u32 4294901760, %v11239_v49 }
 0x1ae   : > { %8444 = vmatprep.subr.mxu0 %v14045_v44  ;;  %8507 = vmatpush3.msra.mxu1 %v14044_v22  ;;  %v11260_v20 = vand.u32 4294901760, %v2899_v37  ;;  %v3099_v17 = vand.u32 4294901760, %v3098_v7  ;;  %v13579_v18 = vand.u32 4294901760, %v11256_v24 }
 0x1af   : > { %8445 = vmatpush3.msra.mxu0 %v14045_v44  ;;  %8508 = vmatprep.subr.mxu1 %v14046_v36  ;;  %v3109_v44 = vand.u32 4294901760, %v3108_v3  ;;  %v11268_v2 = vsub.f32 %v2898_v1, %v11250_v5  ;;  %v3128_v7 = vsub.f32 %v11239_v49, %v13578_v0  ;;  %v14050_v3 = vld [vmem:[#allocation40_spill] sm:$0xff] }
 0x1b0   : > { %8360 = vmatmul.mubr.f32.gmra.mxu0 %v3079_v4  ;;  %8424 = vmatprep.mubr.f32.mxu1 %v11214_v56  ;;  %v3118_v4 = vsub.f32 %v11227_v62, %v13577_v52  ;;  %v11280_v1 = vsub.f32 %v2899_v37, %v11260_v20 }
 0x1b1   : > { %8362 = vmatprep.mubr.f32.mxu0 %v3089_v58  ;;  %8446 = vmatprep.subr.mxu0 %v14047_v31  ;;  %v14048_v58 = vld [vmem:[#allocation37_spill] sm:$0xff]  ;;  %v3147_v52 = vand.u32 4294901760, %v11268_v2  ;;  %v3129_v37 = vand.u32 4294901760, %v3128_v7 }
 0x1b2   : > { %8509 = vmatpush3.msra.mxu1 %v14046_v36  ;;  %8447 = vmatpush3.msra.mxu0 %v14047_v31  ;;  %v3119_v31 = vand.u32 4294901760, %v3118_v4  ;;  %v14053_v4 = vld [vmem:[#allocation36_spill] sm:$0xff]  ;;  %v3157_v0 = vand.u32 4294901760, %v11280_v1 }
 0x1b3   : > { %8425 = vmatmul.mubr.f32.gmra.mxu1 %v11234_v8  ;;  %8510 = vmatprep.subr.mxu1 %v14048_v58 }
 0x1b4   : > { %8363 = vmatmul.mubr.f32.gmra.mxu0 %v3099_v17  ;;  %8448 = vmatprep.subr.mxu0 %v14049_v15  ;;  %v14051_v17 = vld [vmem:[#allocation33_spill] sm:$0xff]  ;;  %v3158_v40 = vsub.f32 %v11280_v1, %v3157_v0 }
 0x1b5   : > { %8511 = vmatpush3.msra.mxu1 %v14048_v58  ;;  %8449 = vmatpush3.msra.mxu0 %v14049_v15  ;;  %v3138_v15 = vsub.f32 %v11256_v24, %v13579_v18  ;;  %v14054_v18 = vld [vmem:[#allocation45_spill] sm:$0xff] }
 0x1b6   : > { %8512 = vmatprep.subr.mxu1 %v14050_v3  ;;  %8365 = vmatprep.mubr.f32.mxu0 %v3109_v44  ;;  %v14052_v44 = vld [vmem:[#allocation41_spill] sm:$0xff] }
 0x1b7   : > { %8427 = vmatprep.mubr.f32.mxu1 %v11250_v5  ;;  %8450 = vmatprep.subr.mxu0 %v14051_v17  ;;  %v3139_v7 = vand.u32 4294901760, %v3138_v15  ;;  %v3159_v15 = vand.u32 4294901760, %v3158_v40  ;;  %v14081_v40 = vld [vmem:[#allocation51_spill] sm:$0xff] }
 0x1b8   : > { %8513 = vmatpush3.msra.mxu1 %v14050_v3  ;;  %8366 = vmatmul.mubr.f32.gmra.mxu0 %v3119_v31  ;;  %v3148_v31 = vsub.f32 %v11268_v2, %v3147_v52 }
 0x1b9   : > { %8428 = vmatmul.mubr.f32.gmra.mxu1 %v11260_v20  ;;  %8451 = vmatpush3.msra.mxu0 %v14051_v17  ;;  %v14055_v17 = vld [vmem:[#allocation39_spill] sm:$0xff] }
 0x1ba   : > { %8514 = vmatprep.subr.mxu1 %v14052_v44  ;;  %8452 = vmatprep.subr.mxu0 %v14053_v4 }
 0x1bb   : > { %8515 = vmatpush3.msra.mxu1 %v14052_v44  ;;  %8518 = vmatprep.mubr.f32.mxu1 %v3007_v19  ;;  %v3149_v19 = vand.u32 4294901760, %v3148_v31 }
 0x1bc   : > { %8453 = vmatpush3.msra.mxu0 %v14053_v4  ;;  %8516 = vmatprep.subr.mxu1 %v14054_v18  ;;  %v14056_v4 = vld [vmem:[#allocation43_spill] sm:$0xff] }
 0x1bd   : > { %8368 = vmatprep.mubr.f32.mxu0 %v3129_v37  ;;  %8454 = vmatprep.subr.mxu0 %v14055_v17  ;;  %v14057_v37 = vld [vmem:[#allocation44_spill] sm:$0xff] }
 0x1be   : > { %8517 = vmatpush3.msra.mxu1 %v14054_v18  ;;  %8369 = vmatmul.mubr.f32.gmra.mxu0 %v3139_v7 }
 0x1bf   : > { %8455 = vmatpush3.msra.mxu0 %v14055_v17  ;;  %8519 = vmatmul.mubr.f32.vlgmr.msra.gmra.mxu1 %v3017_v30  ;;  %v14058_v30 = vld [vmem:[#allocation49_spill] sm:$0xff] }
 0x1c0   : > { %8598 = vmatprep.subr.mxu1 %v14010_v28  ;;  %8456 = vmatprep.subr.mxu0 %v14056_v4 }
 0x1c1   : > { %8521 = vmatprep.mubr.f32.mxu1 %v3027_v9  ;;  %8599 = vmatpush3.msra.mxu1 %v14010_v28  ;;  %v14059_v28 = vld [vmem:[#allocation5_spill] sm:$0xff]  ;;  %v14067_v9 = vand.u32 4294901760, %v11222_v54 }
 0x1c2   : > { %8457 = vmatpush3.msra.mxu0 %v14056_v4  ;;  %8600 = vmatprep.subr.mxu1 %v14013_v38 }
 0x1c3   : > { %8371 = vmatprep.mubr.f32.mxu0 %v3149_v19  ;;  %8458 = vmatprep.subr.mxu0 %v14057_v37 }
 0x1c4   : > { %8601 = vmatpush3.msra.mxu1 %v14013_v38  ;;  %8372 = vmatmul.mubr.f32.gmra.mxu0 %v3159_v15  ;;  %v14062_v38 = vand.u32 4294901760, %v11182_v27  ;;  %v7177_v15 = vld [vmem:[%s13474_s4 + $0xb8] sm:$0xff] }
 0x1c5   : > { %8459 = vmatpush3.msra.mxu0 %v14057_v37  ;;  %8522 = vmatmul.mubr.f32.gmra.mxu1 %v3037_v29  ;;  %v14071_v29 = vand.u32 4294901760, %v11239_v49 }
 0x1c6   : > { %8602 = vmatprep.subr.mxu1 %v14016_v42  ;;  %8460 = vmatprep.subr.mxu0 %v14058_v30 }
 0x1c7   : > { %8462 = vmatprep.mubr.f32.mxu0 %v11024_v13  ;;  %8524 = vmatprep.mubr.f32.mxu1 %v3047_v51  ;;  %v14060_v13 = vld [vmem:[#allocation8_spill] sm:$0xff]  ;;  %v14076_v51 = vld [vmem:[#allocation35_spill] sm:$0xff] }
 0x1c8   : > { %8603 = vmatpush3.msra.mxu1 %v14016_v42  ;;  %8461 = vmatpush3.msra.mxu0 %v14058_v30  ;;  %v14063_v42 = vand.u32 4294901760, %v11206_v57 }
 0x1c9   : > { %8604 = vmatprep.subr.mxu1 %v14019_v61  ;;  %8542 = vmatprep.subr.mxu0 %v14059_v28 }
 0x1ca   : > { %8605 = vmatpush3.msra.mxu1 %v14019_v61  ;;  %8463 = vmatmul.mubr.f32.vlgmr.msra.gmra.mxu0 %v10987_v25  ;;  %v14061_v25 = vld [vmem:[#allocation11_spill] sm:$0xff]  ;;  %v14064_v61 = vld [vmem:[#allocation14_spill] sm:$0xff] }
 0x1cb   : > { %8525 = vmatmul.mubr.f32.gmra.mxu1 %v3057_v21  ;;  %8543 = vmatpush3.msra.mxu0 %v14059_v28  ;;  %v14077_v21 = vld [vmem:[#allocation38_spill] sm:$0xff] }
 0x1cc   : > { %8606 = vmatprep.subr.mxu1 %v14022_v35  ;;  %8465 = vmatprep.mubr.f32.mxu0 %v11082_v46  ;;  %v14066_v46 = vand.u32 4294901760, %v11219_v59 }
 0x1cd   : > { %8527 = vmatprep.mubr.f32.mxu1 %v3067_v10  ;;  %8544 = vmatprep.subr.mxu0 %v14060_v13  ;;  %v14078_v10 = vld [vmem:[#allocation42_spill] sm:$0xff] }
 0x1ce   : > { %8607 = vmatpush3.msra.mxu1 %v14022_v35  ;;  %8545 = vmatpush3.msra.mxu0 %v14060_v13  ;;  %v14065_v35 = vld [vmem:[#allocation18_spill] sm:$0xff]  ;;  %v11570_v13 = vand.u32 4294901760, %v7177_v15 }
 0x1cf   : > { %8608 = vmatprep.subr.mxu1 %v14028_v26  ;;  %8546 = vmatprep.subr.mxu0 %v14061_v25 }
 0x1d0   : > { %8609 = vmatpush3.msra.mxu1 %v14028_v26  ;;  %8466 = vmatmul.mubr.f32.gmra.mxu0 %v11124_v33  ;;  %v14068_v26 = vld [vmem:[#allocation22_spill] sm:$0xff]  ;;  %v14069_v33 = vld [vmem:[#allocation23_spill] sm:$0xff]  ;;  %14105 = vst [vmem:[#allocation91_spill] sm:$0xff] %v11570_v13 }
 0x1d1   : > { %8528 = vmatmul.mubr.f32.gmra.mxu1 %v14062_v38  ;;  %8547 = vmatpush3.msra.mxu0 %v14061_v25  ;;  %v7176_v38 = vld [vmem:[%s13474_s4 + $0xb0] sm:$0xff] }
 0x1d2   : > { %8610 = vmatprep.subr.mxu1 %v14034_v34  ;;  %8468 = vmatprep.mubr.f32.mxu0 %v11147_v47  ;;  %v14072_v47 = vld [vmem:[#allocation26_spill] sm:$0xff] }
 0x1d3   : > { %8530 = vmatprep.mubr.f32.mxu1 %v14063_v42  ;;  %8548 = vmatprep.subr.mxu0 %v14064_v61 }
 0x1d4   : > { %8611 = vmatpush3.msra.mxu1 %v14034_v34  ;;  %8549 = vmatpush3.msra.mxu0 %v14064_v61  ;;  %v14070_v34 = vand.u32 4294901760, %v11227_v62 }
 0x1d5   : > { %8612 = vmatprep.subr.mxu1 %v14037_v11  ;;  %8550 = vmatprep.subr.mxu0 %v14065_v35 }
 0x1d6   : > { %8613 = vmatpush3.msra.mxu1 %v14037_v11  ;;  %8469 = vmatmul.mubr.f32.gmra.mxu0 %v11152_v60  ;;  %v14073_v60 = vld [vmem:[#allocation29_spill] sm:$0xff]  ;;  %v14074_v11 = vand.u32 4294901760, %v11256_v24 }
 0x1d7   : > { %8531 = vmatmul.mubr.f32.gmra.mxu1 %v14066_v46  ;;  %8551 = vmatpush3.msra.mxu0 %v14065_v35  ;;  %v11583_v46 = vsub.f32 %v7177_v15, %v11570_v13 }
 0x1d8   : > { %8614 = vmatprep.subr.mxu1 %v14040_v63  ;;  %8471 = vmatprep.mubr.f32.mxu0 %v11162_v16  ;;  %v14075_v16 = vld [vmem:[#allocation32_spill] sm:$0xff] }
 0x1d9   : > { %8533 = vmatprep.mubr.f32.mxu1 %v14067_v9  ;;  %8552 = vmatprep.subr.mxu0 %v14068_v26  ;;  %14107 = vst [vmem:[#allocation77_spill] sm:$0xff] %v11583_v46  ;;  %v11586_v9 = vand.u32 4294901760, %v7176_v38 }
 0x1da   : > { %8615 = vmatpush3.msra.mxu1 %v14040_v63  ;;  %8553 = vmatpush3.msra.mxu0 %v14068_v26  ;;  %v14080_v63 = vld [vmem:[#allocation48_spill] sm:$0xff]  ;;  %v7175_v26 = vld [vmem:[%s13474_s4 + $0xa8] sm:$0xff] }
 0x1db   : > { %8616 = vmatprep.subr.mxu1 %v14042_v39  ;;  %8554 = vmatprep.subr.mxu0 %v14069_v33  ;;  %14108 = vst [vmem:[#allocation79_spill] sm:$0xff] %v11586_v9 }
 0x1dc   : > { %8617 = vmatpush3.msra.mxu1 %v14042_v39  ;;  %8472 = vmatmul.mubr.f32.gmra.mxu0 %v11182_v27  ;;  %v14079_v27 = vld [vmem:[#allocation47_spill] sm:$0xff] }
 0x1dd   : > { %8534 = vmatmul.mubr.f32.gmra.mxu1 %v14070_v34  ;;  %8555 = vmatpush3.msra.mxu0 %v14069_v33 }
 0x1de   : > { %8618 = vmatprep.subr.mxu1 %v14044_v22  ;;  %8474 = vmatprep.mubr.f32.mxu0 %v11206_v57 }
 0x1df   : > { %8536 = vmatprep.mubr.f32.mxu1 %v14071_v29  ;;  %8556 = vmatprep.subr.mxu0 %v14072_v47  ;;  %v11595_v29 = vand.u32 4294901760, %v11583_v46 }
 0x1e0   : > { %8619 = vmatpush3.msra.mxu1 %v14044_v22  ;;  %8557 = vmatpush3.msra.mxu0 %v14072_v47  ;;  %v7180_v22 = vld [vmem:[%s13474_s4 + $0xd0] sm:$0xff]  ;;  %v11597_v47 = vand.u32 4294901760, %v7175_v26 }
 0x1e1   : > { %8620 = vmatprep.subr.mxu1 %v14046_v36  ;;  %8558 = vmatprep.subr.mxu0 %v14073_v60  ;;  %14109 = vst [vmem:[#allocation97_spill] sm:$0xff] %v11595_v29 }
 0x1e2   : > { %8621 = vmatpush3.msra.mxu1 %v14046_v36  ;;  %8475 = vmatmul.mubr.f32.gmra.mxu0 %v11219_v59  ;;  %v11523_v36 = vand.u32 4294901760, %v7180_v22  ;;  %14110 = vst [vmem:[#allocation81_spill] sm:$0xff] %v11597_v47 }
 0x1e3   : > { %8537 = vmatmul.mubr.f32.gmra.mxu1 %v14074_v11  ;;  %8559 = vmatpush3.msra.mxu0 %v14073_v60  ;;  %v11601_v60 = vsub.f32 %v7176_v38, %v11586_v9  ;;  %v7174_v11 = vld [vmem:[%s13474_s4 + $0xa0] sm:$0xff] }
 0x1e4   : > { %8622 = vmatprep.subr.mxu1 %v14048_v58  ;;  %8477 = vmatprep.mubr.f32.mxu0 %v11222_v54  ;;  %14095 = vst [vmem:[#allocation65_spill] sm:$0xff] %v11523_v36 }
 0x1e5   : > { %8539 = vmatprep.mubr.f32.mxu1 %v3147_v52  ;;  %8560 = vmatprep.subr.mxu0 %v14075_v16  ;;  %14111 = vst [vmem:[#allocation83_spill] sm:$0xff] %v11601_v60 }
 0x1e6   : > { %8623 = vmatpush3.msra.mxu1 %v14048_v58  ;;  %8561 = vmatpush3.msra.mxu0 %v14075_v16  ;;  %v11535_v58 = vsub.f32 %v7180_v22, %v11523_v36 }
 0x1e7   : > { %8624 = vmatprep.subr.mxu1 %v14050_v3  ;;  %8562 = vmatprep.subr.mxu0 %v14076_v51 }
 0x1e8   : > { %8625 = vmatpush3.msra.mxu1 %v14050_v3  ;;  %8478 = vmatmul.mubr.f32.gmra.mxu0 %v11227_v62  ;;  %14097 = vst [vmem:[#allocation64_spill] sm:$0xff] %v11535_v58  ;;  %v11548_v7 = vand.u32 4294901760, %v11535_v58 }
 0x1e9   : > { %8540 = vmatmul.mubr.f32.gmra.mxu1 %v3157_v0  ;;  %8563 = vmatpush3.msra.mxu0 %v14076_v51  ;;  %v7179_v0 = vld [vmem:[%s13474_s4 + $0xc8] sm:$0xff]  ;;  %v4552_v51 = vsub.f32 %v11583_v46, %v11595_v29 }
 0x1ea   : > { %8626 = vmatprep.subr.mxu1 %v14052_v44  ;;  %8480 = vmatprep.mubr.f32.mxu0 %v11239_v49  ;;  %14100 = vst [vmem:[#allocation75_spill] sm:$0xff] %v11548_v7  ;;  %v4531_v37 = vsub.f32 %v11535_v58, %v11548_v7 }
 0x1eb   : > { %8564 = vmatprep.subr.mxu0 %v14077_v21  ;;  %8627 = vmatpush3.msra.mxu1 %v14052_v44  ;;  %v7178_v44 = vld [vmem:[%s13474_s4 + $0xc0] sm:$0xff] }
 0x1ec   : > { %8630 = vmatprep.mubr.f32.mxu1 %v10995_v23  ;;  %8565 = vmatpush3.msra.mxu0 %v14077_v21  ;;  %v11553_v19 = vand.u32 4294901760, %v7178_v44  ;;  %v4532_v42 = vand.u32 4294901760, %v4531_v37  ;;  %v11610_v21 = vsub.f32 %v7175_v26, %v11597_v47 }
 0x1ed   : > { %8628 = vmatprep.subr.mxu1 %v14054_v18  ;;  %8566 = vmatprep.subr.mxu0 %v14078_v10 }
 0x1ee   : > { %8629 = vmatpush3.msra.mxu1 %v14054_v18  ;;  %8481 = vmatmul.mubr.f32.gmra.mxu0 %v11256_v24  ;;  %14102 = vst [vmem:[#allocation72_spill] sm:$0xff] %v11553_v19  ;;  %v11568_v28 = vsub.f32 %v7178_v44, %v11553_v19  ;;  %14112 = vst [vmem:[#allocation100_spill] sm:$0xff] %v11610_v21 }
 0x1ef   : > { %8567 = vmatpush3.msra.mxu0 %v14078_v10  ;;  %8631 = vmatmul.mubr.f32.vlgmr.msra.gmra.mxu1 %v10976_v14  ;;  %v11612_v10 = vand.u32 4294901760, %v7174_v11 }
 0x1f0   : > { %8483 = vmatprep.mubr.f32.mxu0 %v11268_v2  ;;  %8568 = vmatprep.subr.mxu0 %v14079_v27  ;;  %14104 = vst [vmem:[#allocation89_spill] sm:$0xff] %v11568_v28  ;;  %v11580_v35 = vand.u32 4294901760, %v11568_v28 }
 0x1f1   : > { %8633 = vmatprep.mubr.f32.mxu1 %v11012_v48  ;;  %8569 = vmatpush3.msra.mxu0 %v14079_v27  ;;  %14113 = vst [vmem:[#allocation107_spill] sm:$0xff] %v11612_v10  ;;  %v11616_v27 = vand.u32 4294901760, %v11601_v60 }
 0x1f2   : > { %8570 = vmatprep.subr.mxu0 %v14080_v63  ;;  %8484 = vmatmul.mubr.f32.gmra.mxu0 %v11280_v1  ;;  %v11537_v1 = vand.u32 4294901760, %v7179_v0  ;;  %14106 = vst [vmem:[#allocation94_spill] sm:$0xff] %v11580_v35  ;;  %v4545_v34 = vsub.f32 %v11568_v28, %v11580_v35 }
 0x1f3   : > { %8571 = vmatpush3.msra.mxu0 %v14080_v63  ;;  %8634 = vmatmul.mubr.f32.gmra.mxu1 %v11021_v32  ;;  %14114 = vst [vmem:[#allocation109_spill] sm:$0xff] %v11616_v27  ;;  %v7173_v63 = vld [vmem:[%s13474_s4 + $0x98] sm:$0xff] }
 0x1f4   : > { %8572 = vmatprep.subr.mxu0 %v14081_v40  ;;  %8574 = vmatprep.mubr.f32.mxu0 %v10995_v23  ;;  %14098 = vst [vmem:[#allocation86_spill] sm:$0xff] %v11537_v1  ;;  %v11551_v17 = vsub.f32 %v7179_v0, %v11537_v1  ;;  %v4546_v16 = vand.u32 4294901760, %v4545_v34 }
 0x1f5   : > { %8636 = vmatprep.mubr.f32.mxu1 %v11054_v55  ;;  %8573 = vmatpush3.msra.mxu0 %v14081_v40  ;;  %v4553_v40 = vand.u32 4294901760, %v4552_v51 }
 0x1f6   : > { %8575 = vmatmul.mubr.f32.vlgmr.msra.gmra.mxu0 %v10976_v14  ;;  %v7185_v14 = vld [vmem:[%s13474_s4 + $0xf8] sm:$0xff]  ;;  %14101 = vst [vmem:[#allocation88_spill] sm:$0xff] %v11551_v17  ;;  %v11565_v30 = vand.u32 4294901760, %v11551_v17 }
 0x1f7   : > { %8637 = vmatmul.mubr.f32.gmra.mxu1 %v11076_v6  ;;  %8577 = vmatprep.mubr.f32.mxu0 %v11012_v48  ;;  %v11460_v23 = vand.u32 4294901760, %v7185_v14  ;;  %v7184_v48 = vld [vmem:[%s13474_s4 + $0xf0] sm:$0xff] }
 0x1f8   : > { %8639 = vmatprep.mubr.f32.mxu1 %v11097_v12  ;;  %14103 = vst [vmem:[#allocation67_spill] sm:$0xff] %v11565_v30  ;;  %v4538_v61 = vsub.f32 %v11551_v17, %v11565_v30 }
 0x1f9   : > { %14082 = vst [vmem:[#allocation66_spill] sm:$0xff] %v11460_v23  ;;  %8654 = vmatprep.subr.mxu0 %v11460_v23 }
 0x1fa   : > { %8578 = vmatmul.mubr.f32.gmra.mxu0 %v11021_v32  ;;  %v11466_v32 = vsub.f32 %v7185_v14, %v11460_v23  ;;  %v4539_v33 = vand.u32 4294901760, %v4538_v61  ;;  %v11623_v14 = vand.u32 4294901760, %v11610_v21 }
 0x1fb   : > { %8640 = vmatmul.mubr.f32.gmra.mxu1 %v11114_v53  ;;  %8580 = vmatprep.mubr.f32.mxu0 %v11054_v55  ;;  %v11468_v55 = vand.u32 4294901760, %v7184_v48 }
 0x1fc   : > { %8642 = vmatprep.mubr.f32.mxu1 %v11130_v45  ;;  %14083 = vst [vmem:[#allocation69_spill] sm:$0xff] %v11466_v32  ;;  %8655 = vmatpush3.msra.mxu0 %v11460_v23  ;;  %14115 = vst [vmem:[#allocation85_spill] sm:$0xff] %v11623_v14 }
 0x1fd   : > { %14084 = vst [vmem:[#allocation71_spill] sm:$0xff] %v11468_v55  ;;  %8656 = vmatprep.subr.mxu0 %v11468_v55 }
 0x1fe   : > { %8581 = vmatmul.mubr.f32.gmra.mxu0 %v11076_v6  ;;  %v7183_v6 = vld [vmem:[%s13474_s4 + $0xe8] sm:$0xff] }
 0x1ff   : > { %8643 = vmatmul.mubr.f32.gmra.mxu1 %v11171_v43  ;;  %8583 = vmatprep.mubr.f32.mxu0 %v11097_v12  ;;  %v11476_v12 = vand.u32 4294901760, %v11466_v32 }
 0x200   : > { %8645 = vmatprep.mubr.f32.mxu1 %v11177_v50  ;;  %8657 = vmatpush3.msra.mxu0 %v11468_v55 }
 0x201   : > { %14085 = vst [vmem:[#allocation57_spill] sm:$0xff] %v11476_v12 }
 0x202   : > { %8584 = vmatmul.mubr.f32.gmra.mxu0 %v11114_v53  ;;  %v11479_v53 = vsub.f32 %v7184_v48, %v11468_v55  ;;  %v11626_v48 = vsub.f32 %v7174_v11, %v11612_v10 }
 0x203   : > { %8646 = vmatmul.mubr.f32.gmra.mxu1 %v11199_v41  ;;  %8586 = vmatprep.mubr.f32.mxu0 %v11130_v45  ;;  %v11481_v45 = vand.u32 4294901760, %v7183_v6 }
 0x204   : > { %8648 = vmatprep.mubr.f32.mxu1 %v11214_v56  ;;  %14086 = vst [vmem:[#allocation73_spill] sm:$0xff] %v11479_v53  ;;  %14116 = vst [vmem:[#allocation87_spill] sm:$0xff] %v11626_v48 }
 0x205   : > { %14087 = vst [vmem:[#allocation80_spill] sm:$0xff] %v11481_v45  ;;  %v11494_v39 = vsub.f32 %v7183_v6, %v11481_v45  ;;  %8658 = vmatprep.subr.mxu0 %v11481_v45  ;;  %v11628_v6 = vand.u32 4294901760, %v7173_v63 }
 0x206   : > { %8587 = vmatmul.mubr.f32.gmra.mxu0 %v11171_v43  ;;  %v7182_v43 = vld [vmem:[%s13474_s4 + $0xe0] sm:$0xff] }
 0x207   : > { %8649 = vmatmul.mubr.f32.gmra.mxu1 %v11234_v8  ;;  %8589 = vmatprep.mubr.f32.mxu0 %v11177_v50  ;;  %v4496_v50 = vsub.f32 %v11466_v32, %v11476_v12  ;;  %14089 = vst [vmem:[#allocation76_spill] sm:$0xff] %v11494_v39  ;;  %v11496_v57 = vand.u32 4294901760, %v7182_v43  ;;  %v11506_v54 = vand.u32 4294901760, %v11494_v39  ;;  %14117 = vst [vmem:[#allocation90_spill] sm:$0xff] %v11628_v6 }
 0x208   : > { %8651 = vmatprep.mubr.f32.mxu1 %v11250_v5  ;;  %8659 = vmatpush3.msra.mxu0 %v11481_v45 }
 0x209   : > { %14090 = vst [vmem:[#allocation74_spill] sm:$0xff] %v11496_v57  ;;  %v4497_v18 = vand.u32 4294901760, %v4496_v50  ;;  %14091 = vst [vmem:[#allocation61_spill] sm:$0xff] %v11506_v54  ;;  %v11509_v62 = vsub.f32 %v7182_v43, %v11496_v57  ;;  %8660 = vmatprep.subr.mxu0 %v11496_v57  ;;  %v4510_v52 = vsub.f32 %v11494_v39, %v11506_v54  ;;  %v7172_v50 = vld [vmem:[%s13474_s4 + $0x90] sm:$0xff] }
 0x20a   : > { %8590 = vmatmul.mubr.f32.gmra.mxu0 %v11199_v41  ;;  %v11491_v41 = vand.u32 4294901760, %v11479_v53  ;;  %v4559_v43 = vsub.f32 %v11601_v60, %v11616_v27  ;;  %v11645_v22 = vand.u32 4294901760, %v7172_v50 }
 0x20b   : > { %8652 = vmatmul.mubr.f32.gmra.mxu1 %v11260_v20  ;;  %8592 = vmatprep.mubr.f32.mxu0 %v11214_v56  ;;  %v7181_v56 = vld [vmem:[%s13474_s4 + $0xd8] sm:$0xff]  ;;  %14092 = vst [vmem:[#allocation82_spill] sm:$0xff] %v11509_v62 }
 0x20c   : > { %14088 = vst [vmem:[#allocation59_spill] sm:$0xff] %v11491_v41  ;;  %v4503_v59 = vsub.f32 %v11479_v53, %v11491_v41  ;;  %8661 = vmatpush3.msra.mxu0 %v11496_v57  ;;  %8710 = vmatprep.subr.mxu1 %v4497_v18  ;;  %14120 = vst [vmem:[#allocation96_spill] sm:$0xff] %v11645_v22  ;;  %v11658_v44 = vsub.f32 %v7172_v50, %v11645_v22 }
 0x20d   : > { %8711 = vmatpush3.msra.mxu1 %v4497_v18  ;;  %v11640_v18 = vand.u32 4294901760, %v11626_v48 }
 0x20e   : > { %8593 = vmatmul.mubr.f32.gmra.mxu0 %v11234_v8  ;;  %v11512_v8 = vand.u32 4294901760, %v7181_v56  ;;  %v4504_v49 = vand.u32 4294901760, %v4503_v59  ;;  %v11643_v59 = vsub.f32 %v7173_v63, %v11628_v6  ;;  %14122 = vst [vmem:[#allocation103_spill] sm:$0xff] %v11658_v44 }
 0x20f   : > { %8595 = vmatprep.mubr.f32.mxu0 %v11250_v5  ;;  %v11521_v5 = vand.u32 4294901760, %v11509_v62  ;;  %14118 = vst [vmem:[#allocation93_spill] sm:$0xff] %v11640_v18 }
 0x210   : > { %14093 = vst [vmem:[#allocation84_spill] sm:$0xff] %v11512_v8  ;;  %v11526_v24 = vsub.f32 %v7181_v56, %v11512_v8  ;;  %8662 = vmatprep.subr.mxu0 %v11512_v8  ;;  %8712 = vmatprep.subr.mxu1 %v4504_v49  ;;  %v4566_v56 = vsub.f32 %v11610_v21, %v11623_v14  ;;  %14119 = vst [vmem:[#allocation102_spill] sm:$0xff] %v11643_v59  ;;  %v11732_v14 = vld [vmem:[%s13475_s5 + $0x1] ss:$0 sm:$0xff] }
 0x211   : > { %14094 = vst [vmem:[#allocation62_spill] sm:$0xff] %v11521_v5  ;;  %v4517_v2 = vsub.f32 %v11509_v62, %v11521_v5  ;;  %8663 = vmatpush3.msra.mxu0 %v11512_v8  ;;  %8713 = vmatpush3.msra.mxu1 %v4504_v49  ;;  %v4560_v49 = vand.u32 4294901760, %v4559_v43 }
 0x212   : > { %8596 = vmatmul.mubr.f32.gmra.mxu0 %v11260_v20  ;;  %14096 = vst [vmem:[#allocation68_spill] sm:$0xff] %v11526_v24  ;;  %v4511_v20 = vand.u32 4294901760, %v4510_v52  ;;  %v11541_v3 = vand.u32 4294901760, %v11526_v24  ;;  %8664 = vmatprep.subr.mxu0 %v11523_v36  ;;  %v7171_v52 = vld [vmem:[%s13474_s4 + $0x88] sm:$0xff]  ;;  %v4567_v0 = vand.u32 4294901760, %v4566_v56 }
 0x213   : > { %v4518_v31 = vand.u32 4294901760, %v4517_v2  ;;  %8665 = vmatpush3.msra.mxu0 %v11523_v36  ;;  %v11655_v2 = vand.u32 4294901760, %v11643_v59 }
 0x214   : > { %14099 = vst [vmem:[#allocation70_spill] sm:$0xff] %v11541_v3  ;;  %8714 = vmatprep.subr.mxu1 %v4511_v20  ;;  %v4524_v4 = vsub.f32 %v11526_v24, %v11541_v3  ;;  %8666 = vmatprep.subr.mxu0 %v11537_v1 }
 0x215   : > { %8715 = vmatpush3.msra.mxu1 %v4511_v20  ;;  %8667 = vmatpush3.msra.mxu0 %v11537_v1  ;;  %v4573_v20 = vsub.f32 %v11626_v48, %v11640_v18  ;;  %14121 = vst [vmem:[#allocation99_spill] sm:$0xff] %v11655_v2  ;;  %v4580_v37 = vsub.f32 %v11643_v59, %v11655_v2 }
 0x216   : > { %8716 = vmatprep.subr.mxu1 %v4518_v31  ;;  %v4525_v25 = vand.u32 4294901760, %v4524_v4  ;;  %8668 = vmatprep.subr.mxu0 %v11553_v19  ;;  %v7170_v4 = vld [vmem:[%s13474_s4 + $0x80] sm:$0xff] }
 0x217   : > { %8717 = vmatpush3.msra.mxu1 %v4518_v31  ;;  %8669 = vmatpush3.msra.mxu0 %v11553_v19  ;;  %v11661_v31 = vand.u32 4294901760, %v7171_v52  ;;  %v4574_v15 = vand.u32 4294901760, %v4573_v20  ;;  %v11672_v38 = vand.u32 4294901760, %v7170_v4  ;;  %v4581_v61 = vand.u32 4294901760, %v4580_v37 }
 0x218   : > { %8718 = vmatprep.subr.mxu1 %v4525_v25  ;;  %8670 = vmatprep.subr.mxu0 %v11570_v13 }
 0x219   : > { %8719 = vmatpush3.msra.mxu1 %v4525_v25  ;;  %8671 = vmatpush3.msra.mxu0 %v11570_v13  ;;  %14123 = vst [vmem:[#allocation105_spill] sm:$0xff] %v11661_v31  ;;  %v11670_v25 = vand.u32 4294901760, %v11658_v44  ;;  %14125 = vst [vmem:[#allocation95_spill] sm:$0xff] %v11672_v38 }
 0x21a   : > { %8720 = vmatprep.subr.mxu1 %v4532_v42  ;;  %8672 = vmatprep.subr.mxu0 %v11586_v9 }
 0x21b   : > { %8721 = vmatpush3.msra.mxu1 %v4532_v42  ;;  %8673 = vmatpush3.msra.mxu0 %v11586_v9  ;;  %14124 = vst [vmem:[#allocation106_spill] sm:$0xff] %v11670_v25  ;;  %v11676_v42 = vsub.f32 %v7171_v52, %v11661_v31  ;;  %v4587_v26 = vsub.f32 %v11658_v44, %v11670_v25 }
 0x21c   : > { %8722 = vmatprep.subr.mxu1 %v4539_v33  ;;  %8674 = vmatprep.subr.mxu0 %v11597_v47 }
 0x21d   : > { %8723 = vmatpush3.msra.mxu1 %v4539_v33  ;;  %8675 = vmatpush3.msra.mxu0 %v11597_v47  ;;  %14126 = vst [vmem:[#allocation98_spill] sm:$0xff] %v11676_v42  ;;  %v11682_v33 = vsub.f32 %v7170_v4, %v11672_v38  ;;  %v11686_v34 = vand.u32 4294901760, %v11676_v42  ;;  %v4588_v11 = vand.u32 4294901760, %v4587_v26 }
 0x21e   : > { %8724 = vmatprep.subr.mxu1 %v4546_v16  ;;  %8676 = vmatprep.subr.mxu0 %v11612_v10 }
 0x21f   : > { %8725 = vmatpush3.msra.mxu1 %v4546_v16  ;;  %8677 = vmatpush3.msra.mxu0 %v11612_v10  ;;  %14127 = vst [vmem:[#allocation108_spill] sm:$0xff] %v11682_v33  ;;  %14128 = vst [vmem:[#allocation110_spill] sm:$0xff] %v11686_v34  ;;  %v11690_v16 = vand.u32 4294901760, %v11682_v33  ;;  %v4594_v51 = vsub.f32 %v11676_v42, %v11686_v34 }
 0x220   : > { %8726 = vmatprep.subr.mxu1 %v4553_v40  ;;  %8678 = vmatprep.subr.mxu0 %v11628_v6 }
 0x221   : > { %8727 = vmatpush3.msra.mxu1 %v4553_v40  ;;  %8679 = vmatpush3.msra.mxu0 %v11628_v6  ;;  %14129 = vst [vmem:[#allocation101_spill] sm:$0xff] %v11690_v16  ;;  %v4601_v63 = vsub.f32 %v11682_v33, %v11690_v16  ;;  %v4595_v40 = vand.u32 4294901760, %v4594_v51 }
 0x222   : > { %8728 = vmatprep.subr.mxu1 %v4560_v49  ;;  %8680 = vmatprep.subr.mxu0 %v11645_v22 }
 0x223   : > { %8729 = vmatpush3.msra.mxu1 %v4560_v49  ;;  %8681 = vmatpush3.msra.mxu0 %v11645_v22  ;;  %v4602_v43 = vand.u32 4294901760, %v4601_v63 }
 0x224   : > { %8730 = vmatprep.subr.mxu1 %v4567_v0  ;;  %8682 = vmatprep.subr.mxu0 %v11661_v31 }
 0x225   : > { %8731 = vmatpush3.msra.mxu1 %v4567_v0  ;;  %8683 = vmatpush3.msra.mxu0 %v11661_v31 }
 0x226   : > { %8732 = vmatprep.subr.mxu1 %v4574_v15  ;;  %8684 = vmatprep.subr.mxu0 %v11672_v38 }
 0x227   : > { %8733 = vmatpush3.msra.mxu1 %v4574_v15  ;;  %8685 = vmatpush3.msra.mxu0 %v11672_v38 }
 0x228   : > { %8734 = vmatprep.subr.mxu1 %v4581_v61  ;;  %8766 = vmatprep.subr.mxu0 %v11466_v32 }
 0x229   : > { %8735 = vmatpush3.msra.mxu1 %v4581_v61 }
 0x22a   : > { %8736 = vmatprep.subr.mxu1 %v4588_v11 }
 0x22b   : > { %8737 = vmatpush3.msra.mxu1 %v4588_v11 }
 0x22c   : > { %8738 = vmatprep.subr.mxu1 %v4595_v40 }
 0x22d   : > { %8739 = vmatpush3.msra.mxu1 %v4595_v40 }
 0x22e   : > { %8740 = vmatprep.subr.mxu1 %v4602_v43 }
 0x22f   : > { %8741 = vmatpush3.msra.mxu1 %v4602_v43 }
 0x230   : > { %8822 = vmatprep.subr.mxu1 %v11460_v23 }
 0x251   : > { %v11699_v50 = vpop.f32.mrf.mxu1 }
 0x253   : > { %v11701_v56 = vpop.f32.mrf.mxu1 }
 0x255   : > { %v11703_v49 = vpop.f32.mrf.mxu1 }
 0x257   : > { %v11705_v52 = vpop.f32.mrf.mxu1 }
 0x25b   : > { %v8352_v4 = vpop.f32.mrf.mxu0 }
 0x25c   : > { %v11707_v0 = vpop.f32.mrf.mxu1  ;;  %v3022_v36 = vadd.f32 %v8352_v4, %v11732_v14 }
 0x25d   : > { %v3011_v61 = vpop.f32.mrf.mxu0 }
 0x25e   : > { %v11709_v20 = vpop.f32.mrf.mxu1  ;;  %v3012_v8 = vadd.f32 %v11732_v14, %v3011_v61 }
 0x260   : > { %v11711_v15 = vpop.f32.mrf.mxu1  ;;  %v3313_v55 = vadd.f32 %v11701_v56, %v3012_v8 }
 0x262   : > { %v11713_v37 = vpop.f32.mrf.mxu1 }
 0x266   : > { %v8420_v26 = vpop.f32.mrf.mxu1 }
 0x268   : > { %v8355_v11 = vpop.f32.mrf.mxu0  ;;  %v11715_v51 = vpop.f32.mrf.mxu1 }
 0x26a   : > { %v11717_v63 = vpop.f32.mrf.mxu0 }
 0x26c   : > { %v11719_v40 = vpop.f32.mrf.mxu0  ;;  %v8423_v43 = vpop.f32.mrf.mxu1 }
 0x26e   : > { %v11721_v16 = vpop.f32.mrf.mxu0  ;;  %v11723_v34 = vpop.f32.mrf.mxu1 }
 0x26f   : > { %v3052_v61 = vadd.f32 %v11732_v14, %v11721_v16 }
 0x270   : > { %v11725_v25 = vpop.f32.mrf.mxu0 }
 0x272   : > { %v11727_v2 = vpop.f32.mrf.mxu0 }
 0x273   : > { %v8426_v18 = vpop.f32.mrf.mxu1 }
 0x274   : > { %v8364_v27 = vpop.f32.mrf.mxu0 }
 0x275   : > { %v3102_v29 = vadd.f32 %v8364_v27, %v11732_v14  ;;  %v11735_v35 = vpop.f32.mrf.mxu1 }
 0x276   : > { %v11737_v30 = vpop.f32.mrf.mxu0 }
 0x277   : > { %v11739_v7 = vadd.f32 %v8420_v26, %v3102_v29  ;;  %v3092_v8 = vadd.f32 %v11732_v14, %v11737_v30 }
 0x278   : > { %v8367_v3 = vpop.f32.mrf.mxu0 }
 0x279   : > { %v3122_v5 = vadd.f32 %v8367_v3, %v11732_v14  ;;  %v8429_v54 = vpop.f32.mrf.mxu1 }
 0x27a   : > { %v3111_v41 = vpop.f32.mrf.mxu0 }
 0x27b   : > { %v11742_v12 = vpop.f32.mrf.mxu1  ;;  %v11744_v33 = vadd.f32 %v8423_v43, %v3122_v5  ;;  %v3112_v56 = vadd.f32 %v11732_v14, %v3111_v41 }
 0x27e   : > { %v8370_v42 = vpop.f32.mrf.mxu0 }
 0x27f   : > { %v3142_v44 = vadd.f32 %v8370_v42, %v11732_v14  ;;  %v8520_v59 = vpop.f32.mrf.mxu1 }
 0x280   : > { %v3131_v27 = vpop.f32.mrf.mxu0 }
 0x281   : > { %v11747_v38 = vpop.f32.mrf.mxu1  ;;  %v11749_v48 = vadd.f32 %v8426_v18, %v3142_v44  ;;  %v3132_v16 = vadd.f32 %v11732_v14, %v3131_v27 }
 0x284   : > { %v8373_v29 = vpop.f32.mrf.mxu0 }
 0x285   : > { %v3162_v26 = vadd.f32 %v8373_v29, %v11732_v14  ;;  %v11752_v31 = vpop.f32.mrf.mxu1 }
 0x286   : > { %v3151_v3 = vpop.f32.mrf.mxu0 }
 0x287   : > { %v11754_v21 = vpop.f32.mrf.mxu1  ;;  %v11756_v22 = vadd.f32 %v8429_v54, %v3162_v26 }
 0x289   : > { %14130 = vst [vmem:[#allocation111_spill] sm:$0xff] %v11756_v22  ;;  %v3042_v22 = vadd.f32 %v8355_v11, %v11732_v14 }
 0x28a   : > { %v8464_v5 = vpop.f32.mrf.mxu0 }
 0x28b   : > { %v11758_v43 = vpop.f32.mrf.mxu1  ;;  %v3331_v11 = vadd.f32 %v11703_v49, %v3042_v22  ;;  %v3152_v22 = vadd.f32 %v11732_v14, %v3151_v3 }
 0x28c   : > { %v3506_v42 = vpop.f32.mrf.mxu0 }
 0x28d   : > { %v11760_v60 = vpop.f32.mrf.mxu1 }
 0x290   : > { %v8467_v6 = vpop.f32.mrf.mxu0 }
 0x291   : > { %v11762_v46 = vpop.f32.mrf.mxu1 }
 0x292   : > { %v3520_v18 = vpop.f32.mrf.mxu0 }
 0x293   : > { %v11764_v44 = vpop.f32.mrf.mxu1 }
 0x296   : > { %v8470_v29 = vpop.f32.mrf.mxu0 }
 0x297   : > { %v11766_v10 = vpop.f32.mrf.mxu1 }
 0x298   : > { %v3534_v28 = vpop.f32.mrf.mxu0 }
 0x299   : > { %v11768_v47 = vpop.f32.mrf.mxu1 }
 0x29c   : > { %v8473_v54 = vpop.f32.mrf.mxu0 }
 0x29d   : > { %v11770_v26 = vpop.f32.mrf.mxu1 }
 0x29e   : > { %v3548_v17 = vpop.f32.mrf.mxu0 }
 0x29f   : > { %v11772_v9 = vpop.f32.mrf.mxu1 }
 0x2a0   : > { %14131 = vst [vmem:[#allocation104_spill] sm:$0xff] %v11772_v9 }
 0x2a2   : > { %v11774_v58 = vpop.f32.mrf.mxu0 }
 0x2a3   : > { %v11776_v13 = vpop.f32.mrf.mxu1 }
 0x2a4   : > { %14132 = vst [vmem:[#allocation112_spill] sm:$0xff] %v11776_v13  ;;  %v11778_v24 = vpop.f32.mrf.mxu0  ;;  %v3319_v13 = vadd.f32 %v11699_v50, %v3022_v36  ;;  %v3082_v36 = vadd.f32 %v11725_v25, %v11732_v14  ;;  %v3507_v50 = vadd.f32 %v3506_v42, %v3313_v55 }
 0x2a5   : > { %v11780_v19 = vpop.f32.mrf.mxu1 }
 0x2a6   : > { %14133 = vst [vmem:[#allocation53_spill] sm:$0xff] %v11780_v19  ;;  %v3514_v19 = vadd.f32 %v8464_v5, %v3319_v13  ;;  %v3072_v13 = vadd.f32 %v11732_v14, %v11727_v2  ;;  %v3337_v2 = vadd.f32 %v11709_v20, %v3052_v61  ;;  %v3355_v30 = vadd.f32 %v11711_v15, %v3082_v36 }
 0x2a8   : > { %v8479_v62 = vpop.f32.mrf.mxu0  ;;  %v3709_v55 = vadd.f32 %v8520_v59, %v3514_v19  ;;  %v3373_v19 = vadd.f32 %v11723_v34, %v3112_v56  ;;  %v3535_v15 = vadd.f32 %v3534_v28, %v3337_v2  ;;  %v3556_v3 = vadd.f32 %v8473_v54, %v3355_v30 }
 0x2a9   : > { %v11782_v1 = vpop.f32.mrf.mxu1  ;;  %v3584_v28 = vadd.f32 %v8479_v62, %v11744_v33 }
 0x2aa   : > { %14134 = vst [vmem:[#allocation115_spill] sm:$0xff] %v11782_v1  ;;  %v11784_v39 = vpop.f32.mrf.mxu0  ;;  %v3032_v1 = vadd.f32 %v11732_v14, %v11717_v63 }
 0x2ab   : > { %v11787_v53 = vpop.f32.mrf.mxu1 }
 0x2ac   : > { %14135 = vst [vmem:[#allocation117_spill] sm:$0xff] %v11787_v53  ;;  %v3062_v53 = vadd.f32 %v11719_v40, %v11732_v14  ;;  %v3528_v40 = vadd.f32 %v8467_v6, %v3331_v11  ;;  %v3325_v5 = vadd.f32 %v11705_v52, %v3032_v1  ;;  %v3349_v6 = vadd.f32 %v11713_v37, %v3072_v13 }
 0x2ad   : > { %v3361_v1 = vadd.f32 %v11715_v51, %v3092_v8 }
 0x2ae   : > { %v11790_v32 = vpop.f32.mrf.mxu0  ;;  %v3343_v49 = vadd.f32 %v11707_v0, %v3062_v53  ;;  %v3385_v53 = vadd.f32 %v11735_v35, %v3132_v16  ;;  %v3725_v20 = vadd.f32 %v11752_v31, %v3528_v40 }
 0x2af   : > { %v8632_v57 = vpop.f32.mrf.mxu1  ;;  %v3563_v35 = vadd.f32 %v11778_v24, %v3361_v1  ;;  %v3757_v24 = vadd.f32 %v11762_v46, %v3556_v3  ;;  %v11859_v46 = vadd.f32 %v11770_v26, %v3584_v28  ;;  %v14147_v3 = vld [vmem:[#allocation80_spill] sm:$0xff] }
 0x2b0   : > { %v11794_v45 = vpop.f32.mrf.mxu0  ;;  %v3542_v27 = vadd.f32 %v8470_v29, %v3343_v49 }
 0x2b1   : > { %14136 = vst [vmem:[#allocation116_spill] sm:$0xff] %v11794_v45  ;;  %v4116_v4 = vpop.f32.mrf.mxu1 }
 0x2b2   : > { %v11803_v23 = vpop.f32.mrf.mxu0 }
 0x2b3   : > { %14137 = vst [vmem:[#allocation119_spill] sm:$0xff] %v11803_v23  ;;  %v8635_v45 = vpop.f32.mrf.mxu1  ;;  %v3521_v23 = vadd.f32 %v3520_v18, %v3325_v5  ;;  %v3549_v18 = vadd.f32 %v3548_v17, %v3349_v6  ;;  %v3741_v17 = vadd.f32 %v11758_v43, %v3542_v27 }
 0x2b4   : > { %v11813_v63 = vpop.f32.mrf.mxu0 }
 0x2b5   : > { %14138 = vst [vmem:[#allocation2_spill] sm:$0xff] %v11813_v63  ;;  %v4128_v25 = vpop.f32.mrf.mxu1  ;;  %v3701_v63 = vadd.f32 %v11747_v38, %v3507_v50  ;;  %v11828_v38 = vadd.f32 %v11742_v12, %v3152_v22  ;;  %v3717_v36 = vadd.f32 %v11754_v21, %v3521_v23  ;;  %v3577_v23 = vadd.f32 %v11784_v39, %v3373_v19  ;;  %v14145_v19 = vld [vmem:[#allocation71_spill] sm:$0xff] }
 0x2b6   : > { %v8576_v42 = vpop.f32.mrf.mxu0  ;;  %v3749_v62 = vadd.f32 %v11764_v44, %v3549_v18 }
 0x2b7   : > { %v3946_v41 = vadd.f32 %v8576_v42, %v3709_v55  ;;  %v8638_v9 = vpop.f32.mrf.mxu1  ;;  %v14141_v55 = vld [vmem:[#allocation104_spill] sm:$0xff] }
 0x2b8   : > { %v3939_v14 = vpop.f32.mrf.mxu0  ;;  %v11876_v22 = vadd.f32 %v14141_v55, %v3577_v23  ;;  %v14142_v49 = vld [vmem:[#allocation116_spill] sm:$0xff] }
 0x2b9   : > { %v4123_v59 = vadd.f32 %v8632_v57, %v3946_v41  ;;  %v3940_v52 = vadd.f32 %v3939_v14, %v3701_v63  ;;  %v4140_v0 = vpop.f32.mrf.mxu1  ;;  %v3570_v57 = vadd.f32 %v11774_v58, %v11739_v7  ;;  %v3733_v58 = vadd.f32 %v11760_v60, %v3535_v15 }
 0x2ba   : > { %v8579_v29 = vpop.f32.mrf.mxu0  ;;  %v3765_v60 = vadd.f32 %v11768_v47, %v3563_v35  ;;  %v3598_v47 = vadd.f32 %v11790_v32, %v11749_v48  ;;  %v11879_v2 = vadd.f32 %v14142_v49, %v3385_v53 }
 0x2bb   : > { %v11830_v37 = vmax.f32 %v4123_v59, 0.0  ;;  %v4117_v51 = vadd.f32 %v4116_v4, %v3940_v52  ;;  %v3958_v61 = vadd.f32 %v8579_v29, %v3725_v20  ;;  %v8641_v34 = vpop.f32.mrf.mxu1  ;;  %v3773_v56 = vadd.f32 %v11766_v10, %v3570_v57 }
 0x2bc   : > { %v3951_v31 = vpop.f32.mrf.mxu0 }
 0x2bd   : > { %v11839_v12 = vand.u32 4294901760, %v11830_v37  ;;  %v11841_v54 = vmax.f32 %v4117_v51, 0.0  ;;  %v4135_v4 = vadd.f32 %v8635_v45, %v3958_v61  ;;  %v3952_v50 = vadd.f32 %v3951_v31, %v3717_v36  ;;  %v4152_v11 = vpop.f32.mrf.mxu1 }
 0x2be   : > { %v8582_v21 = vpop.f32.mrf.mxu0 }
 0x2bf   : > { %v11849_v7 = vsub.f32 %v11830_v37, %v11839_v12  ;;  %v11852_v33 = vand.u32 4294901760, %v11841_v54  ;;  %v11854_v43 = vmax.f32 %v4135_v4, 0.0  ;;  %v4129_v45 = vadd.f32 %v4128_v25, %v3952_v50  ;;  %v8644_v13 = vpop.f32.mrf.mxu1  ;;  %v14150_v50 = vld [vmem:[#allocation112_spill] sm:$0xff] }
 0x2c0   : > { %v3970_v8 = vadd.f32 %v8582_v21, %v3741_v17  ;;  %v3963_v39 = vpop.f32.mrf.mxu0  ;;  %v14149_v17 = vld [vmem:[#allocation74_spill] sm:$0xff]  ;;  %v3805_v23 = vadd.f32 %v14150_v50, %v3598_v47 }
 0x2c1   : > { %14139 = vst [vmem:[#allocation113_spill] sm:$0xff] %v11854_v43  ;;  %v13683_v44 = vand.u32 4294901760, %v11849_v7  ;;  %v11864_v63 = vsub.f32 %v11841_v54, %v11852_v33  ;;  %v11867_v16 = vand.u32 4294901760, %v11854_v43  ;;  %v11869_v40 = vmax.f32 %v4129_v45, 0.0  ;;  %v4164_v5 = vpop.f32.mrf.mxu1  ;;  %8742 = vmatprep.mubr.f32.mxu1 %v11852_v33  ;;  %v14153_v45 = vld [vmem:[#allocation119_spill] sm:$0xff] }
 0x2c2   : > { %v4147_v10 = vadd.f32 %v8638_v9, %v3970_v8  ;;  %v3964_v26 = vadd.f32 %v3963_v39, %v3733_v58  ;;  %v8585_v25 = vpop.f32.mrf.mxu0  ;;  %8743 = vmatmul.mubr.f32.vlgmr.msra.gmra.mxu1 %v11839_v12  ;;  %v14143_v9 = vld [vmem:[#allocation66_spill] sm:$0xff] }
 0x2c3   : > { %14140 = vst [vmem:[#allocation118_spill] sm:$0xff] %v11869_v40  ;;  %v11883_v42 = vsub.f32 %v11854_v43, %v11867_v16  ;;  %v11886_v30 = vand.u32 4294901760, %v11869_v40  ;;  %v3982_v41 = vadd.f32 %v8585_v25, %v3757_v24  ;;  %v11888_v32 = vpop.f32.mrf.mxu1  ;;  %8823 = vmatpush3.msra.mxu1 %v14143_v9  ;;  %v4345_v48 = vsub.f32 %v11849_v7, %v13683_v44 }
 0x2c4   : > { %v11894_v27 = vmax.f32 %v4147_v10, 0.0  ;;  %v4141_v6 = vadd.f32 %v4140_v0, %v3964_v26  ;;  %v3975_v1 = vpop.f32.mrf.mxu0  ;;  %8824 = vmatprep.subr.mxu1 %v14145_v19  ;;  %v13684_v14 = vand.u32 4294901760, %v11864_v63 }
 0x2c5   : > { %v11900_v53 = vsub.f32 %v11869_v40, %v11886_v30  ;;  %v4159_v59 = vadd.f32 %v8641_v34, %v3982_v41  ;;  %v3976_v52 = vadd.f32 %v3975_v1, %v3749_v62  ;;  %8745 = vmatprep.mubr.f32.mxu1 %v11886_v30  ;;  %8825 = vmatpush3.msra.mxu1 %v14145_v19  ;;  %v13678_v29 = vand.u32 4294901760, %v11883_v42  ;;  %v4176_v34 = vpop.f32.mrf.mxu1  ;;  %v14152_v62 = vld [vmem:[#allocation111_spill] sm:$0xff] }
 0x2c6   : > { %14144 = vst [vmem:[#allocation4_spill] sm:$0xff] %v11894_v27  ;;  %v11905_v20 = vand.u32 4294901760, %v11894_v27  ;;  %v11907_v15 = vmax.f32 %v4141_v6, 0.0  ;;  %v8588_v0 = vpop.f32.mrf.mxu0  ;;  %8746 = vmatmul.mubr.f32.gmra.mxu1 %v11867_v16  ;;  %8826 = vmatprep.subr.mxu1 %v14147_v3  ;;  %v4335_v18 = vsub.f32 %v11864_v63, %v13684_v14  ;;  %v11933_v8 = vadd.f32 %v14153_v45, %v14152_v62  ;;  %v14156_v6 = vld [vmem:[#allocation84_spill] sm:$0xff]  ;;  %v14180_v14 = vld [vmem:[#allocation89_spill] sm:$0xff] }
 0x2c7   : > { %v11915_v51 = vmax.f32 %v4159_v59, 0.0  ;;  %v4153_v61 = vadd.f32 %v4152_v11, %v3976_v52  ;;  %v3994_v36 = vadd.f32 %v8588_v0, %v3773_v56  ;;  %8827 = vmatpush3.msra.mxu1 %v14147_v3  ;;  %v13679_v57 = vand.u32 4294901760, %v11900_v53  ;;  %v11949_v10 = vpop.f32.mrf.mxu1 }
 0x2c8   : > { %14146 = vst [vmem:[#allocation46_spill] sm:$0xff] %v11907_v15  ;;  %v11921_v35 = vsub.f32 %v11894_v27, %v11905_v20  ;;  %v11924_v28 = vand.u32 4294901760, %v11907_v15  ;;  %v3987_v31 = vpop.f32.mrf.mxu0  ;;  %8828 = vmatprep.subr.mxu1 %v14149_v17  ;;  %v4336_v4 = vand.u32 4294901760, %v4335_v18  ;;  %v4346_v11 = vand.u32 4294901760, %v4345_v48  ;;  %v14155_v48 = vld [vmem:[#allocation69_spill] sm:$0xff] }
 0x2c9   : > { %14148 = vst [vmem:[#allocation121_spill] sm:$0xff] %v11915_v51  ;;  %v11928_v21 = vmax.f32 %v4153_v61, 0.0  ;;  %v4171_v58 = vadd.f32 %v8644_v13, %v3994_v36  ;;  %v3988_v24 = vadd.f32 %v3987_v31, %v3765_v60  ;;  %8829 = vmatpush3.msra.mxu1 %v14149_v17  ;;  %v11940_v56 = vand.u32 4294901760, %v11915_v51  ;;  %v14158_v18 = vld [vmem:[#allocation73_spill] sm:$0xff]  ;;  %v14160_v31 = vld [vmem:[#allocation2_spill] sm:$0xff] }
 0x2ca   : > { %v11937_v39 = vsub.f32 %v11907_v15, %v11924_v28  ;;  %8686 = vmatprep.mubr.f32.mxu0 %v4336_v4  ;;  %8748 = vmatprep.mubr.f32.mxu1 %v11924_v28  ;;  %v8591_v47 = vpop.f32.mrf.mxu0  ;;  %v4355_v13 = vsub.f32 %v11900_v53, %v13679_v57  ;;  %v4365_v25 = vsub.f32 %v11883_v42, %v13678_v29  ;;  %v13676_v55 = vand.u32 4294901760, %v11921_v35  ;;  %v14159_v61 = vld [vmem:[#allocation53_spill] sm:$0xff] }
 0x2cb   : > { %14151 = vst [vmem:[#allocation7_spill] sm:$0xff] %v11928_v21  ;;  %v11947_v60 = vand.u32 4294901760, %v11928_v21  ;;  %v4165_v26 = vadd.f32 %v4164_v5, %v3988_v24  ;;  %8687 = vmatmul.mubr.f32.vlgmr.msra.gmra.mxu0 %v4346_v11  ;;  %8749 = vmatmul.mubr.f32.gmra.mxu1 %v11905_v20  ;;  %v11956_v49 = vmax.f32 %v4171_v58, 0.0  ;;  %v4006_v41 = vadd.f32 %v8591_v47, %v11859_v46  ;;  %v14161_v11 = vld [vmem:[#allocation65_spill] sm:$0xff] }
 0x2cc   : > { %8767 = vmatpush3.msra.mxu0 %v14155_v48  ;;  %8830 = vmatprep.subr.mxu1 %v14156_v6  ;;  %v3999_v1 = vpop.f32.mrf.mxu0  ;;  %v4356_v59 = vand.u32 4294901760, %v4355_v13  ;;  %v13677_v5 = vand.u32 4294901760, %v11937_v39  ;;  %v3797_v36 = vadd.f32 %v14159_v61, %v11879_v2  ;;  %v3605_v4 = vadd.f32 %v14160_v31, %v11828_v38  ;;  %v4188_v2 = vpop.f32.mrf.mxu1  ;;  %v14162_v13 = vld [vmem:[#allocation76_spill] sm:$0xff] }
 0x2cd   : > { %14154 = vst [vmem:[#allocation56_spill] sm:$0xff] %v11956_v49  ;;  %v11964_v52 = vsub.f32 %v11928_v21, %v11947_v60  ;;  %v11966_v0 = vmax.f32 %v4165_v26, 0.0  ;;  %8768 = vmatprep.subr.mxu0 %v14158_v18  ;;  %8831 = vmatpush3.msra.mxu1 %v14156_v6  ;;  %v4000_v46 = vadd.f32 %v3999_v1, %v11876_v22  ;;  %v4366_v45 = vand.u32 4294901760, %v4365_v25  ;;  %v14192_v21 = vld [vmem:[#allocation102_spill] sm:$0xff] }
 0x2ce   : > { %v11977_v50 = vsub.f32 %v11915_v51, %v11940_v56  ;;  %8769 = vmatpush3.msra.mxu0 %v14158_v18  ;;  %8832 = vmatprep.subr.mxu1 %v14161_v11  ;;  %v8594_v58 = vpop.f32.mrf.mxu0  ;;  %v4375_v24 = vsub.f32 %v11937_v39, %v13677_v5  ;;  %v4183_v62 = vadd.f32 %v11888_v32, %v4006_v41  ;;  %v11990_v47 = vand.u32 4294901760, %v11956_v49  ;;  %v8653_v31 = vpop.f32.mrf.mxu1 }
 0x2cf   : > { %14157 = vst [vmem:[#allocation60_spill] sm:$0xff] %v11966_v0  ;;  %v11985_v22 = vand.u32 4294901760, %v11966_v0  ;;  %v4177_v38 = vadd.f32 %v4176_v34, %v4000_v46  ;;  %8689 = vmatprep.mubr.f32.mxu0 %v4356_v59  ;;  %8751 = vmatprep.mubr.f32.mxu1 %v11947_v60  ;;  %v4018_v26 = vadd.f32 %v8594_v58, %v3805_v23  ;;  %v13680_v32 = vand.u32 4294901760, %v11964_v52  ;;  %v14164_v23 = vld [vmem:[#allocation86_spill] sm:$0xff] }
 0x2d0   : > { %8770 = vmatprep.subr.mxu0 %v14162_v13  ;;  %8833 = vmatpush3.msra.mxu1 %v14161_v11  ;;  %v4011_v48 = vpop.f32.mrf.mxu0  ;;  %v4385_v1 = vsub.f32 %v11921_v35, %v13676_v55  ;;  %v4376_v59 = vand.u32 4294901760, %v4375_v24  ;;  %v13681_v46 = vand.u32 4294901760, %v11977_v50  ;;  %v12008_v61 = vmax.f32 %v4183_v62, 0.0  ;;  %v14167_v24 = vld [vmem:[#allocation72_spill] sm:$0xff]  ;;  %v14168_v62 = vld [vmem:[#allocation115_spill] sm:$0xff]  ;;  %v14169_v55 = vld [vmem:[#allocation117_spill] sm:$0xff] }
 0x2d1   : > { %v12000_v34 = vsub.f32 %v11966_v0, %v11985_v22  ;;  %v12002_v25 = vmax.f32 %v4177_v38, 0.0  ;;  %8690 = vmatmul.mubr.f32.gmra.mxu0 %v4366_v45  ;;  %8752 = vmatmul.mubr.f32.gmra.mxu1 %v11940_v56  ;;  %v4012_v41 = vadd.f32 %v4011_v48, %v3797_v36  ;;  %v14166_v38 = vld [vmem:[#allocation82_spill] sm:$0xff]  ;;  %v4395_v36 = vsub.f32 %v11964_v52, %v13680_v32  ;;  %v14171_v32 = vld [vmem:[#allocation68_spill] sm:$0xff] }
 0x2d2   : > { %8771 = vmatpush3.msra.mxu0 %v14162_v13  ;;  %8834 = vmatprep.subr.mxu1 %v14164_v23  ;;  %v8597_v18 = vpop.f32.mrf.mxu0  ;;  %14165 = vst [vmem:[#allocation50_spill] sm:$0xff] %v12008_v61  ;;  %v3821_v13 = vadd.f32 %v14168_v62, %v11933_v8  ;;  %v4386_v48 = vand.u32 4294901760, %v4385_v1  ;;  %v3813_v5 = vadd.f32 %v14169_v55, %v3605_v4  ;;  %v12038_v4 = vand.u32 4294901760, %v12008_v61 }
 0x2d3   : > { %14163 = vst [vmem:[#allocation10_spill] sm:$0xff] %v12002_v25  ;;  %v12011_v58 = vand.u32 4294901760, %v12002_v25  ;;  %8772 = vmatprep.subr.mxu0 %v14166_v38  ;;  %8835 = vmatpush3.msra.mxu1 %v14164_v23  ;;  %v4189_v45 = vadd.f32 %v4188_v2, %v4012_v41  ;;  %v12025_v57 = vsub.f32 %v11956_v49, %v11990_v47  ;;  %v14187_v49 = vld [vmem:[#allocation100_spill] sm:$0xff]  ;;  %v14193_v51 = vand.u32 4294901760, %v11849_v7 }
 0x2d4   : > { %8773 = vmatpush3.msra.mxu0 %v14166_v38  ;;  %8836 = vmatprep.subr.mxu1 %v14167_v24  ;;  %v4023_v29 = vpop.f32.mrf.mxu0  ;;  %v4195_v2 = vadd.f32 %v11949_v10, %v4018_v26  ;;  %v13682_v38 = vand.u32 4294901760, %v12000_v34  ;;  %v4405_v55 = vsub.f32 %v11977_v50, %v13681_v46  ;;  %v4200_v26 = vpop.f32.mrf.mxu1  ;;  %v4030_v1 = vadd.f32 %v8597_v18, %v3821_v13  ;;  %v14174_v46 = vld [vmem:[#allocation64_spill] sm:$0xff] }
 0x2d5   : > { %v12028_v41 = vmax.f32 %v4189_v45, 0.0  ;;  %8692 = vmatprep.mubr.f32.mxu0 %v4376_v59  ;;  %8754 = vmatprep.mubr.f32.mxu1 %v11985_v22  ;;  %v4024_v8 = vadd.f32 %v4023_v29, %v3813_v5  ;;  %v12042_v10 = vsub.f32 %v12002_v25, %v12011_v58  ;;  %v4396_v59 = vand.u32 4294901760, %v4395_v36  ;;  %v14172_v29 = vld [vmem:[#allocation91_spill] sm:$0xff]  ;;  %v14182_v25 = vld [vmem:[#allocation77_spill] sm:$0xff] }
 0x2d6   : > { %8774 = vmatprep.subr.mxu0 %v14171_v32  ;;  %8837 = vmatpush3.msra.mxu1 %v14167_v24  ;;  %v12047_v45 = vmax.f32 %v4195_v2, 0.0  ;;  %v4415_v18 = vsub.f32 %v12000_v34, %v13682_v38  ;;  %v13685_v36 = vand.u32 4294901760, %v12025_v57  ;;  %v4406_v13 = vand.u32 4294901760, %v4405_v55  ;;  %v14177_v38 = vld [vmem:[#allocation88_spill] sm:$0xff] }
 0x2d7   : > { %14170 = vst [vmem:[#allocation120_spill] sm:$0xff] %v12028_v41  ;;  %8693 = vmatmul.mubr.f32.gmra.mxu0 %v4386_v48  ;;  %8755 = vmatmul.mubr.f32.gmra.mxu1 %v11990_v47  ;;  %v4201_v5 = vadd.f32 %v4200_v26, %v4024_v8  ;;  %v12050_v62 = vand.u32 4294901760, %v12028_v41  ;;  %v12062_v48 = vsub.f32 %v12008_v61, %v12038_v4  ;;  %v13688_v26 = vand.u32 4294901760, %v12042_v10 }
 0x2d8   : > { %8775 = vmatpush3.msra.mxu0 %v14171_v32  ;;  %8838 = vmatprep.subr.mxu1 %v14172_v29  ;;  %14173 = vst [vmem:[#allocation12_spill] sm:$0xff] %v12047_v45  ;;  %v14175_v32 = vld [vmem:[#allocation79_spill] sm:$0xff]  ;;  %v4207_v2 = vadd.f32 %v8653_v31, %v4030_v1  ;;  %v4416_v31 = vand.u32 4294901760, %v4415_v18  ;;  %v4425_v1 = vsub.f32 %v12025_v57, %v13685_v36 }
 0x2d9   : > { %8776 = vmatprep.subr.mxu0 %v14174_v46  ;;  %8839 = vmatpush3.msra.mxu1 %v14172_v29  ;;  %v12064_v8 = vmax.f32 %v4201_v5, 0.0  ;;  %v12075_v55 = vsub.f32 %v12028_v41, %v12050_v62  ;;  %v4435_v18 = vsub.f32 %v12042_v10, %v13688_v26  ;;  %v14183_v41 = vld [vmem:[#allocation90_spill] sm:$0xff] }
 0x2da   : > { %8777 = vmatpush3.msra.mxu0 %v14174_v46  ;;  %8840 = vmatprep.subr.mxu1 %v14175_v32  ;;  %v12071_v46 = vand.u32 4294901760, %v12047_v45  ;;  %v12083_v5 = vmax.f32 %v4207_v2, 0.0  ;;  %v4426_v36 = vand.u32 4294901760, %v4425_v1 }
 0x2db   : > { %14176 = vst [vmem:[#allocation114_spill] sm:$0xff] %v12064_v8  ;;  %8695 = vmatprep.mubr.f32.mxu0 %v4396_v59  ;;  %8757 = vmatprep.mubr.f32.mxu1 %v12011_v58  ;;  %v14178_v59 = vld [vmem:[#allocation81_spill] sm:$0xff]  ;;  %v12086_v44 = vand.u32 4294901760, %v12064_v8  ;;  %v14185_v61 = vand.u32 4294901760, %v12075_v55 }
 0x2dc   : > { %8778 = vmatprep.subr.mxu0 %v14177_v38  ;;  %8841 = vmatpush3.msra.mxu1 %v14175_v32  ;;  %14179 = vst [vmem:[#allocation122_spill] sm:$0xff] %v12083_v5  ;;  %v12098_v2 = vsub.f32 %v12047_v45, %v12071_v46  ;;  %v12105_v26 = vand.u32 4294901760, %v12083_v5  ;;  %v14184_v45 = vld [vmem:[#allocation83_spill] sm:$0xff] }
 0x2dd   : > { %8696 = vmatmul.mubr.f32.gmra.mxu0 %v4406_v13  ;;  %8758 = vmatmul.mubr.f32.gmra.mxu1 %v12038_v4  ;;  %v13692_v13 = vand.u32 4294901760, %v12062_v48 }
 0x2de   : > { %8779 = vmatpush3.msra.mxu0 %v14177_v38  ;;  %8842 = vmatprep.subr.mxu1 %v14178_v59  ;;  %v14181_v38 = vld [vmem:[#allocation107_spill] sm:$0xff] }
 0x2df   : > { %8780 = vmatprep.subr.mxu0 %v14180_v14  ;;  %8843 = vmatpush3.msra.mxu1 %v14178_v59  ;;  %v4445_v1 = vsub.f32 %v12062_v48, %v13692_v13  ;;  %v12127_v13 = vsub.f32 %v12083_v5, %v12105_v26  ;;  %v14189_v5 = vld [vmem:[#allocation87_spill] sm:$0xff] }
 0x2e0   : > { %8781 = vmatpush3.msra.mxu0 %v14180_v14  ;;  %8844 = vmatprep.subr.mxu1 %v14181_v38  ;;  %v12109_v14 = vsub.f32 %v12064_v8, %v12086_v44  ;;  %v4455_v8 = vsub.f32 %v12075_v55, %v14185_v61 }
 0x2e1   : > { %8698 = vmatprep.mubr.f32.mxu0 %v4416_v31  ;;  %8760 = vmatprep.mubr.f32.mxu1 %v12050_v62  ;;  %v4436_v31 = vand.u32 4294901760, %v4435_v18  ;;  %v14186_v18 = vld [vmem:[#allocation96_spill] sm:$0xff] }
 0x2e2   : > { %8782 = vmatprep.subr.mxu0 %v14182_v25  ;;  %8845 = vmatpush3.msra.mxu1 %v14181_v38  ;;  %v13699_v0 = vand.u32 4294901760, %v12109_v14  ;;  %v4456_v61 = vand.u32 4294901760, %v4455_v8  ;;  %v14190_v8 = vand.u32 4294901760, %v11864_v63 }
 0x2e3   : > { %8699 = vmatmul.mubr.f32.gmra.mxu0 %v4426_v36  ;;  %8761 = vmatmul.mubr.f32.gmra.mxu1 %v12071_v46  ;;  %v13696_v36 = vand.u32 4294901760, %v12098_v2 }
 0x2e4   : > { %8783 = vmatpush3.msra.mxu0 %v14182_v25  ;;  %8846 = vmatprep.subr.mxu1 %v14183_v41  ;;  %v4446_v25 = vand.u32 4294901760, %v4445_v1  ;;  %v4475_v1 = vsub.f32 %v12109_v14, %v13699_v0 }
 0x2e5   : > { %8784 = vmatprep.subr.mxu0 %v14184_v45  ;;  %8847 = vmatpush3.msra.mxu1 %v14183_v41 }
 0x2e6   : > { %8785 = vmatpush3.msra.mxu0 %v14184_v45  ;;  %8848 = vmatprep.subr.mxu1 %v14186_v18  ;;  %v4465_v45 = vsub.f32 %v12098_v2, %v13696_v36  ;;  %v14191_v36 = vld [vmem:[#allocation95_spill] sm:$0xff]  ;;  %v4476_v0 = vand.u32 4294901760, %v4475_v1  ;;  %v14198_v1 = vld [vmem:[#allocation108_spill] sm:$0xff] }
 0x2e7   : > { %8701 = vmatprep.mubr.f32.mxu0 %v4436_v31  ;;  %8763 = vmatprep.mubr.f32.mxu1 %v12086_v44  ;;  %v14188_v31 = vld [vmem:[#allocation105_spill] sm:$0xff] }
 0x2e8   : > { %8786 = vmatprep.subr.mxu0 %v14187_v49  ;;  %8849 = vmatpush3.msra.mxu1 %v14186_v18 }
 0x2e9   : > { %8702 = vmatmul.mubr.f32.gmra.mxu0 %v4446_v25  ;;  %8764 = vmatmul.mubr.f32.gmra.mxu1 %v12105_v26  ;;  %v4484_v25 = vand.u32 4294901760, %v12127_v13 }
 0x2ea   : > { %8787 = vmatpush3.msra.mxu0 %v14187_v49  ;;  %8850 = vmatprep.subr.mxu1 %v14188_v31  ;;  %v4466_v49 = vand.u32 4294901760, %v4465_v45  ;;  %v14196_v45 = vld [vmem:[#allocation98_spill] sm:$0xff] }
 0x2eb   : > { %8788 = vmatprep.subr.mxu0 %v14189_v5  ;;  %8851 = vmatpush3.msra.mxu1 %v14188_v31  ;;  %v4485_v15 = vsub.f32 %v12127_v13, %v4484_v25 }
 0x2ec   : > { %8854 = vmatprep.mubr.f32.mxu1 %v14190_v8  ;;  %8789 = vmatpush3.msra.mxu0 %v14189_v5  ;;  %v14194_v5 = vld [vmem:[#allocation103_spill] sm:$0xff] }
 0x2ed   : > { %8852 = vmatprep.subr.mxu1 %v14191_v36  ;;  %8704 = vmatprep.mubr.f32.mxu0 %v4456_v61  ;;  %v14195_v61 = vand.u32 4294901760, %v11900_v53 }
 0x2ee   : > { %8790 = vmatprep.subr.mxu0 %v14192_v21  ;;  %8853 = vmatpush3.msra.mxu1 %v14191_v36 }
 0x2ef   : > { %8705 = vmatmul.mubr.f32.gmra.mxu0 %v4466_v49  ;;  %8855 = vmatmul.mubr.f32.vlgmr.msra.gmra.mxu1 %v14193_v51  ;;  %v4486_v51 = vand.u32 4294901760, %v4485_v15  ;;  %v14201_v15 = vand.u32 4294901760, %v11921_v35 }
 0x2f0   : > { %8791 = vmatpush3.msra.mxu0 %v14192_v21  ;;  %8934 = vmatprep.subr.mxu1 %v14143_v9  ;;  %v14197_v21 = vand.u32 4294901760, %v11883_v42 }
 0x2f1   : > { %8792 = vmatprep.subr.mxu0 %v14194_v5  ;;  %8857 = vmatprep.mubr.f32.mxu1 %v14195_v61 }
 0x2f2   : > { %8935 = vmatpush3.msra.mxu1 %v14143_v9  ;;  %8793 = vmatpush3.msra.mxu0 %v14194_v5  ;;  %v14199_v9 = vand.u32 4294901760, %v11937_v39  ;;  %v7197_v5 = vld [vmem:[%s13474_s4 + $0x148] sm:$0xff] }
 0x2f3   : > { %8936 = vmatprep.subr.mxu1 %v14145_v19  ;;  %8707 = vmatprep.mubr.f32.mxu0 %v4476_v0  ;;  %v14209_v0 = vand.u32 4294901760, %v12025_v57 }
 0x2f4   : > { %8794 = vmatprep.subr.mxu0 %v14196_v45  ;;  %8937 = vmatpush3.msra.mxu1 %v14145_v19  ;;  %v14200_v19 = vld [vmem:[#allocation57_spill] sm:$0xff] }
 0x2f5   : > { %8708 = vmatmul.mubr.f32.gmra.mxu0 %v4486_v51  ;;  %8858 = vmatmul.mubr.f32.gmra.mxu1 %v14197_v21  ;;  %v12383_v21 = vand.u32 4294901760, %v7197_v5 }
 0x2f6   : > { %8795 = vmatpush3.msra.mxu0 %v14196_v45  ;;  %8938 = vmatprep.subr.mxu1 %v14147_v3 }
 0x2f7   : > { %8796 = vmatprep.subr.mxu0 %v14198_v1  ;;  %8798 = vmatprep.mubr.f32.mxu0 %v11864_v63  ;;  %v14202_v63 = vand.u32 4294901760, %v11964_v52  ;;  %14242 = vst [vmem:[#allocation19_spill] sm:$0xff] %v12383_v21 }
 0x2f8   : > { %8860 = vmatprep.mubr.f32.mxu1 %v14199_v9  ;;  %8939 = vmatpush3.msra.mxu1 %v14147_v3  ;;  %v14203_v3 = vld [vmem:[#allocation59_spill] sm:$0xff]  ;;  %v7196_v9 = vld [vmem:[%s13474_s4 + $0x140] sm:$0xff] }
 0x2f9   : > { %8797 = vmatpush3.msra.mxu0 %v14198_v1  ;;  %8940 = vmatprep.subr.mxu1 %v14149_v17 }
 0x2fa   : > { %8878 = vmatprep.subr.mxu0 %v14200_v19  ;;  %8941 = vmatpush3.msra.mxu1 %v14149_v17  ;;  %v14205_v17 = vand.u32 4294901760, %v11977_v50 }
 0x2fb   : > { %8799 = vmatmul.mubr.f32.vlgmr.msra.gmra.mxu0 %v11849_v7  ;;  %8861 = vmatmul.mubr.f32.gmra.mxu1 %v14201_v15  ;;  %v14204_v7 = vld [vmem:[#allocation61_spill] sm:$0xff] }
 0x2fc   : > { %8879 = vmatpush3.msra.mxu0 %v14200_v19  ;;  %8942 = vmatprep.subr.mxu1 %v14156_v6 }
 0x2fd   : > { %8801 = vmatprep.mubr.f32.mxu0 %v11900_v53  ;;  %8863 = vmatprep.mubr.f32.mxu1 %v14202_v63  ;;  %v14206_v53 = vand.u32 4294901760, %v12000_v34  ;;  %v12397_v63 = vsub.f32 %v7197_v5, %v12383_v21 }
 0x2fe   : > { %8880 = vmatprep.subr.mxu0 %v14203_v3  ;;  %8943 = vmatpush3.msra.mxu1 %v14156_v6  ;;  %v14207_v6 = vld [vmem:[#allocation62_spill] sm:$0xff] }
 0x2ff   : > { %8881 = vmatpush3.msra.mxu0 %v14203_v3  ;;  %8944 = vmatprep.subr.mxu1 %v14161_v11  ;;  %14245 = vst [vmem:[#allocation31_spill] sm:$0xff] %v12397_v63  ;;  %v12399_v3 = vand.u32 4294901760, %v7196_v9 }
 0x300   : > { %8882 = vmatprep.subr.mxu0 %v14204_v7  ;;  %8945 = vmatpush3.msra.mxu1 %v14161_v11  ;;  %v14211_v11 = vld [vmem:[#allocation75_spill] sm:$0xff] }
 0x301   : > { %8802 = vmatmul.mubr.f32.gmra.mxu0 %v11883_v42  ;;  %8864 = vmatmul.mubr.f32.gmra.mxu1 %v14205_v17  ;;  %v14208_v42 = vld [vmem:[#allocation70_spill] sm:$0xff]  ;;  %14246 = vst [vmem:[#allocation24_spill] sm:$0xff] %v12399_v3  ;;  %v7195_v17 = vld [vmem:[%s13474_s4 + $0x138] sm:$0xff] }
 0x302   : > { %8883 = vmatpush3.msra.mxu0 %v14204_v7  ;;  %8946 = vmatprep.subr.mxu1 %v14164_v23 }
 0x303   : > { %8804 = vmatprep.mubr.f32.mxu0 %v11937_v39  ;;  %8866 = vmatprep.mubr.f32.mxu1 %v14206_v53  ;;  %v14210_v39 = vand.u32 4294901760, %v12042_v10 }
 0x304   : > { %8884 = vmatprep.subr.mxu0 %v14207_v6  ;;  %8947 = vmatpush3.msra.mxu1 %v14164_v23  ;;  %v14213_v23 = vand.u32 4294901760, %v12062_v48 }
 0x305   : > { %8885 = vmatpush3.msra.mxu0 %v14207_v6  ;;  %8948 = vmatprep.subr.mxu1 %v14167_v24  ;;  %v12411_v6 = vand.u32 4294901760, %v12397_v63 }
 0x306   : > { %8886 = vmatprep.subr.mxu0 %v14208_v42  ;;  %8949 = vmatpush3.msra.mxu1 %v14167_v24  ;;  %v14215_v24 = vld [vmem:[#allocation94_spill] sm:$0xff] }
 0x307   : > { %8805 = vmatmul.mubr.f32.gmra.mxu0 %v11921_v35  ;;  %8867 = vmatmul.mubr.f32.gmra.mxu1 %v14209_v0  ;;  %v14212_v35 = vld [vmem:[#allocation67_spill] sm:$0xff]  ;;  %14247 = vst [vmem:[#allocation34_spill] sm:$0xff] %v12411_v6  ;;  %v12416_v0 = vand.u32 4294901760, %v7195_v17 }
 0x308   : > { %8887 = vmatpush3.msra.mxu0 %v14208_v42  ;;  %8950 = vmatprep.subr.mxu1 %v14172_v29  ;;  %v12414_v42 = vsub.f32 %v7196_v9, %v12399_v3 }
 0x309   : > { %8807 = vmatprep.mubr.f32.mxu0 %v11964_v52  ;;  %8869 = vmatprep.mubr.f32.mxu1 %v14210_v39  ;;  %v14214_v52 = vand.u32 4294901760, %v12075_v55  ;;  %14249 = vst [vmem:[#allocation37_spill] sm:$0xff] %v12416_v0 }
 0x30a   : > { %8888 = vmatprep.subr.mxu0 %v14211_v11  ;;  %8951 = vmatpush3.msra.mxu1 %v14172_v29  ;;  %v14217_v29 = vand.u32 4294901760, %v12098_v2  ;;  %14248 = vst [vmem:[#allocation27_spill] sm:$0xff] %v12414_v42 }
 0x30b   : > { %8889 = vmatpush3.msra.mxu0 %v14211_v11  ;;  %8952 = vmatprep.subr.mxu1 %v14175_v32  ;;  %v7194_v11 = vld [vmem:[%s13474_s4 + $0x130] sm:$0xff] }
 0x30c   : > { %8890 = vmatprep.subr.mxu0 %v14212_v35  ;;  %8953 = vmatpush3.msra.mxu1 %v14175_v32  ;;  %v14219_v32 = vld [vmem:[#allocation109_spill] sm:$0xff] }
 0x30d   : > { %8808 = vmatmul.mubr.f32.gmra.mxu0 %v11977_v50  ;;  %8870 = vmatmul.mubr.f32.gmra.mxu1 %v14213_v23  ;;  %v14216_v50 = vld [vmem:[#allocation97_spill] sm:$0xff]  ;;  %v5881_v23 = vsub.f32 %v12397_v63, %v12411_v6  ;;  %v12584_v6 = vld [vmem:[%s13475_s5 + $0x2] ss:$0 sm:$0xff] }
 0x30e   : > { %8891 = vmatpush3.msra.mxu0 %v14212_v35  ;;  %8954 = vmatprep.subr.mxu1 %v14178_v59 }
 0x30f   : > { %8810 = vmatprep.mubr.f32.mxu0 %v12000_v34  ;;  %8872 = vmatprep.mubr.f32.mxu1 %v14214_v52  ;;  %v14218_v34 = vand.u32 4294901760, %v12109_v14  ;;  %v12426_v52 = vand.u32 4294901760, %v12414_v42 }
 0x310   : > { %8892 = vmatprep.subr.mxu0 %v14215_v24  ;;  %8955 = vmatpush3.msra.mxu1 %v14178_v59  ;;  %v14225_v59 = vld [vmem:[#allocation101_spill] sm:$0xff] }
 0x311   : > { %8893 = vmatpush3.msra.mxu0 %v14215_v24  ;;  %8956 = vmatprep.subr.mxu1 %v14181_v38  ;;  %14250 = vst [vmem:[#allocation30_spill] sm:$0xff] %v12426_v52  ;;  %v12429_v24 = vsub.f32 %v7195_v17, %v12416_v0 }
 0x312   : > { %8894 = vmatprep.subr.mxu0 %v14216_v50  ;;  %8957 = vmatpush3.msra.mxu1 %v14181_v38 }
 0x313   : > { %8811 = vmatmul.mubr.f32.gmra.mxu0 %v12025_v57  ;;  %8873 = vmatmul.mubr.f32.gmra.mxu1 %v14217_v29  ;;  %v14220_v57 = vld [vmem:[#allocation85_spill] sm:$0xff]  ;;  %14251 = vst [vmem:[#allocation40_spill] sm:$0xff] %v12429_v24  ;;  %v7193_v29 = vld [vmem:[%s13474_s4 + $0x128] sm:$0xff] }
 0x314   : > { %8895 = vmatpush3.msra.mxu0 %v14216_v50  ;;  %8958 = vmatprep.subr.mxu1 %v14183_v41  ;;  %v12432_v50 = vand.u32 4294901760, %v7194_v11 }
 0x315   : > { %8813 = vmatprep.mubr.f32.mxu0 %v12042_v10  ;;  %8875 = vmatprep.mubr.f32.mxu1 %v14218_v34  ;;  %v14222_v10 = vld [vmem:[#allocation99_spill] sm:$0xff]  ;;  %v5882_v34 = vand.u32 4294901760, %v5881_v23 }
 0x316   : > { %8896 = vmatprep.subr.mxu0 %v14219_v32  ;;  %8959 = vmatpush3.msra.mxu1 %v14183_v41  ;;  %v14221_v41 = vld [vmem:[#allocation93_spill] sm:$0xff]  ;;  %14252 = vst [vmem:[#allocation33_spill] sm:$0xff] %v12432_v50 }
 0x317   : > { %8897 = vmatpush3.msra.mxu0 %v14219_v32  ;;  %8960 = vmatprep.subr.mxu1 %v14186_v18  ;;  %v5888_v32 = vsub.f32 %v12414_v42, %v12426_v52 }
 0x318   : > { %8898 = vmatprep.subr.mxu0 %v14220_v57  ;;  %8961 = vmatpush3.msra.mxu1 %v14186_v18 }
 0x319   : > { %8814 = vmatmul.mubr.f32.gmra.mxu0 %v12062_v48  ;;  %8876 = vmatmul.mubr.f32.gmra.mxu1 %v4484_v25  ;;  %v14223_v48 = vld [vmem:[#allocation106_spill] sm:$0xff] }
 0x31a   : > { %8899 = vmatpush3.msra.mxu0 %v14220_v57  ;;  %8962 = vmatprep.subr.mxu1 %v14188_v31  ;;  %v12441_v57 = vand.u32 4294901760, %v12429_v24 }
 0x31b   : > { %8816 = vmatprep.mubr.f32.mxu0 %v12075_v55  ;;  %8900 = vmatprep.subr.mxu0 %v14221_v41  ;;  %v14224_v55 = vld [vmem:[#allocation110_spill] sm:$0xff] }
 0x31c   : > { %8963 = vmatpush3.msra.mxu1 %v14188_v31  ;;  %8966 = vmatprep.mubr.f32.mxu1 %v11852_v33  ;;  %14253 = vst [vmem:[#allocation41_spill] sm:$0xff] %v12441_v57 }
 0x31d   : > { %8901 = vmatpush3.msra.mxu0 %v14221_v41  ;;  %8964 = vmatprep.subr.mxu1 %v14191_v36  ;;  %v12443_v41 = vand.u32 4294901760, %v7193_v29 }
 0x31e   : > { %8902 = vmatprep.subr.mxu0 %v14222_v10  ;;  %8965 = vmatpush3.msra.mxu1 %v14191_v36  ;;  %v7198_v36 = vld [vmem:[%s13474_s4 + $0x150] sm:$0xff] }
 0x31f   : > { %8817 = vmatmul.mubr.f32.gmra.mxu0 %v12098_v2  ;;  %8967 = vmatmul.mubr.f32.vlgmr.msra.gmra.mxu1 %v11839_v12  ;;  %v12369_v8 = vand.u32 4294901760, %v7198_v36  ;;  %14254 = vst [vmem:[#allocation36_spill] sm:$0xff] %v12443_v41 }
 0x320   : > { %8903 = vmatpush3.msra.mxu0 %v14222_v10  ;;  %8819 = vmatprep.mubr.f32.mxu0 %v12109_v14  ;;  %v12447_v10 = vsub.f32 %v7194_v11, %v12432_v50 }
 0x321   : > { %8904 = vmatprep.subr.mxu0 %v14223_v48  ;;  %8969 = vmatprep.mubr.f32.mxu1 %v11886_v30  ;;  %14239 = vst [vmem:[#allocation78_spill] sm:$0xff] %v12369_v8  ;;  %v12381_v45 = vsub.f32 %v7198_v36, %v12369_v8 }
 0x322   : > { %8905 = vmatpush3.msra.mxu0 %v14223_v48  ;;  %14255 = vst [vmem:[#allocation45_spill] sm:$0xff] %v12447_v10  ;;  %v7192_v48 = vld [vmem:[%s13474_s4 + $0x120] sm:$0xff] }
 0x323   : > { %8906 = vmatprep.subr.mxu0 %v14224_v55  ;;  %8820 = vmatmul.mubr.f32.gmra.mxu0 %v12127_v13  ;;  %14241 = vst [vmem:[#allocation25_spill] sm:$0xff] %v12381_v45  ;;  %v12394_v15 = vand.u32 4294901760, %v12381_v45 }
 0x324   : > { %8907 = vmatpush3.msra.mxu0 %v14224_v55  ;;  %8970 = vmatmul.mubr.f32.gmra.mxu1 %v11867_v16  ;;  %v5889_v55 = vand.u32 4294901760, %v5888_v32 }
 0x325   : > { %8908 = vmatprep.subr.mxu0 %v14225_v59  ;;  %8910 = vmatprep.mubr.f32.mxu0 %v11852_v33  ;;  %14244 = vst [vmem:[#allocation20_spill] sm:$0xff] %v12394_v15  ;;  %v5874_v53 = vsub.f32 %v12381_v45, %v12394_v15 }
 0x326   : > { %8972 = vmatprep.mubr.f32.mxu1 %v11924_v28  ;;  %8909 = vmatpush3.msra.mxu0 %v14225_v59  ;;  %v5895_v59 = vsub.f32 %v12429_v24, %v12441_v57 }
 0x327   : > { %8911 = vmatmul.mubr.f32.vlgmr.msra.gmra.mxu0 %v11839_v12  ;;  %v7203_v12 = vld [vmem:[%s13474_s4 + $0x178] sm:$0xff]  ;;  %v5875_v35 = vand.u32 4294901760, %v5874_v53 }
 0x328   : > { %8973 = vmatmul.mubr.f32.gmra.mxu1 %v11905_v20  ;;  %8913 = vmatprep.mubr.f32.mxu0 %v11886_v30  ;;  %v12306_v33 = vand.u32 4294901760, %v7203_v12 }
 0x329   : > { %8975 = vmatprep.mubr.f32.mxu1 %v11947_v60 }
 0x32a   : > { %14226 = vst [vmem:[#allocation3_spill] sm:$0xff] %v12306_v33  ;;  %v12312_v30 = vsub.f32 %v7203_v12, %v12306_v33  ;;  %8990 = vmatprep.subr.mxu0 %v12306_v33  ;;  %v12456_v12 = vsub.f32 %v7193_v29, %v12443_v41 }
 0x32b   : > { %8914 = vmatmul.mubr.f32.gmra.mxu0 %v11867_v16  ;;  %v7202_v16 = vld [vmem:[%s13474_s4 + $0x170] sm:$0xff] }
 0x32c   : > { %8976 = vmatmul.mubr.f32.gmra.mxu1 %v11940_v56  ;;  %8916 = vmatprep.mubr.f32.mxu0 %v11924_v28  ;;  %14227 = vst [vmem:[#allocation52_spill] sm:$0xff] %v12312_v30  ;;  %v12322_v28 = vand.u32 4294901760, %v12312_v30  ;;  %14256 = vst [vmem:[#allocation39_spill] sm:$0xff] %v12456_v12 }
 0x32d   : > { %8978 = vmatprep.mubr.f32.mxu1 %v11985_v22  ;;  %8991 = vmatpush3.msra.mxu0 %v12306_v33 }
 0x32e   : > { %14229 = vst [vmem:[#allocation16_spill] sm:$0xff] %v12322_v28 }
 0x32f   : > { %8917 = vmatmul.mubr.f32.gmra.mxu0 %v11905_v20  ;;  %v12314_v20 = vand.u32 4294901760, %v7202_v16 }
 0x330   : > { %8979 = vmatmul.mubr.f32.gmra.mxu1 %v11990_v47  ;;  %8919 = vmatprep.mubr.f32.mxu0 %v11947_v60 }
 0x331   : > { %8981 = vmatprep.mubr.f32.mxu1 %v12011_v58  ;;  %14228 = vst [vmem:[#allocation6_spill] sm:$0xff] %v12314_v20  ;;  %8992 = vmatprep.subr.mxu0 %v12314_v20 }
 0x332   : > { %8993 = vmatpush3.msra.mxu0 %v12314_v20 }
 0x333   : > { %8920 = vmatmul.mubr.f32.gmra.mxu0 %v11940_v56  ;;  %v12325_v56 = vsub.f32 %v7202_v16, %v12314_v20  ;;  %v12458_v16 = vand.u32 4294901760, %v7192_v48 }
 0x334   : > { %8982 = vmatmul.mubr.f32.gmra.mxu1 %v12038_v4  ;;  %8922 = vmatprep.mubr.f32.mxu0 %v11985_v22  ;;  %v7200_v22 = vld [vmem:[%s13474_s4 + $0x160] sm:$0xff] }
 0x335   : > { %8984 = vmatprep.mubr.f32.mxu1 %v12050_v62  ;;  %14230 = vst [vmem:[#allocation55_spill] sm:$0xff] %v12325_v56  ;;  %14257 = vst [vmem:[#allocation43_spill] sm:$0xff] %v12458_v16 }
 0x337   : > { %8923 = vmatmul.mubr.f32.gmra.mxu0 %v11990_v47  ;;  %v5839_v47 = vsub.f32 %v12312_v30, %v12322_v28 }
 0x338   : > { %8985 = vmatmul.mubr.f32.gmra.mxu1 %v12071_v46  ;;  %8925 = vmatprep.mubr.f32.mxu0 %v12011_v58  ;;  %v12337_v58 = vand.u32 4294901760, %v12325_v56 }
 0x339   : > { %8987 = vmatprep.mubr.f32.mxu1 %v12086_v44 }
 0x33a   : > { %14232 = vst [vmem:[#allocation58_spill] sm:$0xff] %v12337_v58  ;;  %v5846_v13 = vsub.f32 %v12325_v56, %v12337_v58 }
 0x33b   : > { %8926 = vmatmul.mubr.f32.gmra.mxu0 %v12038_v4 }
 0x33c   : > { %8988 = vmatmul.mubr.f32.gmra.mxu1 %v12105_v26  ;;  %8928 = vmatprep.mubr.f32.mxu0 %v12050_v62  ;;  %v12342_v62 = vand.u32 4294901760, %v7200_v22  ;;  %v5847_v18 = vand.u32 4294901760, %v5846_v13 }
 0x33e   : > { %14234 = vst [vmem:[#allocation92_spill] sm:$0xff] %v12342_v62  ;;  %v12355_v2 = vsub.f32 %v7200_v22, %v12342_v62  ;;  %v7191_v22 = vld [vmem:[%s13474_s4 + $0x118] sm:$0xff] }
 0x33f   : > { %8929 = vmatmul.mubr.f32.gmra.mxu0 %v12071_v46  ;;  %v5840_v46 = vand.u32 4294901760, %v5839_v47  ;;  %v5896_v47 = vand.u32 4294901760, %v5895_v59  ;;  %v12474_v13 = vand.u32 4294901760, %v7191_v22 }
 0x340   : > { %8931 = vmatprep.mubr.f32.mxu0 %v12086_v44  ;;  %v7201_v44 = vld [vmem:[%s13474_s4 + $0x168] sm:$0xff]  ;;  %14236 = vst [vmem:[#allocation13_spill] sm:$0xff] %v12355_v2  ;;  %v12367_v25 = vand.u32 4294901760, %v12355_v2 }
 0x341   : > { %v12327_v60 = vand.u32 4294901760, %v7201_v44  ;;  %9046 = vmatprep.subr.mxu1 %v5840_v46  ;;  %14261 = vst [vmem:[#allocation8_spill] sm:$0xff] %v12474_v13 }
 0x342   : > { %14238 = vst [vmem:[#allocation21_spill] sm:$0xff] %v12367_v25  ;;  %9047 = vmatpush3.msra.mxu1 %v5840_v46  ;;  %v5860_v51 = vsub.f32 %v12355_v2, %v12367_v25  ;;  %v12472_v46 = vsub.f32 %v7192_v48, %v12458_v16 }
 0x343   : > { %8932 = vmatmul.mubr.f32.gmra.mxu0 %v12105_v26  ;;  %14231 = vst [vmem:[#allocation63_spill] sm:$0xff] %v12327_v60  ;;  %v12340_v4 = vsub.f32 %v7201_v44, %v12327_v60  ;;  %8994 = vmatprep.subr.mxu0 %v12327_v60  ;;  %v7199_v26 = vld [vmem:[%s13474_s4 + $0x158] sm:$0xff]  ;;  %v12462_v44 = vand.u32 4294901760, %v12447_v10 }
 0x344   : > { %8995 = vmatpush3.msra.mxu0 %v12327_v60  ;;  %v12358_v14 = vand.u32 4294901760, %v7199_v26  ;;  %9048 = vmatprep.subr.mxu1 %v5847_v18  ;;  %v5861_v19 = vand.u32 4294901760, %v5860_v51  ;;  %14260 = vst [vmem:[#allocation5_spill] sm:$0xff] %v12472_v46  ;;  %v12486_v5 = vand.u32 4294901760, %v12472_v46 }
 0x345   : > { %14233 = vst [vmem:[#allocation9_spill] sm:$0xff] %v12340_v4  ;;  %v12352_v38 = vand.u32 4294901760, %v12340_v4  ;;  %8996 = vmatprep.subr.mxu0 %v12342_v62  ;;  %9049 = vmatpush3.msra.mxu1 %v5847_v18  ;;  %14258 = vst [vmem:[#allocation44_spill] sm:$0xff] %v12462_v44  ;;  %v5902_v36 = vsub.f32 %v12447_v10, %v12462_v44  ;;  %v7190_v18 = vld [vmem:[%s13474_s4 + $0x110] sm:$0xff] }
 0x346   : > { %14237 = vst [vmem:[#allocation54_spill] sm:$0xff] %v12358_v14  ;;  %8997 = vmatpush3.msra.mxu0 %v12342_v62  ;;  %v12372_v49 = vsub.f32 %v7199_v26, %v12358_v14  ;;  %v12469_v26 = vand.u32 4294901760, %v12456_v12  ;;  %14262 = vst [vmem:[#allocation11_spill] sm:$0xff] %v12486_v5  ;;  %v12491_v51 = vand.u32 4294901760, %v7190_v18  ;;  %v5916_v17 = vsub.f32 %v12472_v46, %v12486_v5 }
 0x347   : > { %14235 = vst [vmem:[#allocation17_spill] sm:$0xff] %v12352_v38  ;;  %v5853_v31 = vsub.f32 %v12340_v4, %v12352_v38  ;;  %8998 = vmatprep.subr.mxu0 %v12358_v14  ;;  %v5903_v9 = vand.u32 4294901760, %v5902_v36 }
 0x348   : > { %14240 = vst [vmem:[#allocation15_spill] sm:$0xff] %v12372_v49  ;;  %8999 = vmatpush3.msra.mxu0 %v12358_v14  ;;  %v12387_v1 = vand.u32 4294901760, %v12372_v49  ;;  %14259 = vst [vmem:[#allocation49_spill] sm:$0xff] %v12469_v26  ;;  %v5917_v23 = vand.u32 4294901760, %v5916_v17 }
 0x349   : > { %v5854_v61 = vand.u32 4294901760, %v5853_v31  ;;  %9000 = vmatprep.subr.mxu0 %v12369_v8  ;;  %v5909_v31 = vsub.f32 %v12456_v12, %v12469_v26  ;;  %14264 = vst [vmem:[#allocation18_spill] sm:$0xff] %v12491_v51 }
 0x34a   : > { %14243 = vst [vmem:[#allocation28_spill] sm:$0xff] %v12387_v1  ;;  %9001 = vmatpush3.msra.mxu0 %v12369_v8  ;;  %v5867_v7 = vsub.f32 %v12372_v49, %v12387_v1 }
 0x34b   : > { %9050 = vmatprep.subr.mxu1 %v5854_v61  ;;  %9002 = vmatprep.subr.mxu0 %v12383_v21 }
 0x34c   : > { %9051 = vmatpush3.msra.mxu1 %v5854_v61  ;;  %9003 = vmatpush3.msra.mxu0 %v12383_v21  ;;  %v5868_v39 = vand.u32 4294901760, %v5867_v7  ;;  %v12489_v61 = vsub.f32 %v7191_v22, %v12474_v13  ;;  %v5910_v7 = vand.u32 4294901760, %v5909_v31 }
 0x34d   : > { %9052 = vmatprep.subr.mxu1 %v5861_v19  ;;  %9004 = vmatprep.subr.mxu0 %v12399_v3 }
 0x34e   : > { %9053 = vmatpush3.msra.mxu1 %v5861_v19  ;;  %9005 = vmatpush3.msra.mxu0 %v12399_v3  ;;  %14263 = vst [vmem:[#allocation14_spill] sm:$0xff] %v12489_v61  ;;  %v7189_v19 = vld [vmem:[%s13474_s4 + $0x108] sm:$0xff]  ;;  %v12501_v53 = vand.u32 4294901760, %v12489_v61 }
 0x34f   : > { %9054 = vmatprep.subr.mxu1 %v5868_v39  ;;  %9006 = vmatprep.subr.mxu0 %v12416_v0  ;;  %v12507_v11 = vand.u32 4294901760, %v7189_v19 }
 0x350   : > { %9055 = vmatpush3.msra.mxu1 %v5868_v39  ;;  %9007 = vmatpush3.msra.mxu0 %v12416_v0  ;;  %14265 = vst [vmem:[#allocation22_spill] sm:$0xff] %v12501_v53  ;;  %v12504_v39 = vsub.f32 %v7190_v18, %v12491_v51  ;;  %v5923_v29 = vsub.f32 %v12489_v61, %v12501_v53 }
 0x351   : > { %9056 = vmatprep.subr.mxu1 %v5875_v35  ;;  %9008 = vmatprep.subr.mxu0 %v12432_v50  ;;  %14267 = vst [vmem:[#allocation26_spill] sm:$0xff] %v12507_v11  ;;  %v12522_v48 = vsub.f32 %v7189_v19, %v12507_v11 }
 0x352   : > { %9057 = vmatpush3.msra.mxu1 %v5875_v35  ;;  %9009 = vmatpush3.msra.mxu0 %v12432_v50  ;;  %14266 = vst [vmem:[#allocation23_spill] sm:$0xff] %v12504_v39  ;;  %v7188_v35 = vld [vmem:[%s13474_s4 + $0x100] sm:$0xff] }
 0x353   : > { %9058 = vmatprep.subr.mxu1 %v5882_v34  ;;  %9010 = vmatprep.subr.mxu0 %v12443_v41  ;;  %v12518_v32 = vand.u32 4294901760, %v7188_v35  ;;  %14270 = vst [vmem:[#allocation35_spill] sm:$0xff] %v12522_v48 }
 0x354   : > { %9059 = vmatpush3.msra.mxu1 %v5882_v34  ;;  %9011 = vmatpush3.msra.mxu0 %v12443_v41  ;;  %v12516_v34 = vand.u32 4294901760, %v12504_v39 }
 0x355   : > { %9060 = vmatprep.subr.mxu1 %v5889_v55  ;;  %9012 = vmatprep.subr.mxu0 %v12458_v16  ;;  %14269 = vst [vmem:[#allocation32_spill] sm:$0xff] %v12518_v32  ;;  %v12528_v22 = vsub.f32 %v7188_v35, %v12518_v32 }
 0x356   : > { %9061 = vmatpush3.msra.mxu1 %v5889_v55  ;;  %9013 = vmatpush3.msra.mxu0 %v12458_v16  ;;  %14268 = vst [vmem:[#allocation29_spill] sm:$0xff] %v12516_v34  ;;  %v5924_v55 = vand.u32 4294901760, %v5923_v29  ;;  %v5930_v59 = vsub.f32 %v12504_v39, %v12516_v34 }
 0x357   : > { %9062 = vmatprep.subr.mxu1 %v5896_v47  ;;  %9014 = vmatprep.subr.mxu0 %v12474_v13  ;;  %14271 = vst [vmem:[#allocation38_spill] sm:$0xff] %v12528_v22  ;;  %v12536_v18 = vand.u32 4294901760, %v12528_v22 }
 0x358   : > { %9063 = vmatpush3.msra.mxu1 %v5896_v47  ;;  %9015 = vmatpush3.msra.mxu0 %v12474_v13  ;;  %v12532_v47 = vand.u32 4294901760, %v12522_v48  ;;  %v5931_v36 = vand.u32 4294901760, %v5930_v59 }
 0x359   : > { %9064 = vmatprep.subr.mxu1 %v5903_v9  ;;  %9016 = vmatprep.subr.mxu0 %v12491_v51  ;;  %14273 = vst [vmem:[#allocation47_spill] sm:$0xff] %v12536_v18 }
 0x35a   : > { %9065 = vmatpush3.msra.mxu1 %v5903_v9  ;;  %9017 = vmatpush3.msra.mxu0 %v12491_v51  ;;  %14272 = vst [vmem:[#allocation42_spill] sm:$0xff] %v12532_v47  ;;  %v5937_v31 = vsub.f32 %v12522_v48, %v12532_v47  ;;  %v5944_v9 = vsub.f32 %v12528_v22, %v12536_v18 }
 0x35b   : > { %9066 = vmatprep.subr.mxu1 %v5910_v7  ;;  %9018 = vmatprep.subr.mxu0 %v12507_v11 }
 0x35c   : > { %9067 = vmatpush3.msra.mxu1 %v5910_v7  ;;  %9019 = vmatpush3.msra.mxu0 %v12507_v11  ;;  %v5938_v19 = vand.u32 4294901760, %v5937_v31  ;;  %v5945_v7 = vand.u32 4294901760, %v5944_v9 }
 0x35d   : > { %9068 = vmatprep.subr.mxu1 %v5917_v23  ;;  %9020 = vmatprep.subr.mxu0 %v12518_v32 }
 0x35e   : > { %9069 = vmatpush3.msra.mxu1 %v5917_v23  ;;  %9021 = vmatpush3.msra.mxu0 %v12518_v32 }
 0x35f   : > { %9070 = vmatprep.subr.mxu1 %v5924_v55  ;;  %9102 = vmatprep.subr.mxu0 %v12312_v30 }
 0x360   : > { %9071 = vmatpush3.msra.mxu1 %v5924_v55 }
 0x361   : > { %9072 = vmatprep.subr.mxu1 %v5931_v36 }
 0x362   : > { %9073 = vmatpush3.msra.mxu1 %v5931_v36 }
 0x363   : > { %9074 = vmatprep.subr.mxu1 %v5938_v19 }
 0x364   : > { %9075 = vmatpush3.msra.mxu1 %v5938_v19 }
 0x365   : > { %9076 = vmatprep.subr.mxu1 %v5945_v7 }
 0x366   : > { %9077 = vmatpush3.msra.mxu1 %v5945_v7 }
 0x367   : > { %9158 = vmatprep.subr.mxu1 %v12306_v33 }
 0x382   : > { %v12545_v17 = vpop.f32.mrf.mxu1 }
 0x384   : > { %v12547_v35 = vpop.f32.mrf.mxu1 }
 0x386   : > { %v12549_v23 = vpop.f32.mrf.mxu1 }
 0x388   : > { %v12551_v29 = vpop.f32.mrf.mxu1 }
 0x38b   : > { %v12553_v55 = vpop.f32.mrf.mxu0  ;;  %v12555_v59 = vpop.f32.mrf.mxu1 }
 0x38c   : > { %v4349_v62 = vadd.f32 %v12553_v55, %v12584_v6 }
 0x38d   : > { %v12557_v36 = vpop.f32.mrf.mxu0  ;;  %v12559_v31 = vpop.f32.mrf.mxu1 }
 0x38e   : > { %v4339_v60 = vadd.f32 %v12584_v6, %v12557_v36  ;;  %v4646_v40 = vadd.f32 %v12545_v17, %v4349_v62 }
 0x390   : > { %v4640_v36 = vadd.f32 %v12547_v35, %v4339_v60 }
 0x391   : > { %v12561_v9 = vpop.f32.mrf.mxu0  ;;  %v12563_v19 = vpop.f32.mrf.mxu1 }
 0x392   : > { %v4369_v33 = vadd.f32 %v12561_v9, %v12584_v6 }
 0x393   : > { %v12565_v7 = vpop.f32.mrf.mxu0  ;;  %v12567_v18 = vpop.f32.mrf.mxu1 }
 0x397   : > { %v12569_v47 = vpop.f32.mrf.mxu0  ;;  %v8756_v34 = vpop.f32.mrf.mxu1 }
 0x399   : > { %v12571_v53 = vpop.f32.mrf.mxu0  ;;  %v12573_v5 = vpop.f32.mrf.mxu1 }
 0x39a   : > { %v4379_v55 = vadd.f32 %v12584_v6, %v12571_v53 }
 0x39d   : > { %v12575_v26 = vpop.f32.mrf.mxu0  ;;  %v8759_v44 = vpop.f32.mrf.mxu1 }
 0x39e   : > { %v4409_v43 = vadd.f32 %v12575_v26, %v12584_v6 }
 0x39f   : > { %v12577_v57 = vpop.f32.mrf.mxu0  ;;  %v12579_v52 = vpop.f32.mrf.mxu1 }
 0x3a3   : > { %v8700_v15 = vpop.f32.mrf.mxu0  ;;  %v8762_v1 = vpop.f32.mrf.mxu1 }
 0x3a4   : > { %v4429_v25 = vadd.f32 %v8700_v15, %v12584_v6 }
 0x3a5   : > { %v12587_v38 = vpop.f32.mrf.mxu0  ;;  %v4711_v58 = vpop.f32.mrf.mxu1 }
 0x3a6   : > { %v12589_v28 = vadd.f32 %v8756_v34, %v4429_v25  ;;  %v4419_v53 = vadd.f32 %v12584_v6, %v12587_v38 }
 0x3a9   : > { %v8703_v22 = vpop.f32.mrf.mxu0  ;;  %v8765_v48 = vpop.f32.mrf.mxu1 }
 0x3aa   : > { %v4449_v39 = vadd.f32 %v8703_v22, %v12584_v6 }
 0x3ab   : > { %v12592_v61 = vpop.f32.mrf.mxu0  ;;  %v4723_v32 = vpop.f32.mrf.mxu1 }
 0x3ac   : > { %v12594_v46 = vadd.f32 %v8759_v44, %v4449_v39 }
 0x3af   : > { %v8706_v11 = vpop.f32.mrf.mxu0  ;;  %v12596_v12 = vpop.f32.mrf.mxu1 }
 0x3b0   : > { %v4469_v51 = vadd.f32 %v8706_v11, %v12584_v6 }
 0x3b1   : > { %v4458_v15 = vpop.f32.mrf.mxu0  ;;  %v12599_v10 = vpop.f32.mrf.mxu1 }
 0x3b2   : > { %v4459_v25 = vadd.f32 %v12584_v6, %v4458_v15  ;;  %v12602_v34 = vadd.f32 %v8762_v1, %v4469_v51 }
 0x3b4   : > { %v12604_v13 = vadd.f32 %v4711_v58, %v4459_v25 }
 0x3b5   : > { %v8709_v22 = vpop.f32.mrf.mxu0  ;;  %v12606_v24 = vpop.f32.mrf.mxu1 }
 0x3b6   : > { %v4489_v44 = vadd.f32 %v8709_v22, %v12584_v6 }
 0x3b7   : > { %v4478_v39 = vpop.f32.mrf.mxu0  ;;  %v12609_v16 = vpop.f32.mrf.mxu1 }
 0x3b8   : > { %v4479_v42 = vadd.f32 %v12584_v6, %v4478_v39  ;;  %v12612_v11 = vadd.f32 %v8765_v48, %v4489_v44 }
 0x3ba   : > { %14274 = vst [vmem:[#allocation48_spill] sm:$0xff] %v12612_v11  ;;  %v12614_v41 = vadd.f32 %v4723_v32, %v4479_v42 }
 0x3bb   : > { %v8800_v63 = vpop.f32.mrf.mxu0  ;;  %v12616_v15 = vpop.f32.mrf.mxu1 }
 0x3bc   : > { %14275 = vst [vmem:[#allocation51_spill] sm:$0xff] %v12614_v41  ;;  %v4359_v41 = vadd.f32 %v12584_v6, %v12565_v7  ;;  %v4841_v11 = vadd.f32 %v8800_v63, %v4646_v40  ;;  %v4658_v7 = vadd.f32 %v12549_v23, %v4369_v33  ;;  %v4439_v40 = vadd.f32 %v12584_v6, %v12592_v61 }
 0x3bd   : > { %v4833_v1 = vpop.f32.mrf.mxu0  ;;  %v12618_v58 = vpop.f32.mrf.mxu1  ;;  %v4664_v33 = vadd.f32 %v12559_v31, %v4379_v55 }
 0x3be   : > { %v4652_v62 = vadd.f32 %v12551_v29, %v4359_v41  ;;  %v5036_v41 = vadd.f32 %v12596_v12, %v4841_v11 }
 0x3c1   : > { %v8803_v51 = vpop.f32.mrf.mxu0  ;;  %v12620_v25 = vpop.f32.mrf.mxu1 }
 0x3c2   : > { %v4855_v26 = vadd.f32 %v8803_v51, %v4658_v7 }
 0x3c3   : > { %v4847_v50 = vpop.f32.mrf.mxu0  ;;  %v12622_v22 = vpop.f32.mrf.mxu1 }
 0x3c4   : > { %v4848_v35 = vadd.f32 %v4847_v50, %v4652_v62  ;;  %v4700_v50 = vadd.f32 %v12579_v52, %v4439_v40 }
 0x3c7   : > { %v8806_v45 = vpop.f32.mrf.mxu0  ;;  %v12624_v0 = vpop.f32.mrf.mxu1 }
 0x3c9   : > { %v4861_v39 = vpop.f32.mrf.mxu0  ;;  %v12626_v48 = vpop.f32.mrf.mxu1 }
 0x3cd   : > { %v8809_v42 = vpop.f32.mrf.mxu0  ;;  %v12628_v32 = vpop.f32.mrf.mxu1 }
 0x3cf   : > { %v4875_v44 = vpop.f32.mrf.mxu0  ;;  %v12630_v49 = vpop.f32.mrf.mxu1 }
 0x3d3   : > { %v8812_v3 = vpop.f32.mrf.mxu0  ;;  %v12632_v2 = vpop.f32.mrf.mxu1 }
 0x3d4   : > { %14276 = vst [vmem:[#allocation104_spill] sm:$0xff] %v12632_v2  ;;  %v4834_v2 = vadd.f32 %v4833_v1, %v4640_v36  ;;  %v4862_v36 = vadd.f32 %v4861_v39, %v4664_v33  ;;  %v4897_v11 = vadd.f32 %v8812_v3, %v12589_v28 }
 0x3d5   : > { %v4889_v21 = vpop.f32.mrf.mxu0  ;;  %v12634_v4 = vpop.f32.mrf.mxu1 }
 0x3d6   : > { %14277 = vst [vmem:[#allocation116_spill] sm:$0xff] %v12634_v4  ;;  %v5060_v52 = vadd.f32 %v12618_v58, %v4862_v36  ;;  %v5100_v58 = vadd.f32 %v12624_v0, %v4897_v11 }
 0x3d9   : > { %v8815_v8 = vpop.f32.mrf.mxu0  ;;  %v12636_v56 = vpop.f32.mrf.mxu1 }
 0x3da   : > { %14278 = vst [vmem:[#allocation66_spill] sm:$0xff] %v12636_v56  ;;  %v4389_v56 = vadd.f32 %v12569_v47, %v12584_v6  ;;  %v4399_v47 = vadd.f32 %v12584_v6, %v12577_v57  ;;  %v4682_v57 = vadd.f32 %v12563_v19, %v4409_v43  ;;  %v5028_v6 = vadd.f32 %v12599_v10, %v4834_v2 }
 0x3db   : > { %v4903_v14 = vpop.f32.mrf.mxu0  ;;  %v12638_v30 = vpop.f32.mrf.mxu1  ;;  %v5044_v43 = vadd.f32 %v12609_v16, %v4848_v35 }
 0x3dc   : > { %14279 = vst [vmem:[#allocation71_spill] sm:$0xff] %v12638_v30  ;;  %v4670_v60 = vadd.f32 %v12555_v59, %v4389_v56  ;;  %v4883_v61 = vadd.f32 %v8809_v42, %v4682_v57  ;;  %v4676_v56 = vadd.f32 %v12567_v18, %v4399_v47  ;;  %v4688_v59 = vadd.f32 %v12573_v5, %v4419_v53 }
 0x3dd   : > { %v4904_v62 = vadd.f32 %v4903_v14, %v4700_v50 }
 0x3de   : > { %v4869_v29 = vadd.f32 %v8806_v45, %v4670_v60  ;;  %v5052_v45 = vadd.f32 %v12606_v24, %v4855_v26  ;;  %v4876_v19 = vadd.f32 %v4875_v44, %v4676_v56  ;;  %v4890_v39 = vadd.f32 %v4889_v21, %v4688_v59  ;;  %v14286_v56 = vld [vmem:[#allocation118_spill] sm:$0xff] }
 0x3df   : > { %v8818_v20 = vpop.f32.mrf.mxu0  ;;  %v8968_v27 = vpop.f32.mrf.mxu1  ;;  %v5084_v16 = vadd.f32 %v12620_v25, %v4883_v61 }
 0x3e0   : > { %v5068_v10 = vadd.f32 %v12616_v15, %v4869_v29  ;;  %v4925_v24 = vadd.f32 %v8818_v20, %v12602_v34  ;;  %v5076_v40 = vadd.f32 %v12622_v22, %v4876_v19  ;;  %v5092_v14 = vadd.f32 %v12626_v48, %v4890_v39 }
 0x3e1   : > { %v4917_v30 = vpop.f32.mrf.mxu0  ;;  %v5443_v4 = vpop.f32.mrf.mxu1 }
 0x3e3   : > { %v12656_v9 = vpop.f32.mrf.mxu0 }
 0x3e4   : > { %14280 = vst [vmem:[#allocation80_spill] sm:$0xff] %v12656_v9  ;;  %v8971_v17 = vpop.f32.mrf.mxu1 }
 0x3e5   : > { %v12667_v63 = vpop.f32.mrf.mxu0 }
 0x3e6   : > { %v5455_v23 = vpop.f32.mrf.mxu1 }
 0x3e7   : > { %v8912_v1 = vpop.f32.mrf.mxu0 }
 0x3e8   : > { %v5273_v38 = vadd.f32 %v8912_v1, %v5036_v41  ;;  %v8974_v9 = vpop.f32.mrf.mxu1  ;;  %v14285_v1 = vld [vmem:[#allocation116_spill] sm:$0xff] }
 0x3e9   : > { %v5266_v31 = vpop.f32.mrf.mxu0 }
 0x3ea   : > { %v5450_v51 = vadd.f32 %v8968_v27, %v5273_v38  ;;  %v5267_v55 = vadd.f32 %v5266_v31, %v5028_v6  ;;  %v5467_v12 = vpop.f32.mrf.mxu1  ;;  %v4911_v27 = vadd.f32 %v8815_v8, %v12594_v46  ;;  %v14287_v31 = vld [vmem:[#allocation51_spill] sm:$0xff] }
 0x3eb   : > { %v8915_v2 = vpop.f32.mrf.mxu0  ;;  %v14284_v41 = vld [vmem:[#allocation80_spill] sm:$0xff] }
 0x3ec   : > { %v5538_v18 = vmax.f32 %v5450_v51, 0.0  ;;  %v5444_v42 = vadd.f32 %v5443_v4, %v5267_v55  ;;  %v5285_v5 = vadd.f32 %v8915_v2, %v5052_v45  ;;  %v8977_v7 = vpop.f32.mrf.mxu1  ;;  %v4918_v4 = vadd.f32 %v4917_v30, %v12604_v13  ;;  %v14281_v13 = vld [vmem:[#allocation104_spill] sm:$0xff] }
 0x3ed   : > { %v5278_v47 = vpop.f32.mrf.mxu0  ;;  %v12693_v60 = vadd.f32 %v12628_v32, %v4911_v27  ;;  %v12696_v30 = vadd.f32 %v12630_v49, %v4904_v62  ;;  %v12699_v22 = vadd.f32 %v14281_v13, %v4925_v24  ;;  %v14290_v27 = vld [vmem:[#allocation6_spill] sm:$0xff] }
 0x3ee   : > { %v5554_v28 = vadd.f32 %v5538_v18, %v11830_v37  ;;  %v5537_v21 = vmax.f32 %v5444_v42, 0.0  ;;  %v5462_v3 = vadd.f32 %v8971_v17, %v5285_v5  ;;  %v5279_v44 = vadd.f32 %v5278_v47, %v5044_v43  ;;  %v5479_v15 = vpop.f32.mrf.mxu1 }
 0x3ef   : > { %v8918_v53 = vpop.f32.mrf.mxu0  ;;  %v12712_v36 = vadd.f32 %v14285_v1, %v4918_v4  ;;  %v14292_v4 = vld [vmem:[#allocation63_spill] sm:$0xff] }
 0x3f0   : > { %v12689_v8 = vand.u32 4294901760, %v5554_v28  ;;  %v5553_v20 = vadd.f32 %v5537_v21, %v11841_v54  ;;  %v5540_v46 = vmax.f32 %v5462_v3, 0.0  ;;  %v5456_v34 = vadd.f32 %v5455_v23, %v5279_v44  ;;  %v8980_v37 = vpop.f32.mrf.mxu1  ;;  %v14282_v54 = vld [vmem:[#allocation113_spill] sm:$0xff]  ;;  %v14283_v23 = vld [vmem:[#allocation48_spill] sm:$0xff]  ;;  %v14291_v21 = vld [vmem:[#allocation46_spill] sm:$0xff] }
 0x3f1   : > { %v5297_v25 = vadd.f32 %v8918_v53, %v5068_v10  ;;  %v5290_v17 = vpop.f32.mrf.mxu0  ;;  %v12709_v29 = vadd.f32 %v14284_v41, %v14283_v23  ;;  %v14288_v10 = vld [vmem:[#allocation3_spill] sm:$0xff] }
 0x3f2   : > { %v12702_v0 = vsub.f32 %v5554_v28, %v12689_v8  ;;  %v12704_v48 = vand.u32 4294901760, %v5553_v20  ;;  %v5556_v26 = vadd.f32 %v5540_v46, %v14282_v54  ;;  %v5539_v35 = vmax.f32 %v5456_v34, 0.0  ;;  %v5491_v33 = vpop.f32.mrf.mxu1  ;;  %v14295_v23 = vld [vmem:[#allocation7_spill] sm:$0xff] }
 0x3f3   : > { %v5474_v32 = vadd.f32 %v8974_v9, %v5297_v25  ;;  %v5291_v57 = vadd.f32 %v5290_v17, %v5060_v52  ;;  %v8921_v49 = vpop.f32.mrf.mxu0  ;;  %v12724_v9 = vadd.f32 %v12667_v63, %v14287_v31  ;;  %v14289_v63 = vld [vmem:[#allocation4_spill] sm:$0xff]  ;;  %v14293_v25 = vld [vmem:[#allocation121_spill] sm:$0xff] }
 0x3f4   : > { %v5687_v38 = vand.u32 4294901760, %v12702_v0  ;;  %v12716_v6 = vsub.f32 %v5553_v20, %v12704_v48  ;;  %v12718_v61 = vand.u32 4294901760, %v5556_v26  ;;  %v5555_v59 = vadd.f32 %v5539_v35, %v14286_v56  ;;  %v8983_v50 = vpop.f32.mrf.mxu1  ;;  %9078 = vmatprep.mubr.f32.mxu1 %v12704_v48 }
 0x3f5   : > { %v5542_v51 = vmax.f32 %v5474_v32, 0.0  ;;  %v5468_v55 = vadd.f32 %v5467_v12, %v5291_v57  ;;  %v5309_v45 = vadd.f32 %v8921_v49, %v5084_v16  ;;  %v5302_v43 = vpop.f32.mrf.mxu0  ;;  %9079 = vmatmul.mubr.f32.vlgmr.msra.gmra.mxu1 %v12689_v8 }
 0x3f6   : > { %v5688_v19 = vsub.f32 %v12702_v0, %v5687_v38  ;;  %v12731_v11 = vsub.f32 %v5556_v26, %v12718_v61  ;;  %v12733_v39 = vand.u32 4294901760, %v5555_v59  ;;  %v5303_v2 = vadd.f32 %v5302_v43, %v5076_v40  ;;  %9159 = vmatpush3.msra.mxu1 %v14288_v10  ;;  %v5503_v5 = vpop.f32.mrf.mxu1  ;;  %v14294_v26 = vld [vmem:[#allocation92_spill] sm:$0xff] }
 0x3f7   : > { %v5558_v18 = vadd.f32 %v5542_v51, %v14289_v63  ;;  %v5541_v42 = vmax.f32 %v5468_v55, 0.0  ;;  %v5486_v12 = vadd.f32 %v8977_v7, %v5309_v45  ;;  %v8924_v52 = vpop.f32.mrf.mxu0  ;;  %9160 = vmatprep.subr.mxu1 %v14290_v27  ;;  %v5677_v62 = vand.u32 4294901760, %v12716_v6  ;;  %v14298_v63 = vld [vmem:[#allocation52_spill] sm:$0xff] }
 0x3f8   : > { %v12740_v24 = vsub.f32 %v5555_v59, %v12733_v39  ;;  %v5480_v47 = vadd.f32 %v5479_v15, %v5303_v2  ;;  %v5321_v16 = vadd.f32 %v8924_v52, %v5100_v58  ;;  %9081 = vmatprep.mubr.f32.mxu1 %v12733_v39  ;;  %9161 = vmatpush3.msra.mxu1 %v14290_v27  ;;  %v5689_v28 = vand.u32 4294901760, %v5688_v19  ;;  %v8986_v13 = vpop.f32.mrf.mxu1  ;;  %v14296_v59 = vld [vmem:[#allocation66_spill] sm:$0xff] }
 0x3f9   : > { %v5557_v3 = vadd.f32 %v5541_v42, %v14291_v21  ;;  %v5544_v44 = vmax.f32 %v5486_v12, 0.0  ;;  %v5314_v7 = vpop.f32.mrf.mxu0  ;;  %9082 = vmatmul.mubr.f32.gmra.mxu1 %v12718_v61  ;;  %9162 = vmatprep.subr.mxu1 %v14292_v4  ;;  %v5678_v53 = vsub.f32 %v12716_v6, %v5677_v62  ;;  %v12752_v46 = vand.u32 4294901760, %v5558_v18  ;;  %v14299_v42 = vld [vmem:[#allocation54_spill] sm:$0xff] }
 0x3fa   : > { %v5543_v40 = vmax.f32 %v5480_v47, 0.0  ;;  %v5498_v15 = vadd.f32 %v8980_v37, %v5321_v16  ;;  %v5315_v58 = vadd.f32 %v5314_v7, %v5092_v14  ;;  %9163 = vmatpush3.msra.mxu1 %v14292_v4  ;;  %v5697_v20 = vand.u32 4294901760, %v12740_v24  ;;  %v5515_v19 = vpop.f32.mrf.mxu1  ;;  %v14300_v47 = vld [vmem:[#allocation60_spill] sm:$0xff] }
 0x3fb   : > { %v12754_v34 = vand.u32 4294901760, %v5557_v3  ;;  %v5560_v17 = vadd.f32 %v5544_v44, %v14293_v25  ;;  %v8927_v54 = vpop.f32.mrf.mxu0  ;;  %9164 = vmatprep.subr.mxu1 %v14294_v26  ;;  %v5679_v35 = vand.u32 4294901760, %v5678_v53  ;;  %v5707_v56 = vand.u32 4294901760, %v12731_v11  ;;  %v14303_v53 = vld [vmem:[#allocation78_spill] sm:$0xff] }
 0x3fc   : > { %v5559_v41 = vadd.f32 %v5543_v40, %v14295_v23  ;;  %v5546_v32 = vmax.f32 %v5498_v15, 0.0  ;;  %v5492_v37 = vadd.f32 %v5491_v33, %v5315_v58  ;;  %v5333_v14 = vadd.f32 %v8927_v54, %v12693_v60  ;;  %9165 = vmatpush3.msra.mxu1 %v14294_v26  ;;  %v14297_v60 = vld [vmem:[#allocation56_spill] sm:$0xff]  ;;  %v14304_v23 = vld [vmem:[#allocation9_spill] sm:$0xff] }
 0x3fd   : > { %v12762_v57 = vsub.f32 %v5557_v3, %v12754_v34  ;;  %9022 = vmatprep.mubr.f32.mxu0 %v5679_v35  ;;  %9084 = vmatprep.mubr.f32.mxu1 %v12754_v34  ;;  %v5326_v49 = vpop.f32.mrf.mxu0  ;;  %v5698_v1 = vsub.f32 %v12740_v24, %v5697_v20  ;;  %v5148_v33 = vadd.f32 %v14296_v59, %v12709_v29  ;;  %v14306_v59 = vld [vmem:[#allocation10_spill] sm:$0xff] }
 0x3fe   : > { %v12771_v31 = vand.u32 4294901760, %v5559_v41  ;;  %v5562_v51 = vadd.f32 %v5546_v32, %v14297_v60  ;;  %v5545_v55 = vmax.f32 %v5492_v37, 0.0  ;;  %v5510_v45 = vadd.f32 %v8983_v50, %v5333_v14  ;;  %9023 = vmatmul.mubr.f32.vlgmr.msra.gmra.mxu0 %v5689_v28  ;;  %9085 = vmatmul.mubr.f32.gmra.mxu1 %v12752_v46 }
 0x3ff   : > { %v12776_v43 = vsub.f32 %v5558_v18, %v12752_v46  ;;  %v5327_v2 = vadd.f32 %v5326_v49, %v12696_v30  ;;  %9103 = vmatpush3.msra.mxu0 %v14298_v63  ;;  %9166 = vmatprep.subr.mxu1 %v14299_v42  ;;  %v8930_v29 = vpop.f32.mrf.mxu0  ;;  %v5699_v12 = vand.u32 4294901760, %v5698_v1  ;;  %v5708_v52 = vsub.f32 %v12731_v11, %v5707_v56  ;;  %v14301_v18 = vld [vmem:[#allocation55_spill] sm:$0xff]  ;;  %v14305_v49 = vld [vmem:[#allocation50_spill] sm:$0xff] }
 0x400   : > { %v12784_v50 = vand.u32 4294901760, %v5560_v17  ;;  %v5561_v16 = vadd.f32 %v5545_v55, %v14300_v47  ;;  %v5548_v28 = vmax.f32 %v5510_v45, 0.0  ;;  %9104 = vmatprep.subr.mxu0 %v14301_v18  ;;  %9167 = vmatpush3.msra.mxu1 %v14299_v42  ;;  %v14302_v30 = vld [vmem:[#allocation71_spill] sm:$0xff]  ;;  %v12792_v3 = vsub.f32 %v5559_v41, %v12771_v31 }
 0x401   : > { %v5140_v21 = vadd.f32 %v14302_v30, %v12724_v9  ;;  %v5504_v44 = vadd.f32 %v5503_v5, %v5327_v2  ;;  %v5345_v7 = vadd.f32 %v8930_v29, %v12699_v22  ;;  %9105 = vmatpush3.msra.mxu0 %v14301_v18  ;;  %9168 = vmatprep.subr.mxu1 %v14303_v53  ;;  %v5338_v40 = vpop.f32.mrf.mxu0  ;;  %v5717_v15 = vand.u32 4294901760, %v12762_v57  ;;  %v8989_v5 = vpop.f32.mrf.mxu1  ;;  %v14307_v55 = vld [vmem:[#allocation19_spill] sm:$0xff]  ;;  %v14309_v18 = vld [vmem:[#allocation24_spill] sm:$0xff] }
 0x402   : > { %v12798_v58 = vand.u32 4294901760, %v5562_v51  ;;  %v12800_v25 = vand.u32 4294901760, %v5561_v16  ;;  %9025 = vmatprep.mubr.f32.mxu0 %v5699_v12  ;;  %9087 = vmatprep.mubr.f32.mxu1 %v12771_v31  ;;  %v5339_v9 = vadd.f32 %v5338_v40, %v12712_v36  ;;  %v5709_v54 = vand.u32 4294901760, %v5708_v52 }
 0x403   : > { %v5547_v35 = vmax.f32 %v5504_v44, 0.0  ;;  %v5522_v22 = vadd.f32 %v8986_v13, %v5345_v7  ;;  %9106 = vmatprep.subr.mxu0 %v14304_v23  ;;  %9169 = vmatpush3.msra.mxu1 %v14303_v53  ;;  %v8933_v41 = vpop.f32.mrf.mxu0  ;;  %v5718_v32 = vsub.f32 %v12762_v57, %v5717_v15  ;;  %v5727_v37 = vand.u32 4294901760, %v12776_v43  ;;  %v14310_v44 = vld [vmem:[#allocation120_spill] sm:$0xff] }
 0x404   : > { %v12811_v14 = vsub.f32 %v5560_v17, %v12784_v50  ;;  %v5564_v36 = vadd.f32 %v5548_v28, %v14305_v49  ;;  %v5516_v1 = vadd.f32 %v5515_v19, %v5339_v9  ;;  %9026 = vmatmul.mubr.f32.gmra.mxu0 %v5709_v54  ;;  %9088 = vmatmul.mubr.f32.gmra.mxu1 %v12784_v50  ;;  %v14308_v19 = vld [vmem:[#allocation13_spill] sm:$0xff]  ;;  %v5737_v30 = vand.u32 4294901760, %v12792_v3  ;;  %v14311_v9 = vld [vmem:[#allocation15_spill] sm:$0xff] }
 0x405   : > { %v12816_v13 = vsub.f32 %v5561_v16, %v12800_v25  ;;  %v5563_v60 = vadd.f32 %v5547_v35, %v14306_v59  ;;  %9107 = vmatpush3.msra.mxu0 %v14304_v23  ;;  %9170 = vmatprep.subr.mxu1 %v14307_v55  ;;  %v5719_v45 = vand.u32 4294901760, %v5718_v32  ;;  %v5350_v2 = vpop.f32.mrf.mxu0  ;;  %v5728_v17 = vsub.f32 %v12776_v43, %v5727_v37  ;;  %v5527_v16 = vpop.f32.mrf.mxu1  ;;  %v14312_v49 = vld [vmem:[#allocation37_spill] sm:$0xff]  ;;  %v14313_v59 = vld [vmem:[#allocation12_spill] sm:$0xff] }
 0x406   : > { %v5549_v63 = vmax.f32 %v5516_v1, 0.0  ;;  %9108 = vmatprep.subr.mxu0 %v14308_v19  ;;  %9171 = vmatpush3.msra.mxu1 %v14307_v55  ;;  %v5357_v29 = vadd.f32 %v8933_v41, %v5148_v33  ;;  %v5351_v12 = vadd.f32 %v5350_v2, %v5140_v21  ;;  %v12827_v52 = vsub.f32 %v5562_v51, %v12798_v58 }
 0x407   : > { %v12829_v47 = vand.u32 4294901760, %v5563_v60  ;;  %v5550_v28 = vmax.f32 %v5522_v22, 0.0  ;;  %9109 = vmatpush3.msra.mxu0 %v14308_v19  ;;  %9172 = vmatprep.subr.mxu1 %v14309_v18  ;;  %v5729_v21 = vand.u32 4294901760, %v5728_v17  ;;  %v13806_v51 = vand.u32 4294901760, %v12811_v14  ;;  %v14315_v19 = vld [vmem:[#allocation33_spill] sm:$0xff] }
 0x408   : > { %v5565_v7 = vadd.f32 %v5549_v63, %v14310_v44  ;;  %9028 = vmatprep.mubr.f32.mxu0 %v5719_v45  ;;  %9090 = vmatprep.mubr.f32.mxu1 %v12800_v25  ;;  %v5528_v33 = vadd.f32 %v5527_v16, %v5351_v12  ;;  %v12837_v40 = vand.u32 4294901760, %v5564_v36  ;;  %v5738_v54 = vsub.f32 %v12792_v3, %v5737_v30  ;;  %v14316_v12 = vld [vmem:[#allocation114_spill] sm:$0xff] }
 0x409   : > { %9110 = vmatprep.subr.mxu0 %v14311_v9  ;;  %9173 = vmatpush3.msra.mxu1 %v14309_v18  ;;  %v13802_v35 = vand.u32 4294901760, %v12816_v13  ;;  %v12846_v22 = vsub.f32 %v5563_v60, %v12829_v47  ;;  %v5534_v23 = vadd.f32 %v8989_v5, %v5357_v29  ;;  %v5748_v32 = vsub.f32 %v12811_v14, %v13806_v51  ;;  %v14314_v60 = vld [vmem:[#allocation25_spill] sm:$0xff] }
 0x40a   : > { %v5551_v41 = vmax.f32 %v5528_v33, 0.0  ;;  %9029 = vmatmul.mubr.f32.gmra.mxu0 %v5729_v21  ;;  %9091 = vmatmul.mubr.f32.gmra.mxu1 %v12798_v58  ;;  %v5739_v1 = vand.u32 4294901760, %v5738_v54  ;;  %v5566_v45 = vadd.f32 %v5550_v28, %v14313_v59  ;;  %v12855_v2 = vand.u32 4294901760, %v5565_v7  ;;  %v14317_v33 = vld [vmem:[#allocation31_spill] sm:$0xff] }
 0x40b   : > { %9111 = vmatpush3.msra.mxu0 %v14311_v9  ;;  %9174 = vmatprep.subr.mxu1 %v14312_v49  ;;  %v5758_v5 = vsub.f32 %v12816_v13, %v13802_v35  ;;  %v13801_v17 = vand.u32 4294901760, %v12827_v52  ;;  %v12864_v63 = vsub.f32 %v5564_v36, %v12837_v40  ;;  %v5552_v29 = vmax.f32 %v5534_v23, 0.0  ;;  %v14318_v23 = vld [vmem:[#allocation36_spill] sm:$0xff]  ;;  %v14320_v59 = vld [vmem:[#allocation27_spill] sm:$0xff] }
 0x40c   : > { %9112 = vmatprep.subr.mxu0 %v14314_v60  ;;  %9175 = vmatpush3.msra.mxu1 %v14312_v49  ;;  %v5567_v16 = vadd.f32 %v5551_v41, %v14316_v12  ;;  %v5749_v28 = vand.u32 4294901760, %v5748_v32  ;;  %v13799_v44 = vand.u32 4294901760, %v12846_v22  ;;  %v12873_v21 = vand.u32 4294901760, %v5566_v45  ;;  %v14319_v41 = vld [vmem:[#allocation122_spill] sm:$0xff]  ;;  %v14326_v35 = vld [vmem:[#allocation39_spill] sm:$0xff] }
 0x40d   : > { %9113 = vmatpush3.msra.mxu0 %v14314_v60  ;;  %9176 = vmatprep.subr.mxu1 %v14315_v19  ;;  %v12876_v36 = vsub.f32 %v5565_v7, %v12855_v2  ;;  %v5759_v9 = vand.u32 4294901760, %v5758_v5  ;;  %v5768_v54 = vsub.f32 %v12827_v52, %v13801_v17  ;;  %v5568_v32 = vadd.f32 %v5552_v29, %v14319_v41  ;;  %v14321_v5 = vld [vmem:[#allocation43_spill] sm:$0xff] }
 0x40e   : > { %9031 = vmatprep.mubr.f32.mxu0 %v5739_v1  ;;  %9093 = vmatprep.mubr.f32.mxu1 %v12829_v47  ;;  %v12885_v1 = vand.u32 4294901760, %v5567_v16  ;;  %v5778_v7 = vsub.f32 %v12846_v22, %v13799_v44  ;;  %v13800_v60 = vand.u32 4294901760, %v12864_v63  ;;  %v12896_v12 = vsub.f32 %v5566_v45, %v12873_v21 }
 0x40f   : > { %9114 = vmatprep.subr.mxu0 %v14317_v33  ;;  %9177 = vmatpush3.msra.mxu1 %v14315_v19  ;;  %v5769_v29 = vand.u32 4294901760, %v5768_v54  ;;  %v12902_v41 = vand.u32 4294901760, %v5568_v32  ;;  %v14323_v54 = vld [vmem:[#allocation8_spill] sm:$0xff] }
 0x410   : > { %9032 = vmatmul.mubr.f32.gmra.mxu0 %v5749_v28  ;;  %9094 = vmatmul.mubr.f32.gmra.mxu1 %v12837_v40  ;;  %v13803_v28 = vand.u32 4294901760, %v12876_v36  ;;  %v12905_v44 = vsub.f32 %v5567_v16, %v12885_v1  ;;  %v5779_v45 = vand.u32 4294901760, %v5778_v7  ;;  %v14325_v7 = vld [vmem:[#allocation18_spill] sm:$0xff] }
 0x411   : > { %9115 = vmatpush3.msra.mxu0 %v14317_v33  ;;  %9178 = vmatprep.subr.mxu1 %v14318_v23  ;;  %v14322_v33 = vld [vmem:[#allocation40_spill] sm:$0xff] }
 0x412   : > { %9116 = vmatprep.subr.mxu0 %v14320_v59  ;;  %9179 = vmatpush3.msra.mxu1 %v14318_v23  ;;  %v5798_v16 = vsub.f32 %v12876_v36, %v13803_v28  ;;  %v13805_v17 = vand.u32 4294901760, %v12905_v44 }
 0x413   : > { %9117 = vmatpush3.msra.mxu0 %v14320_v59  ;;  %9180 = vmatprep.subr.mxu1 %v14321_v5  ;;  %v14324_v59 = vld [vmem:[#allocation45_spill] sm:$0xff] }
 0x414   : > { %9034 = vmatprep.mubr.f32.mxu0 %v5759_v9  ;;  %9096 = vmatprep.mubr.f32.mxu1 %v12855_v2  ;;  %v5788_v9 = vsub.f32 %v12864_v63, %v13800_v60  ;;  %v12922_v60 = vsub.f32 %v5568_v32, %v12902_v41  ;;  %v5799_v28 = vand.u32 4294901760, %v5798_v16  ;;  %v14327_v32 = vld [vmem:[#allocation26_spill] sm:$0xff]  ;;  %v14329_v16 = vld [vmem:[#allocation32_spill] sm:$0xff] }
 0x415   : > { %9118 = vmatprep.subr.mxu0 %v14322_v33  ;;  %9181 = vmatpush3.msra.mxu1 %v14321_v5 }
 0x416   : > { %9035 = vmatmul.mubr.f32.gmra.mxu0 %v5769_v29  ;;  %9097 = vmatmul.mubr.f32.gmra.mxu1 %v12873_v21  ;;  %v13804_v29 = vand.u32 4294901760, %v12896_v12 }
 0x417   : > { %9119 = vmatpush3.msra.mxu0 %v14322_v33  ;;  %9182 = vmatprep.subr.mxu1 %v14323_v54  ;;  %v5789_v33 = vand.u32 4294901760, %v5788_v9  ;;  %v5818_v9 = vsub.f32 %v12905_v44, %v13805_v17 }
 0x418   : > { %9120 = vmatprep.subr.mxu0 %v14324_v59  ;;  %9183 = vmatpush3.msra.mxu1 %v14323_v54 }
 0x419   : > { %9121 = vmatpush3.msra.mxu0 %v14324_v59  ;;  %9184 = vmatprep.subr.mxu1 %v14325_v7  ;;  %v5808_v59 = vsub.f32 %v12896_v12, %v13804_v29  ;;  %v14330_v29 = vld [vmem:[#allocation14_spill] sm:$0xff]  ;;  %v5819_v17 = vand.u32 4294901760, %v5818_v9 }
 0x41a   : > { %9037 = vmatprep.mubr.f32.mxu0 %v5779_v45  ;;  %9099 = vmatprep.mubr.f32.mxu1 %v12885_v1  ;;  %v14328_v45 = vld [vmem:[#allocation5_spill] sm:$0xff] }
 0x41b   : > { %9122 = vmatprep.subr.mxu0 %v14326_v35  ;;  %9185 = vmatpush3.msra.mxu1 %v14325_v7 }
 0x41c   : > { %9038 = vmatmul.mubr.f32.gmra.mxu0 %v5789_v33  ;;  %9100 = vmatmul.mubr.f32.gmra.mxu1 %v12902_v41  ;;  %v5827_v33 = vand.u32 4294901760, %v12922_v60 }
 0x41d   : > { %9123 = vmatpush3.msra.mxu0 %v14326_v35  ;;  %9186 = vmatprep.subr.mxu1 %v14327_v32  ;;  %v5809_v35 = vand.u32 4294901760, %v5808_v59 }
 0x41e   : > { %9124 = vmatprep.subr.mxu0 %v14328_v45  ;;  %9187 = vmatpush3.msra.mxu1 %v14327_v32  ;;  %v5828_v51 = vsub.f32 %v12922_v60, %v5827_v33 }
 0x41f   : > { %9190 = vmatprep.mubr.f32.mxu1 %v5677_v62  ;;  %9125 = vmatpush3.msra.mxu0 %v14328_v45  ;;  %v14331_v62 = vld [vmem:[#allocation23_spill] sm:$0xff] }
 0x420   : > { %9188 = vmatprep.subr.mxu1 %v14329_v16  ;;  %9040 = vmatprep.mubr.f32.mxu0 %v5799_v28  ;;  %v14332_v28 = vld [vmem:[#allocation35_spill] sm:$0xff] }
 0x421   : > { %9126 = vmatprep.subr.mxu0 %v14330_v29  ;;  %9189 = vmatpush3.msra.mxu1 %v14329_v16 }
 0x422   : > { %9041 = vmatmul.mubr.f32.gmra.mxu0 %v5809_v35  ;;  %9191 = vmatmul.mubr.f32.vlgmr.msra.gmra.mxu1 %v5687_v38  ;;  %v5829_v38 = vand.u32 4294901760, %v5828_v51  ;;  %v14356_v51 = vld [vmem:[#allocation42_spill] sm:$0xff] }
 0x423   : > { %9127 = vmatpush3.msra.mxu0 %v14330_v29  ;;  %9270 = vmatprep.subr.mxu1 %v14288_v10 }
 0x424   : > { %9128 = vmatprep.subr.mxu0 %v14331_v62  ;;  %9193 = vmatprep.mubr.f32.mxu1 %v5697_v20  ;;  %v14333_v20 = vld [vmem:[#allocation38_spill] sm:$0xff] }
 0x425   : > { %9271 = vmatpush3.msra.mxu1 %v14288_v10  ;;  %9129 = vmatpush3.msra.mxu0 %v14331_v62  ;;  %v14334_v10 = vld [vmem:[#allocation16_spill] sm:$0xff] }
 0x426   : > { %9272 = vmatprep.subr.mxu1 %v14290_v27  ;;  %9043 = vmatprep.mubr.f32.mxu0 %v5819_v17 }
 0x427   : > { %9130 = vmatprep.subr.mxu0 %v14332_v28  ;;  %9273 = vmatpush3.msra.mxu1 %v14290_v27  ;;  %v14337_v27 = vand.u32 4294901760, %v12811_v14 }
 0x428   : > { %9044 = vmatmul.mubr.f32.gmra.mxu0 %v5829_v38  ;;  %9194 = vmatmul.mubr.f32.gmra.mxu1 %v5707_v56  ;;  %v14343_v56 = vld [vmem:[#allocation20_spill] sm:$0xff] }
 0x429   : > { %9131 = vmatpush3.msra.mxu0 %v14332_v28  ;;  %9274 = vmatprep.subr.mxu1 %v14292_v4 }
 0x42a   : > { %9132 = vmatprep.subr.mxu0 %v14333_v20  ;;  %9134 = vmatprep.mubr.f32.mxu0 %v12716_v6  ;;  %v14335_v6 = vld [vmem:[#allocation58_spill] sm:$0xff] }
 0x42b   : > { %9196 = vmatprep.mubr.f32.mxu1 %v5717_v15  ;;  %9275 = vmatpush3.msra.mxu1 %v14292_v4  ;;  %v14339_v4 = vld [vmem:[#allocation21_spill] sm:$0xff] }
 0x42c   : > { %9133 = vmatpush3.msra.mxu0 %v14333_v20  ;;  %9276 = vmatprep.subr.mxu1 %v14294_v26  ;;  %v14348_v15 = vld [vmem:[#allocation41_spill] sm:$0xff] }
 0x42d   : > { %9214 = vmatprep.subr.mxu0 %v14334_v10  ;;  %9277 = vmatpush3.msra.mxu1 %v14294_v26  ;;  %v14341_v26 = vand.u32 4294901760, %v12827_v52 }
 0x42e   : > { %9135 = vmatmul.mubr.f32.vlgmr.msra.gmra.mxu0 %v12702_v0  ;;  %9197 = vmatmul.mubr.f32.gmra.mxu1 %v5727_v37  ;;  %v14336_v0 = vld [vmem:[#allocation17_spill] sm:$0xff]  ;;  %v14349_v37 = vand.u32 4294901760, %v12896_v12 }
 0x42f   : > { %9215 = vmatpush3.msra.mxu0 %v14334_v10  ;;  %9278 = vmatprep.subr.mxu1 %v14299_v42 }
 0x430   : > { %9137 = vmatprep.mubr.f32.mxu0 %v12740_v24  ;;  %9199 = vmatprep.mubr.f32.mxu1 %v5737_v30  ;;  %v14338_v24 = vand.u32 4294901760, %v12816_v13  ;;  %v14355_v30 = vld [vmem:[#allocation29_spill] sm:$0xff] }
 0x431   : > { %9216 = vmatprep.subr.mxu0 %v14335_v6  ;;  %9279 = vmatpush3.msra.mxu1 %v14299_v42  ;;  %v14345_v42 = vand.u32 4294901760, %v12864_v63 }
 0x432   : > { %9217 = vmatpush3.msra.mxu0 %v14335_v6  ;;  %9280 = vmatprep.subr.mxu1 %v14303_v53 }
 0x433   : > { %9218 = vmatprep.subr.mxu0 %v14336_v0  ;;  %9281 = vmatpush3.msra.mxu1 %v14303_v53  ;;  %v14347_v53 = vld [vmem:[#allocation30_spill] sm:$0xff] }
 0x434   : > { %9138 = vmatmul.mubr.f32.gmra.mxu0 %v12731_v11  ;;  %9200 = vmatmul.mubr.f32.gmra.mxu1 %v14337_v27  ;;  %v14340_v11 = vld [vmem:[#allocation28_spill] sm:$0xff] }
 0x435   : > { %9219 = vmatpush3.msra.mxu0 %v14336_v0  ;;  %9282 = vmatprep.subr.mxu1 %v14307_v55 }
 0x436   : > { %9140 = vmatprep.mubr.f32.mxu0 %v12762_v57  ;;  %9202 = vmatprep.mubr.f32.mxu1 %v14338_v24  ;;  %v14342_v57 = vand.u32 4294901760, %v12846_v22 }
 0x437   : > { %9220 = vmatprep.subr.mxu0 %v14339_v4  ;;  %9283 = vmatpush3.msra.mxu1 %v14307_v55  ;;  %v14352_v55 = vld [vmem:[#allocation49_spill] sm:$0xff] }
 0x438   : > { %9221 = vmatpush3.msra.mxu0 %v14339_v4  ;;  %9284 = vmatprep.subr.mxu1 %v14309_v18 }
 0x439   : > { %9222 = vmatprep.subr.mxu0 %v14340_v11  ;;  %9285 = vmatpush3.msra.mxu1 %v14309_v18  ;;  %v14354_v18 = vld [vmem:[#allocation22_spill] sm:$0xff] }
 0x43a   : > { %9141 = vmatmul.mubr.f32.gmra.mxu0 %v12776_v43  ;;  %9203 = vmatmul.mubr.f32.gmra.mxu1 %v14341_v26  ;;  %v14344_v43 = vld [vmem:[#allocation34_spill] sm:$0xff] }
 0x43b   : > { %9223 = vmatpush3.msra.mxu0 %v14340_v11  ;;  %9286 = vmatprep.subr.mxu1 %v14312_v49 }
 0x43c   : > { %9143 = vmatprep.mubr.f32.mxu0 %v12792_v3  ;;  %9205 = vmatprep.mubr.f32.mxu1 %v14342_v57  ;;  %v14346_v3 = vand.u32 4294901760, %v12876_v36 }
 0x43d   : > { %9224 = vmatprep.subr.mxu0 %v14343_v56  ;;  %9287 = vmatpush3.msra.mxu1 %v14312_v49 }
 0x43e   : > { %9225 = vmatpush3.msra.mxu0 %v14343_v56  ;;  %9288 = vmatprep.subr.mxu1 %v14315_v19 }
 0x43f   : > { %9226 = vmatprep.subr.mxu0 %v14344_v43  ;;  %9289 = vmatpush3.msra.mxu1 %v14315_v19 }
 0x440   : > { %9144 = vmatmul.mubr.f32.gmra.mxu0 %v12811_v14  ;;  %9206 = vmatmul.mubr.f32.gmra.mxu1 %v14345_v42  ;;  %v14350_v14 = vand.u32 4294901760, %v12905_v44 }
 0x441   : > { %9227 = vmatpush3.msra.mxu0 %v14344_v43  ;;  %9290 = vmatprep.subr.mxu1 %v14318_v23 }
 0x442   : > { %9146 = vmatprep.mubr.f32.mxu0 %v12816_v13  ;;  %9208 = vmatprep.mubr.f32.mxu1 %v14346_v3  ;;  %v14351_v13 = vld [vmem:[#allocation44_spill] sm:$0xff] }
 0x443   : > { %9228 = vmatprep.subr.mxu0 %v14347_v53  ;;  %9291 = vmatpush3.msra.mxu1 %v14318_v23 }
 0x444   : > { %9229 = vmatpush3.msra.mxu0 %v14347_v53  ;;  %9292 = vmatprep.subr.mxu1 %v14321_v5 }
 0x445   : > { %9230 = vmatprep.subr.mxu0 %v14348_v15  ;;  %9293 = vmatpush3.msra.mxu1 %v14321_v5 }
 0x446   : > { %9147 = vmatmul.mubr.f32.gmra.mxu0 %v12827_v52  ;;  %9209 = vmatmul.mubr.f32.gmra.mxu1 %v14349_v37  ;;  %v14353_v52 = vld [vmem:[#allocation11_spill] sm:$0xff] }
 0x447   : > { %9231 = vmatpush3.msra.mxu0 %v14348_v15  ;;  %9294 = vmatprep.subr.mxu1 %v14323_v54 }
 0x448   : > { %9149 = vmatprep.mubr.f32.mxu0 %v12846_v22  ;;  %9211 = vmatprep.mubr.f32.mxu1 %v14350_v14  ;;  %v14357_v22 = vld [vmem:[#allocation47_spill] sm:$0xff]  ;;  %v13185_v14 = vld [vmem:[%s13475_s5 + $0x3] ss:$0 sm:$0xff] }
 0x449   : > { %9232 = vmatprep.subr.mxu0 %v14351_v13  ;;  %9295 = vmatpush3.msra.mxu1 %v14323_v54 }
 0x44a   : > { %9233 = vmatpush3.msra.mxu0 %v14351_v13  ;;  %9296 = vmatprep.subr.mxu1 %v14325_v7 }
 0x44b   : > { %9234 = vmatprep.subr.mxu0 %v14352_v55  ;;  %9297 = vmatpush3.msra.mxu1 %v14325_v7 }
 0x44c   : > { %9150 = vmatmul.mubr.f32.gmra.mxu0 %v12864_v63  ;;  %9212 = vmatmul.mubr.f32.gmra.mxu1 %v5827_v33 }
 0x44d   : > { %9235 = vmatpush3.msra.mxu0 %v14352_v55  ;;  %9298 = vmatprep.subr.mxu1 %v14327_v32 }
 0x44e   : > { %9152 = vmatprep.mubr.f32.mxu0 %v12876_v36  ;;  %9236 = vmatprep.subr.mxu0 %v14353_v52 }
 0x44f   : > { %9299 = vmatpush3.msra.mxu1 %v14327_v32  ;;  %9302 = vmatprep.mubr.f32.mxu1 %v12704_v48 }
 0x450   : > { %9237 = vmatpush3.msra.mxu0 %v14353_v52  ;;  %9300 = vmatprep.subr.mxu1 %v14329_v16 }
 0x451   : > { %9238 = vmatprep.subr.mxu0 %v14354_v18  ;;  %9301 = vmatpush3.msra.mxu1 %v14329_v16 }
 0x452   : > { %9153 = vmatmul.mubr.f32.gmra.mxu0 %v12896_v12  ;;  %9303 = vmatmul.mubr.f32.vlgmr.msra.gmra.mxu1 %v12689_v8 }
 0x453   : > { %9239 = vmatpush3.msra.mxu0 %v14354_v18  ;;  %9155 = vmatprep.mubr.f32.mxu0 %v12905_v44 }
 0x454   : > { %9240 = vmatprep.subr.mxu0 %v14355_v30  ;;  %9305 = vmatprep.mubr.f32.mxu1 %v12733_v39 }
 0x455   : > { %9241 = vmatpush3.msra.mxu0 %v14355_v30 }
 0x456   : > { %9242 = vmatprep.subr.mxu0 %v14356_v51  ;;  %9156 = vmatmul.mubr.f32.gmra.mxu0 %v12922_v60 }
 0x457   : > { %9243 = vmatpush3.msra.mxu0 %v14356_v51  ;;  %9306 = vmatmul.mubr.f32.gmra.mxu1 %v12718_v61 }
 0x458   : > { %9244 = vmatprep.subr.mxu0 %v14357_v22  ;;  %9246 = vmatprep.mubr.f32.mxu0 %v12704_v48 }
 0x459   : > { %9308 = vmatprep.mubr.f32.mxu1 %v12754_v34  ;;  %9245 = vmatpush3.msra.mxu0 %v14357_v22 }
 0x45a   : > { %9247 = vmatmul.mubr.f32.vlgmr.msra.gmra.mxu0 %v12689_v8 }
 0x45b   : > { %9309 = vmatmul.mubr.f32.gmra.mxu1 %v12752_v46  ;;  %9249 = vmatprep.mubr.f32.mxu0 %v12733_v39 }
 0x45c   : > { %9311 = vmatprep.mubr.f32.mxu1 %v12771_v31 }
 0x45e   : > { %9250 = vmatmul.mubr.f32.gmra.mxu0 %v12718_v61 }
 0x45f   : > { %9312 = vmatmul.mubr.f32.gmra.mxu1 %v12784_v50  ;;  %9252 = vmatprep.mubr.f32.mxu0 %v12754_v34 }
 0x460   : > { %9314 = vmatprep.mubr.f32.mxu1 %v12800_v25 }
 0x462   : > { %9253 = vmatmul.mubr.f32.gmra.mxu0 %v12752_v46 }
 0x463   : > { %9315 = vmatmul.mubr.f32.gmra.mxu1 %v12798_v58  ;;  %9255 = vmatprep.mubr.f32.mxu0 %v12771_v31 }
 0x464   : > { %9317 = vmatprep.mubr.f32.mxu1 %v12829_v47 }
 0x466   : > { %9256 = vmatmul.mubr.f32.gmra.mxu0 %v12784_v50 }
 0x467   : > { %9318 = vmatmul.mubr.f32.gmra.mxu1 %v12837_v40  ;;  %9258 = vmatprep.mubr.f32.mxu0 %v12800_v25 }
 0x468   : > { %9320 = vmatprep.mubr.f32.mxu1 %v12855_v2 }
 0x46a   : > { %9259 = vmatmul.mubr.f32.gmra.mxu0 %v12798_v58 }
 0x46b   : > { %9321 = vmatmul.mubr.f32.gmra.mxu1 %v12873_v21  ;;  %9261 = vmatprep.mubr.f32.mxu0 %v12829_v47 }
 0x46c   : > { %9323 = vmatprep.mubr.f32.mxu1 %v12885_v1 }
 0x46e   : > { %9262 = vmatmul.mubr.f32.gmra.mxu0 %v12837_v40 }
 0x46f   : > { %9324 = vmatmul.mubr.f32.gmra.mxu1 %v12902_v41  ;;  %9264 = vmatprep.mubr.f32.mxu0 %v12855_v2 }
 0x472   : > { %9265 = vmatmul.mubr.f32.gmra.mxu0 %v12873_v21 }
 0x473   : > { %9267 = vmatprep.mubr.f32.mxu0 %v12885_v1 }
 0x476   : > { %9268 = vmatmul.mubr.f32.gmra.mxu0 %v12902_v41 }
 0x4b5   : > { %v13098_v8 = vpop.f32.mrf.mxu1 }
 0x4b7   : > { %v13100_v48 = vpop.f32.mrf.mxu1 }
 0x4b9   : > { %v13102_v61 = vpop.f32.mrf.mxu1 }
 0x4bb   : > { %v13104_v39 = vpop.f32.mrf.mxu1 }
 0x4be   : > { %v9024_v46 = vpop.f32.mrf.mxu0  ;;  %v13106_v34 = vpop.f32.mrf.mxu1 }
 0x4bf   : > { %v5692_v30 = vadd.f32 %v9024_v46, %v13185_v14 }
 0x4c0   : > { %v5681_v31 = vpop.f32.mrf.mxu0  ;;  %v13108_v50 = vpop.f32.mrf.mxu1 }
 0x4c1   : > { %v5682_v51 = vadd.f32 %v13185_v14, %v5681_v31 }
 0x4c4   : > { %v9027_v58 = vpop.f32.mrf.mxu0  ;;  %v13110_v25 = vpop.f32.mrf.mxu1 }
 0x4c6   : > { %v5701_v47 = vpop.f32.mrf.mxu0  ;;  %v13112_v40 = vpop.f32.mrf.mxu1 }
 0x4ca   : > { %v9030_v49 = vpop.f32.mrf.mxu0  ;;  %v13114_v2 = vpop.f32.mrf.mxu1 }
 0x4cb   : > { %v5732_v46 = vadd.f32 %v9030_v49, %v13185_v14 }
 0x4cc   : > { %v13116_v17 = vpop.f32.mrf.mxu0  ;;  %v13118_v63 = vpop.f32.mrf.mxu1 }
 0x4cd   : > { %v6013_v49 = vadd.f32 %v13106_v34, %v5732_v46 }
 0x4d0   : > { %v13120_v19 = vpop.f32.mrf.mxu0  ;;  %v13122_v44 = vpop.f32.mrf.mxu1 }
 0x4d2   : > { %v13124_v21 = vpop.f32.mrf.mxu0  ;;  %v13126_v36 = vpop.f32.mrf.mxu1 }
 0x4d6   : > { %v13128_v23 = vpop.f32.mrf.mxu0  ;;  %v13130_v1 = vpop.f32.mrf.mxu1 }
 0x4d8   : > { %v13132_v60 = vpop.f32.mrf.mxu0  ;;  %v13134_v5 = vpop.f32.mrf.mxu1 }
 0x4d9   : > { %14358 = vst [vmem:[#allocation74_spill] sm:$0xff] %v13134_v5  ;;  %v5983_v5 = vadd.f32 %v13100_v48, %v5682_v51  ;;  %v5752_v48 = vadd.f32 %v13120_v19, %v13185_v14  ;;  %v5772_v19 = vadd.f32 %v13128_v23, %v13185_v14 }
 0x4db   : > { %v6025_v34 = vadd.f32 %v13110_v25, %v5752_v48 }
 0x4dc   : > { %v13136_v12 = vpop.f32.mrf.mxu0  ;;  %v13138_v41 = vpop.f32.mrf.mxu1 }
 0x4dd   : > { %14359 = vst [vmem:[#allocation112_spill] sm:$0xff] %v13138_v41 }
 0x4de   : > { %v13140_v54 = vpop.f32.mrf.mxu0  ;;  %v13142_v29 = vpop.f32.mrf.mxu1 }
 0x4df   : > { %14360 = vst [vmem:[#allocation111_spill] sm:$0xff] %v13142_v29  ;;  %v5989_v29 = vadd.f32 %v13098_v8, %v5692_v30 }
 0x4e2   : > { %v13144_v7 = vpop.f32.mrf.mxu0  ;;  %v9192_v59 = vpop.f32.mrf.mxu1 }
 0x4e4   : > { %v13146_v32 = vpop.f32.mrf.mxu0  ;;  %v6370_v45 = vpop.f32.mrf.mxu1 }
 0x4e8   : > { %v13148_v9 = vpop.f32.mrf.mxu0  ;;  %v13150_v33 = vpop.f32.mrf.mxu1 }
 0x4ea   : > { %v13152_v16 = vpop.f32.mrf.mxu0  ;;  %v13154_v35 = vpop.f32.mrf.mxu1 }
 0x4eb   : > { %14361 = vst [vmem:[#allocation119_spill] sm:$0xff] %v13152_v16 }
 0x4ee   : > { %v9136_v62 = vpop.f32.mrf.mxu0  ;;  %v13156_v38 = vpop.f32.mrf.mxu1 }
 0x4f0   : > { %v6176_v28 = vpop.f32.mrf.mxu0  ;;  %v13158_v20 = vpop.f32.mrf.mxu1 }
 0x4f1   : > { %v6177_v31 = vadd.f32 %v6176_v28, %v5983_v5 }
 0x4f3   : > { %v6371_v28 = vadd.f32 %v6370_v45, %v6177_v31 }
 0x4f4   : > { %v9139_v10 = vpop.f32.mrf.mxu0  ;;  %v13160_v6 = vpop.f32.mrf.mxu1 }
 0x4f6   : > { %v6190_v0 = vpop.f32.mrf.mxu0  ;;  %v13162_v27 = vpop.f32.mrf.mxu1 }
 0x4fa   : > { %v9142_v24 = vpop.f32.mrf.mxu0  ;;  %v13164_v4 = vpop.f32.mrf.mxu1 }
 0x4fc   : > { %v6204_v11 = vpop.f32.mrf.mxu0  ;;  %v13166_v26 = vpop.f32.mrf.mxu1 }
 0x500   : > { %v9145_v57 = vpop.f32.mrf.mxu0  ;;  %v13168_v56 = vpop.f32.mrf.mxu1 }
 0x501   : > { %14362 = vst [vmem:[#allocation69_spill] sm:$0xff] %v13168_v56  ;;  %v6184_v56 = vadd.f32 %v9136_v62, %v5989_v29 }
 0x502   : > { %v13170_v43 = vpop.f32.mrf.mxu0  ;;  %v13172_v42 = vpop.f32.mrf.mxu1 }
 0x503   : > { %14363 = vst [vmem:[#allocation84_spill] sm:$0xff] %v13172_v42  ;;  %v5702_v42 = vadd.f32 %v13185_v14, %v5701_v47  ;;  %v6379_v29 = vadd.f32 %v9192_v59, %v6184_v56 }
 0x505   : > { %v5995_v8 = vadd.f32 %v13104_v39, %v5702_v42 }
 0x506   : > { %v13174_v3 = vpop.f32.mrf.mxu0  ;;  %v13176_v53 = vpop.f32.mrf.mxu1 }
 0x507   : > { %14364 = vst [vmem:[#allocation73_spill] sm:$0xff] %v13176_v53  ;;  %v5712_v53 = vadd.f32 %v9027_v58, %v13185_v14  ;;  %v5722_v58 = vadd.f32 %v13185_v14, %v13116_v17  ;;  %v6191_v62 = vadd.f32 %v6190_v0, %v5995_v8  ;;  %v5742_v17 = vadd.f32 %v13185_v14, %v13124_v21 }
 0x508   : > { %v13178_v15 = vpop.f32.mrf.mxu0  ;;  %v13180_v37 = vpop.f32.mrf.mxu1 }
 0x509   : > { %14365 = vst [vmem:[#allocation53_spill] sm:$0xff] %v13180_v37  ;;  %v6007_v39 = vadd.f32 %v13108_v50, %v5722_v58  ;;  %v6387_v45 = vadd.f32 %v13154_v35, %v6191_v62  ;;  %v6019_v58 = vadd.f32 %v13112_v40, %v5742_v17 }
 0x50b   : > { %v6205_v46 = vadd.f32 %v6204_v11, %v6007_v39  ;;  %v6219_v40 = vadd.f32 %v13170_v43, %v6019_v58 }
 0x50c   : > { %v13187_v13 = vpop.f32.mrf.mxu0  ;;  %v13189_v55 = vpop.f32.mrf.mxu1 }
 0x50d   : > { %14366 = vst [vmem:[#allocation2_spill] sm:$0xff] %v13189_v55  ;;  %v6403_v62 = vadd.f32 %v13158_v20, %v6205_v46 }
 0x50e   : > { %v13191_v52 = vpop.f32.mrf.mxu0  ;;  %v13193_v18 = vpop.f32.mrf.mxu1 }
 0x50f   : > { %14367 = vst [vmem:[#allocation65_spill] sm:$0xff] %v13193_v18 }
 0x512   : > { %v13197_v22 = vpop.f32.mrf.mxu0  ;;  %v9304_v37 = vpop.f32.mrf.mxu1 }
 0x513   : > { %14368 = vst [vmem:[#allocation76_spill] sm:$0xff] %v13197_v22  ;;  %v6001_v22 = vadd.f32 %v13102_v61, %v5712_v53  ;;  %v6212_v53 = vadd.f32 %v9142_v24, %v6013_v49 }
 0x514   : > { %v13202_v41 = vpop.f32.mrf.mxu0  ;;  %v6786_v55 = vpop.f32.mrf.mxu1 }
 0x515   : > { %14369 = vst [vmem:[#allocation86_spill] sm:$0xff] %v13202_v41  ;;  %v6198_v30 = vadd.f32 %v9139_v10, %v6001_v22  ;;  %v6411_v35 = vadd.f32 %v13156_v38, %v6212_v53  ;;  %v5782_v38 = vadd.f32 %v13185_v14, %v13140_v54  ;;  %v5812_v54 = vadd.f32 %v13144_v7, %v13185_v14 }
 0x516   : > { %v13205_v18 = vpop.f32.mrf.mxu0 }
 0x517   : > { %v9307_v16 = vpop.f32.mrf.mxu1  ;;  %v6395_v59 = vadd.f32 %v13150_v33, %v6198_v30  ;;  %v5762_v33 = vadd.f32 %v13185_v14, %v13132_v60  ;;  %v6043_v7 = vadd.f32 %v13126_v36, %v5782_v38 }
 0x518   : > { %v13212_v47 = vpop.f32.mrf.mxu0 }
 0x519   : > { %v6798_v41 = vpop.f32.mrf.mxu1  ;;  %v6031_v49 = vadd.f32 %v13118_v63, %v5762_v33  ;;  %v6247_v36 = vadd.f32 %v13191_v52, %v6043_v7  ;;  %v14380_v7 = vld [vmem:[#allocation2_spill] sm:$0xff] }
 0x51a   : > { %v9248_v51 = vpop.f32.mrf.mxu0 }
 0x51b   : > { %v6616_v5 = vadd.f32 %v9248_v51, %v6379_v29  ;;  %v9310_v61 = vpop.f32.mrf.mxu1  ;;  %v6037_v29 = vadd.f32 %v13114_v2, %v5772_v19  ;;  %v6233_v63 = vadd.f32 %v13178_v15, %v6031_v49  ;;  %v14377_v49 = vld [vmem:[#allocation111_spill] sm:$0xff] }
 0x51c   : > { %v6609_v42 = vpop.f32.mrf.mxu0 }
 0x51d   : > { %v6610_v10 = vadd.f32 %v6609_v42, %v6371_v28  ;;  %v6810_v22 = vpop.f32.mrf.mxu1  ;;  %v13221_v56 = vadd.f32 %v9304_v37, %v6616_v5  ;;  %v6226_v37 = vadd.f32 %v9145_v57, %v6025_v34  ;;  %v6419_v42 = vadd.f32 %v13162_v27, %v6219_v40 }
 0x51e   : > { %v9251_v0 = vpop.f32.mrf.mxu0 }
 0x51f   : > { %v6628_v21 = vadd.f32 %v9251_v0, %v6395_v59  ;;  %v9313_v31 = vpop.f32.mrf.mxu1  ;;  %v6883_v50 = vsel %vm350_vm0, %v13221_v56, -inf  ;;  %v13229_v24 = vadd.f32 %v6786_v55, %v6610_v10  ;;  %v5792_v55 = vadd.f32 %v13136_v12, %v13185_v14 }
 0x520   : > { %6884 = vmax.xlane.f32.xlu0 %v6883_v50  ;;  %v6621_v23 = vpop.f32.mrf.mxu0  ;;  %v6427_v2 = vadd.f32 %v13160_v6, %v6226_v37  ;;  %v14371_v50 = vld [vmem:[#allocation76_spill] sm:$0xff]  ;;  %v14372_v37 = vld [vmem:[#allocation74_spill] sm:$0xff] }
 0x521   : > { %v6822_v25 = vpop.f32.mrf.mxu1  ;;  %v6622_v8 = vadd.f32 %v6621_v23, %v6387_v45  ;;  %v6880_v11 = vsel %vm350_vm0, %v13229_v24, -inf  ;;  %v13237_v30 = vadd.f32 %v9307_v16, %v6628_v21  ;;  %v6240_v16 = vadd.f32 %v13174_v3, %v6037_v29  ;;  %v14370_v21 = vld [vmem:[#allocation119_spill] sm:$0xff]  ;;  %v14375_v29 = vld [vmem:[#allocation86_spill] sm:$0xff] }
 0x522   : > { %v9254_v60 = vpop.f32.mrf.mxu0  ;;  %6881 = vmax.xlane.f32.xlu1 %v6880_v11  ;;  %v6049_v3 = vadd.f32 %v13122_v44, %v5792_v55  ;;  %v6435_v45 = vadd.f32 %v13166_v26, %v6233_v63 }
 0x523   : > { %v6640_v57 = vadd.f32 %v9254_v60, %v6411_v35  ;;  %v9316_v48 = vpop.f32.mrf.mxu1  ;;  %v13244_v51 = vadd.f32 %v6798_v41, %v6622_v8  ;;  %v6889_v20 = vsel %vm350_vm0, %v13237_v30, -inf  ;;  %v6443_v44 = vadd.f32 %v13164_v4, %v6240_v16 }
 0x524   : > { %v6633_v12 = vpop.f32.mrf.mxu0  ;;  %v6254_v10 = vadd.f32 %v13187_v13, %v6049_v3 }
 0x525   : > { %v6634_v5 = vadd.f32 %v6633_v12, %v6403_v62  ;;  %v6834_v28 = vpop.f32.mrf.mxu1  ;;  %v6886_v43 = vsel %vm350_vm0, %v13244_v51, -inf  ;;  %v13255_v41 = vadd.f32 %v9310_v61, %v6640_v57  ;;  %v5802_v61 = vadd.f32 %v13185_v14, %v13146_v32  ;;  %v14376_v57 = vld [vmem:[#allocation84_spill] sm:$0xff] }
 0x526   : > { %v9257_v17 = vpop.f32.mrf.mxu0  ;;  %6887 = vmax.xlane.f32.xlu0 %v6886_v43  ;;  %6890 = vmax.xlane.f32.xlu1 %v6889_v20  ;;  %v6061_v32 = vadd.f32 %v13130_v1, %v5812_v54  ;;  %v14373_v1 = vld [vmem:[#allocation69_spill] sm:$0xff]  ;;  %v6451_v62 = vadd.f32 %v14376_v57, %v6247_v36 }
 0x527   : > { %v6652_v6 = vadd.f32 %v9257_v17, %v6427_v2  ;;  %v9319_v39 = vpop.f32.mrf.mxu1  ;;  %v13262_v53 = vadd.f32 %v6810_v22, %v6634_v5  ;;  %v6895_v34 = vsel %vm350_vm0, %v13255_v41, -inf  ;;  %v5832_v22 = vadd.f32 %v13148_v9, %v13185_v14 }
 0x528   : > { %v6645_v59 = vpop.f32.mrf.mxu0  ;;  %v6268_v33 = vadd.f32 %v14371_v50, %v6061_v32  ;;  %v6055_v9 = vadd.f32 %v14372_v37, %v5802_v61  ;;  %v6459_v23 = vadd.f32 %v14373_v1, %v6254_v10  ;;  %v14381_v32 = vld [vmem:[#allocation65_spill] sm:$0xff] }
 0x529   : > { %v6646_v19 = vadd.f32 %v6645_v59, %v6419_v42  ;;  %v6892_v15 = vsel %vm350_vm0, %v13262_v53, -inf  ;;  %v13273_v27 = vadd.f32 %v9313_v31, %v6652_v6  ;;  %v6846_v13 = vpop.f32.mrf.mxu1  ;;  %v5822_v31 = vadd.f32 %v13185_v14, %v14370_v21  ;;  %v14379_v6 = vld [vmem:[#allocation53_spill] sm:$0xff] }
 0x52a   : > { %v9260_v0 = vpop.f32.mrf.mxu0  ;;  %6893 = vmax.xlane.f32.xlu0 %v6892_v15  ;;  %6896 = vmax.xlane.f32.xlu1 %v6895_v34  ;;  %v6261_v60 = vadd.f32 %v14375_v29, %v6055_v9 }
 0x52b   : > { %v6664_v4 = vadd.f32 %v9260_v0, %v6443_v44  ;;  %v13280_v46 = vadd.f32 %v6822_v25, %v6646_v19  ;;  %v6901_v52 = vsel %vm350_vm0, %v13273_v27, -inf  ;;  %v14374_v25 = vld [vmem:[#allocation112_spill] sm:$0xff]  ;;  %v9322_v55 = vpop.f32.mrf.mxu1  ;;  %v6067_v12 = vadd.f32 %v14377_v49, %v5822_v31 }
 0x52c   : > { %v6657_v58 = vpop.f32.mrf.mxu0  ;;  %v6073_v11 = vadd.f32 %v14374_v25, %v5832_v22  ;;  %v6467_v42 = vadd.f32 %v14379_v6, %v6261_v60 }
 0x52d   : > { %v6658_v8 = vadd.f32 %v6657_v58, %v6435_v45  ;;  %v6898_v35 = vsel %vm350_vm0, %v13280_v46, -inf  ;;  %v13291_v26 = vadd.f32 %v9316_v48, %v6664_v4  ;;  %v14378_v48 = vld [vmem:[#allocation73_spill] sm:$0xff]  ;;  %v6858_v17 = vpop.f32.mrf.mxu1 }
 0x52e   : > { %v9263_v14 = vpop.f32.mrf.mxu0  ;;  %6899 = vmax.xlane.f32.xlu0 %v6898_v35  ;;  %6902 = vmax.xlane.f32.xlu1 %v6901_v52  ;;  %v6282_v16 = vadd.f32 %v13205_v18, %v6073_v11  ;;  %v6475_v5 = vadd.f32 %v14378_v48, %v6268_v33  ;;  %v6275_v18 = vadd.f32 %v13212_v47, %v6067_v12 }
 0x52f   : > { %v6676_v40 = vadd.f32 %v9263_v14, %v6459_v23  ;;  %v13296_v38 = vadd.f32 %v6834_v28, %v6658_v8  ;;  %v6907_v54 = vsel %vm350_vm0, %v13291_v26, -inf  ;;  %v9325_v34 = vpop.f32.mrf.mxu1 }
 0x530   : > { %v6669_v2 = vpop.f32.mrf.mxu0  ;;  %v6491_v59 = vadd.f32 %v14380_v7, %v6282_v16 }
 0x531   : > { %v6670_v43 = vadd.f32 %v6669_v2, %v6451_v62  ;;  %v6904_v20 = vsel %vm350_vm0, %v13296_v38, -inf  ;;  %v13305_v3 = vadd.f32 %v9319_v39, %v6676_v40  ;;  %v6870_v50 = vpop.f32.mrf.mxu1 }
 0x532   : > { %v9266_v63 = vpop.f32.mrf.mxu0  ;;  %6905 = vmax.xlane.f32.xlu0 %v6904_v20  ;;  %6908 = vmax.xlane.f32.xlu1 %v6907_v54 }
 0x533   : > { %v6688_v28 = vadd.f32 %v9266_v63, %v6475_v5  ;;  %v13309_v61 = vadd.f32 %v6846_v13, %v6670_v43  ;;  %v6913_v39 = vsel %vm350_vm0, %v13305_v3, -inf  ;;  %v6483_v13 = vadd.f32 %v14381_v32, %v6275_v18 }
 0x534   : > { %v6681_v10 = vpop.f32.mrf.mxu0 }
 0x535   : > { %v6682_v44 = vadd.f32 %v6681_v10, %v6467_v42  ;;  %v6910_v19 = vsel %vm350_vm0, %v13309_v61, -inf  ;;  %v13316_v15 = vadd.f32 %v9322_v55, %v6688_v28 }
 0x536   : > { %v9269_v22 = vpop.f32.mrf.mxu0  ;;  %6911 = vmax.xlane.f32.xlu0 %v6910_v19  ;;  %6914 = vmax.xlane.f32.xlu1 %v6913_v39 }
 0x537   : > { %v6700_v47 = vadd.f32 %v9269_v22, %v6491_v59  ;;  %v13319_v0 = vadd.f32 %v6858_v17, %v6682_v44  ;;  %v6919_v21 = vsel %vm350_vm0, %v13316_v15, -inf }
 0x538   : > { %v6693_v36 = vpop.f32.mrf.mxu0 }
 0x539   : > { %v6694_v4 = vadd.f32 %v6693_v36, %v6483_v13  ;;  %v6916_v45 = vsel %vm350_vm0, %v13319_v0, -inf  ;;  %v13325_v31 = vadd.f32 %v9325_v34, %v6700_v47 }
 0x53a   : > { %6917 = vmax.xlane.f32.xlu0 %v6916_v45  ;;  %6920 = vmax.xlane.f32.xlu1 %v6919_v21 }
 0x53b   : > { %v13327_v33 = vadd.f32 %v6870_v50, %v6694_v4  ;;  %v6925_v9 = vsel %vm350_vm0, %v13325_v31, -inf }
 0x53d   : > { %v6922_v37 = vsel %vm350_vm0, %v13327_v33, -inf }
 0x53e   : > { %6923 = vmax.xlane.f32.xlu0 %v6922_v37  ;;  %6926 = vmax.xlane.f32.xlu1 %v6925_v9 }
 0x5a9   : > { %v6885_v58 = vpop.xlane.xlu0 %6884 }
 0x5aa   : > { %v6929_v1 = vsub.f32 %v13221_v56, %v6885_v58 }
 0x5ab   : > { %v6882_v23 = vpop.xlane.xlu1 %6881 }
 0x5ac   : > { %v6946_v8 = vmul.f32 1.442695, %v6929_v1  ;;  %v6928_v35 = vsub.f32 %v13229_v24, %v6882_v23 }
 0x5ae   : > { %9354 = vpow2.f32 %v6946_v8  ;;  %v6944_v52 = vmul.f32 1.442695, %v6928_v35 }
 0x5af   : > { %v6888_v25 = vpop.xlane.xlu0 %6887  ;;  %v6891_v11 = vpop.xlane.xlu1 %6890 }
 0x5b0   : > { %9356 = vpow2.f32 %v6944_v52  ;;  %v6930_v55 = vsub.f32 %v13244_v51, %v6888_v25  ;;  %v6931_v14 = vsub.f32 %v13237_v30, %v6891_v11 }
 0x5b2   : > { %v6948_v29 = vmul.f32 1.442695, %v6930_v55  ;;  %v6950_v60 = vmul.f32 1.442695, %v6931_v14 }
 0x5b3   : > { %v6894_v40 = vpop.xlane.xlu0 %6893  ;;  %v6897_v57 = vpop.xlane.xlu1 %6896 }
 0x5b4   : > { %9358 = vpow2.f32 %v6948_v29  ;;  %v6932_v56 = vsub.f32 %v13262_v53, %v6894_v40  ;;  %v6933_v62 = vsub.f32 %v13255_v41, %v6897_v57 }
 0x5b5   : > { %9360 = vpow2.f32 %v6950_v60 }
 0x5b6   : > { %v6952_v24 = vmul.f32 1.442695, %v6932_v56  ;;  %v6954_v16 = vmul.f32 1.442695, %v6933_v62 }
 0x5b7   : > { %v6900_v49 = vpop.xlane.xlu0 %6899  ;;  %v6903_v12 = vpop.xlane.xlu1 %6902 }
 0x5b8   : > { %9362 = vpow2.f32 %v6952_v24  ;;  %v6934_v2 = vsub.f32 %v13280_v46, %v6900_v49  ;;  %v6935_v51 = vsub.f32 %v13273_v27, %v6903_v12 }
 0x5b9   : > { %9364 = vpow2.f32 %v6954_v16 }
 0x5ba   : > { %v6956_v30 = vmul.f32 1.442695, %v6934_v2  ;;  %v6958_v48 = vmul.f32 1.442695, %v6935_v51 }
 0x5bb   : > { %v13341_v5 = vpop.eup %9354  ;;  %v6906_v43 = vpop.xlane.xlu0 %6905 }
 0x5bc   : > { %v6909_v20 = vpop.xlane.xlu1 %6908  ;;  %9366 = vpow2.f32 %v6956_v30  ;;  %v6936_v41 = vsub.f32 %v13296_v38, %v6906_v43  ;;  %v6979_v54 = vsel %vm350_vm0, %v13341_v5, 0.0 }
 0x5bd   : > { %v6937_v53 = vsub.f32 %v13291_v26, %v6909_v20  ;;  %v13347_v17 = vpop.eup %9356  ;;  %9368 = vpow2.f32 %v6958_v48  ;;  %6980 = vadd.xlane.f32.xlu1 %v6979_v54 }
 0x5be   : > { %v6960_v27 = vmul.f32 1.442695, %v6936_v41  ;;  %v6976_v63 = vsel %vm350_vm0, %v13347_v17, 0.0 }
 0x5bf   : > { %v6962_v46 = vmul.f32 1.442695, %v6937_v53  ;;  %v6912_v18 = vpop.xlane.xlu0 %6911  ;;  %6977 = vadd.xlane.f32.xlu0 %v6976_v63 }
 0x5c0   : > { %v6915_v28 = vpop.xlane.xlu1 %6914  ;;  %9370 = vpow2.f32 %v6960_v27  ;;  %v6938_v38 = vsub.f32 %v13309_v61, %v6912_v18 }
 0x5c1   : > { %v6939_v26 = vsub.f32 %v13305_v3, %v6915_v28  ;;  %v13353_v6 = vpop.eup %9358  ;;  %9372 = vpow2.f32 %v6962_v46 }
 0x5c2   : > { %v13355_v42 = vpop.eup %9360  ;;  %v6964_v10 = vmul.f32 1.442695, %v6938_v38  ;;  %v6982_v59 = vsel %vm350_vm0, %v13353_v6, 0.0 }
 0x5c3   : > { %v6966_v7 = vmul.f32 1.442695, %v6939_v26  ;;  %v6918_v44 = vpop.xlane.xlu0 %6917  ;;  %6983 = vadd.xlane.f32.xlu0 %v6982_v59  ;;  %v6985_v19 = vsel %vm350_vm0, %v13355_v42, 0.0 }
 0x5c4   : > { %v6921_v39 = vpop.xlane.xlu1 %6920  ;;  %9374 = vpow2.f32 %v6964_v10  ;;  %v6940_v61 = vsub.f32 %v13319_v0, %v6918_v44  ;;  %6986 = vadd.xlane.f32.xlu1 %v6985_v19 }
 0x5c5   : > { %v6941_v3 = vsub.f32 %v13316_v15, %v6921_v39  ;;  %v13363_v34 = vpop.eup %9362  ;;  %9376 = vpow2.f32 %v6966_v7 }
 0x5c6   : > { %v13365_v22 = vpop.eup %9364  ;;  %v6968_v47 = vmul.f32 1.442695, %v6940_v61  ;;  %v6988_v13 = vsel %vm350_vm0, %v13363_v34, 0.0 }
 0x5c7   : > { %v6970_v32 = vmul.f32 1.442695, %v6941_v3  ;;  %v6924_v36 = vpop.xlane.xlu0 %6923  ;;  %6989 = vadd.xlane.f32.xlu0 %v6988_v13  ;;  %v6991_v4 = vsel %vm350_vm0, %v13365_v22, 0.0 }
 0x5c8   : > { %v6927_v45 = vpop.xlane.xlu1 %6926  ;;  %9378 = vpow2.f32 %v6968_v47  ;;  %v6942_v0 = vsub.f32 %v13327_v33, %v6924_v36  ;;  %6992 = vadd.xlane.f32.xlu1 %v6991_v4 }
 0x5c9   : > { %v6943_v15 = vsub.f32 %v13325_v31, %v6927_v45  ;;  %v13373_v21 = vpop.eup %9366  ;;  %9380 = vpow2.f32 %v6970_v32 }
 0x5ca   : > { %v13375_v50 = vpop.eup %9368  ;;  %v6972_v37 = vmul.f32 1.442695, %v6942_v0  ;;  %v6994_v58 = vsel %vm350_vm0, %v13373_v21, 0.0 }
 0x5cb   : > { %v6974_v9 = vmul.f32 1.442695, %v6943_v15  ;;  %6995 = vadd.xlane.f32.xlu0 %v6994_v58  ;;  %v6997_v1 = vsel %vm350_vm0, %v13375_v50, 0.0 }
 0x5cc   : > { %9382 = vpow2.f32 %v6972_v37  ;;  %6998 = vadd.xlane.f32.xlu1 %v6997_v1 }
 0x5cd   : > { %v13381_v33 = vpop.eup %9370  ;;  %9384 = vpow2.f32 %v6974_v9 }
 0x5ce   : > { %v13383_v31 = vpop.eup %9372  ;;  %v7000_v23 = vsel %vm350_vm0, %v13381_v33, 0.0 }
 0x5cf   : > { %7001 = vadd.xlane.f32.xlu0 %v7000_v23  ;;  %v7003_v8 = vsel %vm350_vm0, %v13383_v31, 0.0 }
 0x5d0   : > { %7004 = vadd.xlane.f32.xlu1 %v7003_v8 }
 0x5d1   : > { %v13389_v35 = vpop.eup %9374 }
 0x5d2   : > { %v13391_v52 = vpop.eup %9376  ;;  %v7006_v25 = vsel %vm350_vm0, %v13389_v35, 0.0 }
 0x5d3   : > { %7007 = vadd.xlane.f32.xlu0 %v7006_v25  ;;  %v7009_v11 = vsel %vm350_vm0, %v13391_v52, 0.0 }
 0x5d4   : > { %7010 = vadd.xlane.f32.xlu1 %v7009_v11 }
 0x5d5   : > { %v13397_v55 = vpop.eup %9378 }
 0x5d6   : > { %v13399_v14 = vpop.eup %9380  ;;  %v7012_v29 = vsel %vm350_vm0, %v13397_v55, 0.0 }
 0x5d7   : > { %7013 = vadd.xlane.f32.xlu0 %v7012_v29  ;;  %v7015_v60 = vsel %vm350_vm0, %v13399_v14, 0.0 }
 0x5d8   : > { %7016 = vadd.xlane.f32.xlu1 %v7015_v60 }
 0x5d9   : > { %v13405_v40 = vpop.eup %9382 }
 0x5da   : > { %v13407_v57 = vpop.eup %9384  ;;  %v7018_v56 = vsel %vm350_vm0, %v13405_v40, 0.0 }
 0x5db   : > { %7019 = vadd.xlane.f32.xlu0 %v7018_v56  ;;  %v7021_v62 = vsel %vm350_vm0, %v13407_v57, 0.0 }
 0x5dc   : > { %7022 = vadd.xlane.f32.xlu1 %v7021_v62 }
 0x646   : > { %v6981_v24 = vpop.xlane.xlu1 %6980 }
 0x647   : > { %9386 = vrcp.f32 %v6981_v24 }
 0x648   : > { %v6978_v16 = vpop.xlane.xlu0 %6977 }
 0x649   : > { %9388 = vrcp.f32 %v6978_v16 }
 0x64c   : > { %v6984_v49 = vpop.xlane.xlu0 %6983 }
 0x64d   : > { %9390 = vrcp.f32 %v6984_v49  ;;  %v6987_v12 = vpop.xlane.xlu1 %6986 }
 0x64e   : > { %9392 = vrcp.f32 %v6987_v12 }
 0x650   : > { %v6990_v2 = vpop.xlane.xlu0 %6989 }
 0x651   : > { %9394 = vrcp.f32 %v6990_v2  ;;  %v6993_v51 = vpop.xlane.xlu1 %6992 }
 0x652   : > { %9396 = vrcp.f32 %v6993_v51 }
 0x654   : > { %v9387_v30 = vpop.eup %9386  ;;  %v6996_v48 = vpop.xlane.xlu0 %6995 }
 0x655   : > { %v7041_v43 = vmul.f32 %v9387_v30, %v13341_v5  ;;  %9398 = vrcp.f32 %v6996_v48  ;;  %v6999_v20 = vpop.xlane.xlu1 %6998 }
 0x656   : > { %v9389_v41 = vpop.eup %9388  ;;  %9400 = vrcp.f32 %v6999_v20 }
 0x657   : > { %7057 = vst.msk [vmem:[%s13417_s16 + $0x8] sm:$0xff] %vm350_vm0, %v7041_v43  ;;  %v7040_v53 = vmul.f32 %v9389_v41, %v13347_v17 }
 0x658   : > { %v7002_v54 = vpop.xlane.xlu0 %7001 }
 0x659   : > { %7056 = vst.msk [vmem:[%s13417_s16] sm:$0xff] %vm350_vm0, %v7040_v53  ;;  %9402 = vrcp.f32 %v7002_v54  ;;  %v7005_v27 = vpop.xlane.xlu1 %7004 }
 0x65a   : > { %v9391_v46 = vpop.eup %9390  ;;  %9404 = vrcp.f32 %v7005_v27 }
 0x65b   : > { %v9393_v63 = vpop.eup %9392  ;;  %v7042_v5 = vmul.f32 %v9391_v46, %v13353_v6 }
 0x65c   : > { %v7043_v18 = vmul.f32 %v9393_v63, %v13355_v42  ;;  %v7008_v28 = vpop.xlane.xlu0 %7007 }
 0x65d   : > { %7058 = vst.msk [vmem:[%s13417_s16 + $0x10] sm:$0xff] %vm350_vm0, %v7042_v5  ;;  %9406 = vrcp.f32 %v7008_v28  ;;  %v7011_v38 = vpop.xlane.xlu1 %7010 }
 0x65e   : > { %v9395_v17 = vpop.eup %9394  ;;  %7059 = vst.msk [vmem:[%s13417_s16 + $0x18] sm:$0xff] %vm350_vm0, %v7043_v18  ;;  %9408 = vrcp.f32 %v7011_v38 }
 0x65f   : > { %v9397_v26 = vpop.eup %9396  ;;  %v7044_v10 = vmul.f32 %v9395_v17, %v13363_v34 }
 0x660   : > { %v7045_v7 = vmul.f32 %v9397_v26, %v13365_v22  ;;  %v7014_v6 = vpop.xlane.xlu0 %7013 }
 0x661   : > { %7060 = vst.msk [vmem:[%s13417_s16 + $0x20] sm:$0xff] %vm350_vm0, %v7044_v10  ;;  %9410 = vrcp.f32 %v7014_v6  ;;  %v7017_v42 = vpop.xlane.xlu1 %7016 }
 0x662   : > { %v9399_v59 = vpop.eup %9398  ;;  %7061 = vst.msk [vmem:[%s13417_s16 + $0x28] sm:$0xff] %vm350_vm0, %v7045_v7  ;;  %9412 = vrcp.f32 %v7017_v42 }
 0x663   : > { %v9401_v44 = vpop.eup %9400  ;;  %v7046_v19 = vmul.f32 %v9399_v59, %v13373_v21 }
 0x664   : > { %v7047_v39 = vmul.f32 %v9401_v44, %v13375_v50  ;;  %v7020_v61 = vpop.xlane.xlu0 %7019 }
 0x665   : > { %7062 = vst.msk [vmem:[%s13417_s16 + $0x30] sm:$0xff] %vm350_vm0, %v7046_v19  ;;  %9414 = vrcp.f32 %v7020_v61  ;;  %v7023_v3 = vpop.xlane.xlu1 %7022 }
 0x666   : > { %v9403_v34 = vpop.eup %9402  ;;  %7063 = vst.msk [vmem:[%s13417_s16 + $0x38] sm:$0xff] %vm350_vm0, %v7047_v39  ;;  %9416 = vrcp.f32 %v7023_v3 }
 0x667   : > { %v9405_v22 = vpop.eup %9404  ;;  %v7048_v47 = vmul.f32 %v9403_v34, %v13381_v33 }
 0x668   : > { %v7049_v32 = vmul.f32 %v9405_v22, %v13383_v31 }
 0x669   : > { %7064 = vst.msk [vmem:[%s13417_s16 + $0x40] sm:$0xff] %vm350_vm0, %v7048_v47 }
 0x66a   : > { %v9407_v13 = vpop.eup %9406  ;;  %7065 = vst.msk [vmem:[%s13417_s16 + $0x48] sm:$0xff] %vm350_vm0, %v7049_v32 }
 0x66b   : > { %v9409_v36 = vpop.eup %9408  ;;  %v7050_v4 = vmul.f32 %v9407_v13, %v13389_v35 }
 0x66c   : > { %v7051_v45 = vmul.f32 %v9409_v36, %v13391_v52 }
 0x66d   : > { %7066 = vst.msk [vmem:[%s13417_s16 + $0x50] sm:$0xff] %vm350_vm0, %v7050_v4 }
 0x66e   : > { %v9411_v0 = vpop.eup %9410  ;;  %7067 = vst.msk [vmem:[%s13417_s16 + $0x58] sm:$0xff] %vm350_vm0, %v7051_v45 }
 0x66f   : > { %v9413_v15 = vpop.eup %9412  ;;  %v7052_v21 = vmul.f32 %v9411_v0, %v13397_v55 }
 0x670   : > { %v7053_v50 = vmul.f32 %v9413_v15, %v13399_v14 }
 0x671   : > { %7068 = vst.msk [vmem:[%s13417_s16 + $0x60] sm:$0xff] %vm350_vm0, %v7052_v21 }
 0x672   : > { %v9415_v37 = vpop.eup %9414  ;;  %7069 = vst.msk [vmem:[%s13417_s16 + $0x68] sm:$0xff] %vm350_vm0, %v7053_v50 }
 0x673   : > { %v9417_v9 = vpop.eup %9416  ;;  %v7054_v58 = vmul.f32 %v9415_v37, %v13405_v40 }
 0x674   : > { %v7055_v1 = vmul.f32 %v9417_v9, %v13407_v57 }
 0x675   : > { %7070 = vst.msk [vmem:[%s13417_s16 + $0x70] sm:$0xff] %vm350_vm0, %v7054_v58 }
 0x676   : > { %7071 = vst.msk [vmem:[%s13417_s16 + $0x78] sm:$0xff] %vm350_vm0, %v7055_v1 }
 0x677 PF: > { %s16_s21 = sadd.s32 1, %s9424_s21  }
 0x678   : > { %p13_p4 = scmp.ge.s32.totalorder %s16_s21, 4  }
 0x67a   :  { %15 = sbr.rel (!%p13_p4) target bundleno = 1 (0x1), region = 85 }

</bundles_post_ra>
